<compile_context>
chip_gen: v7x
topology: tpu7x:2x2x1
jax: 0.10.0
libtpu: 0.0.40
codegen_flags: <defaults>
</compile_context>

<pallas_src>
import functools

import jax
import jax.numpy as jnp
from jax.experimental import pallas as pl
from jax.experimental.pallas import tpu as pltpu


# Order in which stacked weight arrays are passed to the fused kernel.
WEIGHT_ORDER = (
    "sa_w", "sa_b", "sa_wo", "sa_bo",      # self-attn  [Wq|Wk|Wv], bias, Wo, bo
    "ca_w", "ca_b", "ca_wo", "ca_bo",      # cross-attn [Wq|Wk|Wv], bias, Wo, bo
    "w1", "b1", "w2", "b2",                # FFN
    "ln_g", "ln_b",                        # per-layer norms (L, 3, 1, D)
    "fn_g", "fn_b",                        # final decoder norm (1, D)
)


# ----------------------------------------------------------------------------
# Fused decoder kernel: one grid step == one batch element, all layers inline.
# ----------------------------------------------------------------------------
def _decoder_kernel(tgt_ref, mem_ref, pos_ref, qpos_ref,
                    sa_w_ref, sa_b_ref, sa_wo_ref, sa_bo_ref,
                    ca_w_ref, ca_b_ref, ca_wo_ref, ca_bo_ref,
                    w1_ref, b1_ref, w2_ref, b2_ref,
                    ln_g_ref, ln_b_ref, fn_g_ref, fn_b_ref,
                    o_ref, kv_scratch, *, nhead, num_layers):
    D = tgt_ref.shape[-1]
    NQ = tgt_ref.shape[-2]
    SM = mem_ref.shape[-2]
    hd = D // nhead
    scale = 1.0 / float(hd) ** 0.5       # torch MHA scales q by 1/sqrt(head_dim)

    tgt = tgt_ref[0]                      # (NQ, D)
    mem = mem_ref[0]                      # (SM, D)
    qpos = qpos_ref[0]                    # (NQ, D)

    # Layer-invariant cross-attn key/value inputs written ONCE per batch step:
    #   rows [NQ      : NQ+SM  ) -> key input   (memory + pos)
    #   rows [NQ+SM   : NQ+2SM ) -> value input (memory)
    # Rows [0:NQ) hold the per-layer query input (tgt + query_pos) and are the
    # only rows refreshed inside the layer loop.
    kv_scratch[NQ:NQ + SM, :] = mem + pos_ref[0]
    kv_scratch[NQ + SM:, :] = mem

    # Per-layer LayerNorm params, loaded once (tiny), value-indexed per use.
    ln_g = ln_g_ref[...]                  # (L, 3, 1, D)
    ln_b = ln_b_ref[...]

    def layer_norm(x, g, b):
        mean = jnp.mean(x, axis=-1, keepdims=True)
        var = jnp.mean((x - mean) ** 2, axis=-1, keepdims=True)
        return (x - mean) * jax.lax.rsqrt(var + 1e-5) * g + b

    def attend(Q, K, V):
        """Per-head scaled-dot-product attention; Q,K,V: (Sq,D)/(Sk,D)/(Sk,D)."""
        Qs = Q * scale                                    # one VPU scale, all heads
        Kt = K.T                                          # one XLU transpose, all heads
        outs = []
        for h in range(nhead):                            # static unroll
            lo, hi = h * hd, (h + 1) * hd
            s = jnp.dot(Qs[:, lo:hi], Kt[lo:hi, :],
                        preferred_element_type=jnp.float32)          # (Sq, Sk)
            s = s - jnp.max(s, axis=-1, keepdims=True)
            p = jnp.exp(s)
            p = p * pl.reciprocal(jnp.sum(p, axis=-1, keepdims=True),
                                  approx=True)            # EUP vrcp (free slot)
            outs.append(jnp.dot(p, V[:, lo:hi],
                                preferred_element_type=jnp.float32))  # (Sq, hd)
        return jnp.concatenate(outs, axis=-1)             # (Sq, D)

    for l in range(num_layers):           # static loop; weights stay VMEM-resident
        # ---------------- self-attention: q = k = tgt + query_pos, v = tgt ----
        # One fused (2*NQ, D) x (D, 3D) dot:
        #   Q <- top rows,    cols [0:D)
        #   K <- top rows,    cols [D:2D)
        #   V <- bottom rows, cols [2D:3D)
        q_in = tgt + qpos
        rows_sa = jnp.concatenate([q_in, tgt], axis=0)               # (2*NQ, D)
        qkv_sa = jnp.dot(rows_sa, sa_w_ref[l],
                         preferred_element_type=jnp.float32) + sa_b_ref[l]
        sa = attend(qkv_sa[:NQ, :D], qkv_sa[:NQ, D:2 * D], qkv_sa[NQ:, 2 * D:])
        sa = jnp.dot(sa, sa_wo_ref[l],
                     preferred_element_type=jnp.float32) + sa_bo_ref[l]
        tgt = layer_norm(tgt + sa, ln_g[l, 0], ln_b[l, 0])

        # ------------- cross-attention: q = tgt+qpos, k = mem+pos, v = mem ----
        # One fused (NQ+2*SM, D) x (D, 3D) dot; only the NQ query rows of the
        # scratch change per layer, the 2*SM memory rows were written above.
        kv_scratch[:NQ, :] = tgt + qpos
        qkv_ca = jnp.dot(kv_scratch[...], ca_w_ref[l],
                         preferred_element_type=jnp.float32) + ca_b_ref[l]
        ca = attend(qkv_ca[:NQ, :D],
                    qkv_ca[NQ:NQ + SM, D:2 * D],
                    qkv_ca[NQ + SM:, 2 * D:])
        ca = jnp.dot(ca, ca_wo_ref[l],
                     preferred_element_type=jnp.float32) + ca_bo_ref[l]
        tgt = layer_norm(tgt + ca, ln_g[l, 1], ln_b[l, 1])

        # ---------------------------------- feed-forward ----------------------
        h = jnp.dot(tgt, w1_ref[l],
                    preferred_element_type=jnp.float32) + b1_ref[l]
        h = jnp.maximum(h, 0.0)           # ReLU (DETR default activation)
        ff = jnp.dot(h, w2_ref[l],
                     preferred_element_type=jnp.float32) + b2_ref[l]
        tgt = layer_norm(tgt + ff, ln_g[l, 2], ln_b[l, 2])

    # Final decoder LayerNorm (self.norm) folded into the same kernel.
    # NOTE: D=32 (<128 lanes) so this single 1 KB store is masked; not worth an
    # in-kernel relayout at this size.
    o_ref[0] = layer_norm(tgt, fn_g_ref[...], fn_b_ref[...])


# ----------------------------------------------------------------------------
# Wrapper: one pallas_call for the whole decoder.
# ----------------------------------------------------------------------------
def transformer_decoder_forward(tgt, memory, params, pos, query_pos, *, nhead):
    # TODO(synk): tgt_mask / memory_mask / key_padding_mask paths not implemented
    # (the DETR decoder call site passes all masks as None).
    B, NQ, D = tgt.shape
    SM = memory.shape[1]
    L = params["sa_w"].shape[0]

    def row_spec(S):
        return pl.BlockSpec((1, S, D), lambda b: (b, 0, 0))

    def full_spec(arr):
        nd = arr.ndim
        return pl.BlockSpec(arr.shape, lambda b, _nd=nd: (0,) * _nd)

    weights = [params[name] for name in WEIGHT_ORDER]

    out = pl.pallas_call(
        functools.partial(_decoder_kernel, nhead=nhead, num_layers=L),
        out_shape=jax.ShapeDtypeStruct((B, NQ, D), jnp.float32),
        grid=(B,),
        in_specs=[row_spec(NQ), row_spec(SM), row_spec(SM), row_spec(NQ)]
                 + [full_spec(w) for w in weights],
        out_specs=row_spec(NQ),
        scratch_shapes=[pltpu.VMEM((NQ + 2 * SM, D), jnp.float32)],
        compiler_params=pltpu.CompilerParams(
            dimension_semantics=("parallel",),      # both TCs busy on v7x
            vmem_limit_bytes=32 * 1024 * 1024,
        ),
    )(tgt, memory, pos, query_pos, *weights)

    # torch: output.unsqueeze(0) -> leading "decoder output" axis of size 1.
    return out[None]   # (1, B, NQ, D) in our batch-first convention


# ----------------------------------------------------------------------------
# Parameter construction (deterministic, synthetic), stacked per layer.
# ----------------------------------------------------------------------------
def make_params(key, num_layers, d_model, nhead, dim_ff):
    def proj(k, fan_in, fan_out):
        return (jax.random.normal(k, (fan_in, fan_out), jnp.float32)
                * (1.0 / jnp.sqrt(fan_in)))

    sa_w, sa_wo, ca_w, ca_wo, w1, w2 = [], [], [], [], [], []
    for _ in range(num_layers):
        keys = jax.random.split(key, 11)
        key = keys[0]
        sa_w.append(jnp.concatenate([proj(keys[1], d_model, d_model),
                                     proj(keys[2], d_model, d_model),
                                     proj(keys[3], d_model, d_model)], axis=1))
        sa_wo.append(proj(keys[4], d_model, d_model))
        ca_w.append(jnp.concatenate([proj(keys[5], d_model, d_model),
                                     proj(keys[6], d_model, d_model),
                                     proj(keys[7], d_model, d_model)], axis=1))
        ca_wo.append(proj(keys[8], d_model, d_model))
        w1.append(proj(keys[9], d_model, dim_ff))
        w2.append(proj(keys[10], dim_ff, d_model))

    L = num_layers
    return dict(
        sa_w=jnp.stack(sa_w),                       # (L, D, 3D)
        sa_b=jnp.zeros((L, 1, 3 * d_model), jnp.float32),
        sa_wo=jnp.stack(sa_wo),                     # (L, D, D)
        sa_bo=jnp.zeros((L, 1, d_model), jnp.float32),
        ca_w=jnp.stack(ca_w),
        ca_b=jnp.zeros((L, 1, 3 * d_model), jnp.float32),
        ca_wo=jnp.stack(ca_wo),
        ca_bo=jnp.zeros((L, 1, d_model), jnp.float32),
        w1=jnp.stack(w1),                           # (L, D, F)
        b1=jnp.zeros((L, 1, dim_ff), jnp.float32),
        w2=jnp.stack(w2),                           # (L, F, D)
        b2=jnp.zeros((L, 1, d_model), jnp.float32),
        ln_g=jnp.ones((L, 3, 1, d_model), jnp.float32),   # norm1/2/3 gammas
        ln_b=jnp.zeros((L, 3, 1, d_model), jnp.float32),  # norm1/2/3 betas
        fn_g=jnp.ones((1, d_model), jnp.float32),         # final decoder norm
        fn_b=jnp.zeros((1, d_model), jnp.float32),
    )


# ----------------------------------------------------------------------------
# Main
# ----------------------------------------------------------------------------
if __name__ == "__main__":
    B, NQ, SM, D = 2, 8, 16, 32      # batch, num queries, memory length, d_model
    NHEAD, DIM_FF, NUM_LAYERS = 4, 64, 2

    root = jax.random.PRNGKey(0)
    k_tgt, k_mem, k_pos, k_qpos, k_par = jax.random.split(root, 5)

    tgt = jax.random.normal(k_tgt, (B, NQ, D), jnp.float32)      # object queries
    memory = jax.random.normal(k_mem, (B, SM, D), jnp.float32)   # encoder output
    pos = jax.random.normal(k_pos, (B, SM, D), jnp.float32)      # spatial pos emb
    query_pos = jax.random.normal(k_qpos, (B, NQ, D), jnp.float32)

    params = make_params(k_par, NUM_LAYERS, D, NHEAD, DIM_FF)

    out = transformer_decoder_forward(tgt, memory, params, pos, query_pos,
                                      nhead=NHEAD)
    out = jax.block_until_ready(out)
    assert out.shape == (1, B, NQ, D), out.shape
    assert bool(jnp.all(jnp.isfinite(out)))
    print("KERNEL_OK")
</pallas_src>

<mosaic_0001>
module attributes {stable_mosaic.version = 11 : i64} {
  func.func @_decoder_kernel(%arg0: i32, %arg1: memref<1x8x32xf32, #tpu.memory_space<vmem>>, %arg2: memref<1x16x32xf32, #tpu.memory_space<vmem>>, %arg3: memref<1x16x32xf32, #tpu.memory_space<vmem>>, %arg4: memref<1x8x32xf32, #tpu.memory_space<vmem>>, %arg5: memref<2x32x96xf32, #tpu.memory_space<vmem>>, %arg6: memref<2x1x96xf32, #tpu.memory_space<vmem>>, %arg7: memref<2x32x32xf32, #tpu.memory_space<vmem>>, %arg8: memref<2x1x32xf32, #tpu.memory_space<vmem>>, %arg9: memref<2x32x96xf32, #tpu.memory_space<vmem>>, %arg10: memref<2x1x96xf32, #tpu.memory_space<vmem>>, %arg11: memref<2x32x32xf32, #tpu.memory_space<vmem>>, %arg12: memref<2x1x32xf32, #tpu.memory_space<vmem>>, %arg13: memref<2x32x64xf32, #tpu.memory_space<vmem>>, %arg14: memref<2x1x64xf32, #tpu.memory_space<vmem>>, %arg15: memref<2x64x32xf32, #tpu.memory_space<vmem>>, %arg16: memref<2x1x32xf32, #tpu.memory_space<vmem>>, %arg17: memref<2x3x1x32xf32, #tpu.memory_space<vmem>>, %arg18: memref<2x3x1x32xf32, #tpu.memory_space<vmem>>, %arg19: memref<1x32xf32, #tpu.memory_space<vmem>>, %arg20: memref<1x32xf32, #tpu.memory_space<vmem>>, %arg21: memref<1x8x32xf32, #tpu.memory_space<vmem>>, %arg22: memref<40x32xf32, #tpu.memory_space<vmem>>) attributes {dimension_semantics = [#tpu.dimension_semantics<parallel>], iteration_bounds = array<i64: 2>, scalar_prefetch = 0 : i64, scratch_operands = 1 : i64, tpu.core_type = #tpu.core_type<tc>, window_params = [{transform_indices = @transform_0, window_bounds = array<i64: 1, 8, 32>}, {transform_indices = @transform_1, window_bounds = array<i64: 1, 16, 32>}, {transform_indices = @transform_2, window_bounds = array<i64: 1, 16, 32>}, {transform_indices = @transform_3, window_bounds = array<i64: 1, 8, 32>}, {pipeline_mode = #tpu.pipeline_mode<synchronous>, transform_indices = @transform_4, window_bounds = array<i64: 2, 32, 96>}, {pipeline_mode = #tpu.pipeline_mode<synchronous>, transform_indices = @transform_5, window_bounds = array<i64: 2, 1, 96>}, {pipeline_mode = #tpu.pipeline_mode<synchronous>, transform_indices = @transform_6, window_bounds = array<i64: 2, 32, 32>}, {pipeline_mode = #tpu.pipeline_mode<synchronous>, transform_indices = @transform_7, window_bounds = array<i64: 2, 1, 32>}, {pipeline_mode = #tpu.pipeline_mode<synchronous>, transform_indices = @transform_8, window_bounds = array<i64: 2, 32, 96>}, {pipeline_mode = #tpu.pipeline_mode<synchronous>, transform_indices = @transform_9, window_bounds = array<i64: 2, 1, 96>}, {pipeline_mode = #tpu.pipeline_mode<synchronous>, transform_indices = @transform_10, window_bounds = array<i64: 2, 32, 32>}, {pipeline_mode = #tpu.pipeline_mode<synchronous>, transform_indices = @transform_11, window_bounds = array<i64: 2, 1, 32>}, {pipeline_mode = #tpu.pipeline_mode<synchronous>, transform_indices = @transform_12, window_bounds = array<i64: 2, 32, 64>}, {pipeline_mode = #tpu.pipeline_mode<synchronous>, transform_indices = @transform_13, window_bounds = array<i64: 2, 1, 64>}, {pipeline_mode = #tpu.pipeline_mode<synchronous>, transform_indices = @transform_14, window_bounds = array<i64: 2, 64, 32>}, {pipeline_mode = #tpu.pipeline_mode<synchronous>, transform_indices = @transform_15, window_bounds = array<i64: 2, 1, 32>}, {pipeline_mode = #tpu.pipeline_mode<synchronous>, transform_indices = @transform_16, window_bounds = array<i64: 2, 3, 1, 32>}, {pipeline_mode = #tpu.pipeline_mode<synchronous>, transform_indices = @transform_17, window_bounds = array<i64: 2, 3, 1, 32>}, {pipeline_mode = #tpu.pipeline_mode<synchronous>, transform_indices = @transform_18, window_bounds = array<i64: 1, 32>}, {pipeline_mode = #tpu.pipeline_mode<synchronous>, transform_indices = @transform_19, window_bounds = array<i64: 1, 32>}, {transform_indices = @transform_20, window_bounds = array<i64: 1, 8, 32>}]} {
    %c0 = arith.constant 0 : index
    %c0_0 = arith.constant 0 : index
    %c0_1 = arith.constant 0 : index
    %0 = vector.load %arg1[%c0, %c0_0, %c0_1] : memref<1x8x32xf32, #tpu.memory_space<vmem>>, vector<1x8x32xf32>
    %1 = vector.shape_cast %0 : vector<1x8x32xf32> to vector<8x32xf32>
    %c0_2 = arith.constant 0 : index
    %c0_3 = arith.constant 0 : index
    %c0_4 = arith.constant 0 : index
    %2 = vector.load %arg2[%c0_2, %c0_3, %c0_4] : memref<1x16x32xf32, #tpu.memory_space<vmem>>, vector<1x16x32xf32>
    %3 = vector.shape_cast %2 : vector<1x16x32xf32> to vector<16x32xf32>
    %c0_5 = arith.constant 0 : index
    %c0_6 = arith.constant 0 : index
    %c0_7 = arith.constant 0 : index
    %4 = vector.load %arg4[%c0_5, %c0_6, %c0_7] : memref<1x8x32xf32, #tpu.memory_space<vmem>>, vector<1x8x32xf32>
    %5 = vector.shape_cast %4 : vector<1x8x32xf32> to vector<8x32xf32>
    %c0_8 = arith.constant 0 : index
    %c0_9 = arith.constant 0 : index
    %c0_10 = arith.constant 0 : index
    %6 = vector.load %arg3[%c0_8, %c0_9, %c0_10] : memref<1x16x32xf32, #tpu.memory_space<vmem>>, vector<1x16x32xf32>
    %7 = vector.shape_cast %6 : vector<1x16x32xf32> to vector<16x32xf32>
    %8 = arith.addf %3, %7 : vector<16x32xf32>
    %c8 = arith.constant 8 : index
    %c0_11 = arith.constant 0 : index
    %9 = vector.load %arg22[%c8, %c0_11] : memref<40x32xf32, #tpu.memory_space<vmem>>, vector<16x32xf32>
    tpu.vector_store %arg22[%c8, %c0_11], %8 {strides = array<i32>} : memref<40x32xf32, #tpu.memory_space<vmem>>, vector<16x32xf32>,
    %c24 = arith.constant 24 : index
    %c0_12 = arith.constant 0 : index
    %10 = vector.load %arg22[%c24, %c0_12] : memref<40x32xf32, #tpu.memory_space<vmem>>, vector<16x32xf32>
    tpu.vector_store %arg22[%c24, %c0_12], %3 {strides = array<i32>} : memref<40x32xf32, #tpu.memory_space<vmem>>, vector<16x32xf32>,
    %c0_13 = arith.constant 0 : index
    %c0_14 = arith.constant 0 : index
    %c0_15 = arith.constant 0 : index
    %c0_16 = arith.constant 0 : index
    %11 = vector.load %arg17[%c0_13, %c0_14, %c0_15, %c0_16] : memref<2x3x1x32xf32, #tpu.memory_space<vmem>>, vector<2x3x1x32xf32>
    %c0_17 = arith.constant 0 : index
    %c0_18 = arith.constant 0 : index
    %c0_19 = arith.constant 0 : index
    %c0_20 = arith.constant 0 : index
    %12 = vector.load %arg18[%c0_17, %c0_18, %c0_19, %c0_20] : memref<2x3x1x32xf32, #tpu.memory_space<vmem>>, vector<2x3x1x32xf32>
    %13 = arith.addf %1, %5 : vector<8x32xf32>
    %14 = tpu.concatenate %13, %1 in 0 : vector<8x32xf32>, vector<8x32xf32> -> vector<16x32xf32>
    %c0_21 = arith.constant 0 : index
    %c0_22 = arith.constant 0 : index
    %c0_23 = arith.constant 0 : index
    %15 = vector.load %arg5[%c0_21, %c0_22, %c0_23] : memref<2x32x96xf32, #tpu.memory_space<vmem>>, vector<1x32x96xf32>
    %16 = vector.shape_cast %15 : vector<1x32x96xf32> to vector<32x96xf32>
    %cst = arith.constant dense<0.000000e+00> : vector<16x96xf32>
    %17 = tpu.matmul %14, %16, %cst {dimension_numbers = #tpu.dot_dimension_numbers<[1], [0], [0], [1], [0, 0, 1, 1], [], []>} : vector<16x32xf32>, vector<32x96xf32>, vector<16x96xf32> -> vector<16x96xf32>
    %c0_24 = arith.constant 0 : index
    %c0_25 = arith.constant 0 : index
    %c0_26 = arith.constant 0 : index
    %18 = vector.load %arg6[%c0_24, %c0_25, %c0_26] : memref<2x1x96xf32, #tpu.memory_space<vmem>>, vector<1x1x96xf32>
    %19 = vector.shape_cast %18 : vector<1x1x96xf32> to vector<1x96xf32>
    %20 = vector.broadcast %19 : vector<1x96xf32> to vector<16x96xf32>
    %21 = arith.addf %17, %20 : vector<16x96xf32>
    %22 = vector.extract_strided_slice %21 {offsets = [0, 0], sizes = [8, 32], strides = [1, 1]} : vector<16x96xf32> to vector<8x32xf32>
    %23 = vector.extract_strided_slice %21 {offsets = [0, 32], sizes = [8, 32], strides = [1, 1]} : vector<16x96xf32> to vector<8x32xf32>
    %24 = vector.extract_strided_slice %21 {offsets = [8, 64], sizes = [8, 32], strides = [1, 1]} : vector<16x96xf32> to vector<8x32xf32>
    %cst_27 = arith.constant 0.353553385 : f32
    %25 = vector.broadcast %cst_27 : f32 to vector<8x32xf32>
    %26 = arith.mulf %22, %25 : vector<8x32xf32>
    %27 = tpu.transpose %23, [1, 0] : vector<8x32xf32> -> vector<32x8xf32>
    %28 = vector.extract_strided_slice %26 {offsets = [0, 0], sizes = [8, 8], strides = [1, 1]} : vector<8x32xf32> to vector<8x8xf32>
    %29 = vector.extract_strided_slice %27 {offsets = [0, 0], sizes = [8, 8], strides = [1, 1]} : vector<32x8xf32> to vector<8x8xf32>
    %cst_28 = arith.constant dense<0.000000e+00> : vector<8x8xf32>
    %30 = tpu.matmul %28, %29, %cst_28 {dimension_numbers = #tpu.dot_dimension_numbers<[1], [0], [0], [1], [0, 0, 1, 1], [], []>} : vector<8x8xf32>, vector<8x8xf32>, vector<8x8xf32> -> vector<8x8xf32>
    %cst_29 = arith.constant dense<0xFF800000> : vector<8xf32>
    %31 = vector.multi_reduction <maximumf>, %30, %cst_29 [1] : vector<8x8xf32> to vector<8xf32>
    %32 = vector.shape_cast %31 : vector<8xf32> to vector<8x1xf32>
    %33 = vector.broadcast %32 : vector<8x1xf32> to vector<8x8xf32>
    %34 = arith.subf %30, %33 : vector<8x8xf32>
    %35 = math.exp %34 : vector<8x8xf32>
    %cst_30 = arith.constant dense<0.000000e+00> : vector<8xf32>
    %36 = vector.multi_reduction <add>, %35, %cst_30 [1] : vector<8x8xf32> to vector<8xf32>
    %37 = vector.shape_cast %36 : vector<8xf32> to vector<8x1xf32>
    %38 = tpu.reciprocal %37 {approx = true} : vector<8x1xf32> -> vector<8x1xf32>
    %39 = vector.broadcast %38 : vector<8x1xf32> to vector<8x8xf32>
    %40 = arith.mulf %35, %39 : vector<8x8xf32>
    %41 = vector.extract_strided_slice %24 {offsets = [0, 0], sizes = [8, 8], strides = [1, 1]} : vector<8x32xf32> to vector<8x8xf32>
    %cst_31 = arith.constant dense<0.000000e+00> : vector<8x8xf32>
    %42 = tpu.matmul %40, %41, %cst_31 {dimension_numbers = #tpu.dot_dimension_numbers<[1], [0], [0], [1], [0, 0, 1, 1], [], []>} : vector<8x8xf32>, vector<8x8xf32>, vector<8x8xf32> -> vector<8x8xf32>
    %43 = vector.extract_strided_slice %26 {offsets = [0, 8], sizes = [8, 8], strides = [1, 1]} : vector<8x32xf32> to vector<8x8xf32>
    %44 = vector.extract_strided_slice %27 {offsets = [8, 0], sizes = [8, 8], strides = [1, 1]} : vector<32x8xf32> to vector<8x8xf32>
    %cst_32 = arith.constant dense<0.000000e+00> : vector<8x8xf32>
    %45 = tpu.matmul %43, %44, %cst_32 {dimension_numbers = #tpu.dot_dimension_numbers<[1], [0], [0], [1], [0, 0, 1, 1], [], []>} : vector<8x8xf32>, vector<8x8xf32>, vector<8x8xf32> -> vector<8x8xf32>
    %cst_33 = arith.constant dense<0xFF800000> : vector<8xf32>
    %46 = vector.multi_reduction <maximumf>, %45, %cst_33 [1] : vector<8x8xf32> to vector<8xf32>
    %47 = vector.shape_cast %46 : vector<8xf32> to vector<8x1xf32>
    %48 = vector.broadcast %47 : vector<8x1xf32> to vector<8x8xf32>
    %49 = arith.subf %45, %48 : vector<8x8xf32>
    %50 = math.exp %49 : vector<8x8xf32>
    %cst_34 = arith.constant dense<0.000000e+00> : vector<8xf32>
    %51 = vector.multi_reduction <add>, %50, %cst_34 [1] : vector<8x8xf32> to vector<8xf32>
    %52 = vector.shape_cast %51 : vector<8xf32> to vector<8x1xf32>
    %53 = tpu.reciprocal %52 {approx = true} : vector<8x1xf32> -> vector<8x1xf32>
    %54 = vector.broadcast %53 : vector<8x1xf32> to vector<8x8xf32>
    %55 = arith.mulf %50, %54 : vector<8x8xf32>
    %56 = vector.extract_strided_slice %24 {offsets = [0, 8], sizes = [8, 8], strides = [1, 1]} : vector<8x32xf32> to vector<8x8xf32>
    %cst_35 = arith.constant dense<0.000000e+00> : vector<8x8xf32>
    %57 = tpu.matmul %55, %56, %cst_35 {dimension_numbers = #tpu.dot_dimension_numbers<[1], [0], [0], [1], [0, 0, 1, 1], [], []>} : vector<8x8xf32>, vector<8x8xf32>, vector<8x8xf32> -> vector<8x8xf32>
    %58 = vector.extract_strided_slice %26 {offsets = [0, 16], sizes = [8, 8], strides = [1, 1]} : vector<8x32xf32> to vector<8x8xf32>
    %59 = vector.extract_strided_slice %27 {offsets = [16, 0], sizes = [8, 8], strides = [1, 1]} : vector<32x8xf32> to vector<8x8xf32>
    %cst_36 = arith.constant dense<0.000000e+00> : vector<8x8xf32>
    %60 = tpu.matmul %58, %59, %cst_36 {dimension_numbers = #tpu.dot_dimension_numbers<[1], [0], [0], [1], [0, 0, 1, 1], [], []>} : vector<8x8xf32>, vector<8x8xf32>, vector<8x8xf32> -> vector<8x8xf32>
    %cst_37 = arith.constant dense<0xFF800000> : vector<8xf32>
    %61 = vector.multi_reduction <maximumf>, %60, %cst_37 [1] : vector<8x8xf32> to vector<8xf32>
    %62 = vector.shape_cast %61 : vector<8xf32> to vector<8x1xf32>
    %63 = vector.broadcast %62 : vector<8x1xf32> to vector<8x8xf32>
    %64 = arith.subf %60, %63 : vector<8x8xf32>
    %65 = math.exp %64 : vector<8x8xf32>
    %cst_38 = arith.constant dense<0.000000e+00> : vector<8xf32>
    %66 = vector.multi_reduction <add>, %65, %cst_38 [1] : vector<8x8xf32> to vector<8xf32>
    %67 = vector.shape_cast %66 : vector<8xf32> to vector<8x1xf32>
    %68 = tpu.reciprocal %67 {approx = true} : vector<8x1xf32> -> vector<8x1xf32>
    %69 = vector.broadcast %68 : vector<8x1xf32> to vector<8x8xf32>
    %70 = arith.mulf %65, %69 : vector<8x8xf32>
    %71 = vector.extract_strided_slice %24 {offsets = [0, 16], sizes = [8, 8], strides = [1, 1]} : vector<8x32xf32> to vector<8x8xf32>
    %cst_39 = arith.constant dense<0.000000e+00> : vector<8x8xf32>
    %72 = tpu.matmul %70, %71, %cst_39 {dimension_numbers = #tpu.dot_dimension_numbers<[1], [0], [0], [1], [0, 0, 1, 1], [], []>} : vector<8x8xf32>, vector<8x8xf32>, vector<8x8xf32> -> vector<8x8xf32>
    %73 = vector.extract_strided_slice %26 {offsets = [0, 24], sizes = [8, 8], strides = [1, 1]} : vector<8x32xf32> to vector<8x8xf32>
    %74 = vector.extract_strided_slice %27 {offsets = [24, 0], sizes = [8, 8], strides = [1, 1]} : vector<32x8xf32> to vector<8x8xf32>
    %cst_40 = arith.constant dense<0.000000e+00> : vector<8x8xf32>
    %75 = tpu.matmul %73, %74, %cst_40 {dimension_numbers = #tpu.dot_dimension_numbers<[1], [0], [0], [1], [0, 0, 1, 1], [], []>} : vector<8x8xf32>, vector<8x8xf32>, vector<8x8xf32> -> vector<8x8xf32>
    %cst_41 = arith.constant dense<0xFF800000> : vector<8xf32>
    %76 = vector.multi_reduction <maximumf>, %75, %cst_41 [1] : vector<8x8xf32> to vector<8xf32>
    %77 = vector.shape_cast %76 : vector<8xf32> to vector<8x1xf32>
    %78 = vector.broadcast %77 : vector<8x1xf32> to vector<8x8xf32>
    %79 = arith.subf %75, %78 : vector<8x8xf32>
    %80 = math.exp %79 : vector<8x8xf32>
    %cst_42 = arith.constant dense<0.000000e+00> : vector<8xf32>
    %81 = vector.multi_reduction <add>, %80, %cst_42 [1] : vector<8x8xf32> to vector<8xf32>
    %82 = vector.shape_cast %81 : vector<8xf32> to vector<8x1xf32>
    %83 = tpu.reciprocal %82 {approx = true} : vector<8x1xf32> -> vector<8x1xf32>
    %84 = vector.broadcast %83 : vector<8x1xf32> to vector<8x8xf32>
    %85 = arith.mulf %80, %84 : vector<8x8xf32>
    %86 = vector.extract_strided_slice %24 {offsets = [0, 24], sizes = [8, 8], strides = [1, 1]} : vector<8x32xf32> to vector<8x8xf32>
    %cst_43 = arith.constant dense<0.000000e+00> : vector<8x8xf32>
    %87 = tpu.matmul %85, %86, %cst_43 {dimension_numbers = #tpu.dot_dimension_numbers<[1], [0], [0], [1], [0, 0, 1, 1], [], []>} : vector<8x8xf32>, vector<8x8xf32>, vector<8x8xf32> -> vector<8x8xf32>
    %88 = tpu.concatenate %42, %57, %72, %87 in 1 : vector<8x8xf32>, vector<8x8xf32>, vector<8x8xf32>, vector<8x8xf32> -> vector<8x32xf32>
    %c0_44 = arith.constant 0 : index
    %c0_45 = arith.constant 0 : index
    %c0_46 = arith.constant 0 : index
    %89 = vector.load %arg7[%c0_44, %c0_45, %c0_46] : memref<2x32x32xf32, #tpu.memory_space<vmem>>, vector<1x32x32xf32>
    %90 = vector.shape_cast %89 : vector<1x32x32xf32> to vector<32x32xf32>
    %cst_47 = arith.constant dense<0.000000e+00> : vector<8x32xf32>
    %91 = tpu.matmul %88, %90, %cst_47 {dimension_numbers = #tpu.dot_dimension_numbers<[1], [0], [0], [1], [0, 0, 1, 1], [], []>} : vector<8x32xf32>, vector<32x32xf32>, vector<8x32xf32> -> vector<8x32xf32>
    %c0_48 = arith.constant 0 : index
    %c0_49 = arith.constant 0 : index
    %c0_50 = arith.constant 0 : index
    %92 = vector.load %arg8[%c0_48, %c0_49, %c0_50] : memref<2x1x32xf32, #tpu.memory_space<vmem>>, vector<1x1x32xf32>
    %93 = vector.shape_cast %92 : vector<1x1x32xf32> to vector<1x32xf32>
    %94 = vector.broadcast %93 : vector<1x32xf32> to vector<8x32xf32>
    %95 = arith.addf %91, %94 : vector<8x32xf32>
    %96 = arith.addf %1, %95 : vector<8x32xf32>
    %97 = vector.extract_strided_slice %11 {offsets = [0, 0, 0, 0], sizes = [1, 1, 1, 32], strides = [1, 1, 1, 1]} : vector<2x3x1x32xf32> to vector<1x1x1x32xf32>
    %98 = vector.shape_cast %97 : vector<1x1x1x32xf32> to vector<1x32xf32>
    %99 = vector.extract_strided_slice %12 {offsets = [0, 0, 0, 0], sizes = [1, 1, 1, 32], strides = [1, 1, 1, 1]} : vector<2x3x1x32xf32> to vector<1x1x1x32xf32>
    %100 = vector.shape_cast %99 : vector<1x1x1x32xf32> to vector<1x32xf32>
    %cst_51 = arith.constant dense<0.000000e+00> : vector<8xf32>
    %101 = vector.multi_reduction <add>, %96, %cst_51 [1] : vector<8x32xf32> to vector<8xf32>
    %102 = vector.shape_cast %101 : vector<8xf32> to vector<8x1xf32>
    %cst_52 = arith.constant 3.200000e+01 : f32
    %103 = vector.broadcast %cst_52 : f32 to vector<8x1xf32>
    %104 = arith.divf %102, %103 : vector<8x1xf32>
    %105 = vector.broadcast %104 : vector<8x1xf32> to vector<8x32xf32>
    %106 = arith.subf %96, %105 : vector<8x32xf32>
    %107 = arith.mulf %106, %106 : vector<8x32xf32>
    %cst_53 = arith.constant dense<0.000000e+00> : vector<8xf32>
    %108 = vector.multi_reduction <add>, %107, %cst_53 [1] : vector<8x32xf32> to vector<8xf32>
    %109 = vector.shape_cast %108 : vector<8xf32> to vector<8x1xf32>
    %cst_54 = arith.constant 3.200000e+01 : f32
    %110 = vector.broadcast %cst_54 : f32 to vector<8x1xf32>
    %111 = arith.divf %109, %110 : vector<8x1xf32>
    %112 = vector.broadcast %104 : vector<8x1xf32> to vector<8x32xf32>
    %113 = arith.subf %96, %112 : vector<8x32xf32>
    %cst_55 = arith.constant 9.99999974E-6 : f32
    %114 = vector.broadcast %cst_55 : f32 to vector<8x1xf32>
    %115 = arith.addf %111, %114 : vector<8x1xf32>
    %116 = math.rsqrt %115 : vector<8x1xf32>
    %117 = vector.broadcast %116 : vector<8x1xf32> to vector<8x32xf32>
    %118 = arith.mulf %113, %117 : vector<8x32xf32>
    %119 = vector.broadcast %98 : vector<1x32xf32> to vector<8x32xf32>
    %120 = arith.mulf %118, %119 : vector<8x32xf32>
    %121 = vector.broadcast %100 : vector<1x32xf32> to vector<8x32xf32>
    %122 = arith.addf %120, %121 : vector<8x32xf32>
    %123 = arith.addf %122, %5 : vector<8x32xf32>
    %c0_56 = arith.constant 0 : index
    %c0_57 = arith.constant 0 : index
    %124 = vector.load %arg22[%c0_56, %c0_57] : memref<40x32xf32, #tpu.memory_space<vmem>>, vector<8x32xf32>
    tpu.vector_store %arg22[%c0_56, %c0_57], %123 {strides = array<i32>} : memref<40x32xf32, #tpu.memory_space<vmem>>, vector<8x32xf32>,
    %c0_58 = arith.constant 0 : index
    %c0_59 = arith.constant 0 : index
    %125 = vector.load %arg22[%c0_58, %c0_59] : memref<40x32xf32, #tpu.memory_space<vmem>>, vector<40x32xf32>
    %c0_60 = arith.constant 0 : index
    %c0_61 = arith.constant 0 : index
    %c0_62 = arith.constant 0 : index
    %126 = vector.load %arg9[%c0_60, %c0_61, %c0_62] : memref<2x32x96xf32, #tpu.memory_space<vmem>>, vector<1x32x96xf32>
    %127 = vector.shape_cast %126 : vector<1x32x96xf32> to vector<32x96xf32>
    %cst_63 = arith.constant dense<0.000000e+00> : vector<40x96xf32>
    %128 = tpu.matmul %125, %127, %cst_63 {dimension_numbers = #tpu.dot_dimension_numbers<[1], [0], [0], [1], [0, 0, 1, 1], [], []>} : vector<40x32xf32>, vector<32x96xf32>, vector<40x96xf32> -> vector<40x96xf32>
    %c0_64 = arith.constant 0 : index
    %c0_65 = arith.constant 0 : index
    %c0_66 = arith.constant 0 : index
    %129 = vector.load %arg10[%c0_64, %c0_65, %c0_66] : memref<2x1x96xf32, #tpu.memory_space<vmem>>, vector<1x1x96xf32>
    %130 = vector.shape_cast %129 : vector<1x1x96xf32> to vector<1x96xf32>
    %131 = vector.broadcast %130 : vector<1x96xf32> to vector<40x96xf32>
    %132 = arith.addf %128, %131 : vector<40x96xf32>
    %133 = vector.extract_strided_slice %132 {offsets = [0, 0], sizes = [8, 32], strides = [1, 1]} : vector<40x96xf32> to vector<8x32xf32>
    %134 = vector.extract_strided_slice %132 {offsets = [8, 32], sizes = [16, 32], strides = [1, 1]} : vector<40x96xf32> to vector<16x32xf32>
    %135 = vector.extract_strided_slice %132 {offsets = [24, 64], sizes = [16, 32], strides = [1, 1]} : vector<40x96xf32> to vector<16x32xf32>
    %cst_67 = arith.constant 0.353553385 : f32
    %136 = vector.broadcast %cst_67 : f32 to vector<8x32xf32>
    %137 = arith.mulf %133, %136 : vector<8x32xf32>
    %138 = tpu.transpose %134, [1, 0] : vector<16x32xf32> -> vector<32x16xf32>
    %139 = vector.extract_strided_slice %137 {offsets = [0, 0], sizes = [8, 8], strides = [1, 1]} : vector<8x32xf32> to vector<8x8xf32>
    %140 = vector.extract_strided_slice %138 {offsets = [0, 0], sizes = [8, 16], strides = [1, 1]} : vector<32x16xf32> to vector<8x16xf32>
    %cst_68 = arith.constant dense<0.000000e+00> : vector<8x16xf32>
    %141 = tpu.matmul %139, %140, %cst_68 {dimension_numbers = #tpu.dot_dimension_numbers<[1], [0], [0], [1], [0, 0, 1, 1], [], []>} : vector<8x8xf32>, vector<8x16xf32>, vector<8x16xf32> -> vector<8x16xf32>
    %cst_69 = arith.constant dense<0xFF800000> : vector<8xf32>
    %142 = vector.multi_reduction <maximumf>, %141, %cst_69 [1] : vector<8x16xf32> to vector<8xf32>
    %143 = vector.shape_cast %142 : vector<8xf32> to vector<8x1xf32>
    %144 = vector.broadcast %143 : vector<8x1xf32> to vector<8x16xf32>
    %145 = arith.subf %141, %144 : vector<8x16xf32>
    %146 = math.exp %145 : vector<8x16xf32>
    %cst_70 = arith.constant dense<0.000000e+00> : vector<8xf32>
    %147 = vector.multi_reduction <add>, %146, %cst_70 [1] : vector<8x16xf32> to vector<8xf32>
    %148 = vector.shape_cast %147 : vector<8xf32> to vector<8x1xf32>
    %149 = tpu.reciprocal %148 {approx = true} : vector<8x1xf32> -> vector<8x1xf32>
    %150 = vector.broadcast %149 : vector<8x1xf32> to vector<8x16xf32>
    %151 = arith.mulf %146, %150 : vector<8x16xf32>
    %152 = vector.extract_strided_slice %135 {offsets = [0, 0], sizes = [16, 8], strides = [1, 1]} : vector<16x32xf32> to vector<16x8xf32>
    %cst_71 = arith.constant dense<0.000000e+00> : vector<8x8xf32>
    %153 = tpu.matmul %151, %152, %cst_71 {dimension_numbers = #tpu.dot_dimension_numbers<[1], [0], [0], [1], [0, 0, 1, 1], [], []>} : vector<8x16xf32>, vector<16x8xf32>, vector<8x8xf32> -> vector<8x8xf32>
    %154 = vector.extract_strided_slice %137 {offsets = [0, 8], sizes = [8, 8], strides = [1, 1]} : vector<8x32xf32> to vector<8x8xf32>
    %155 = vector.extract_strided_slice %138 {offsets = [8, 0], sizes = [8, 16], strides = [1, 1]} : vector<32x16xf32> to vector<8x16xf32>
    %cst_72 = arith.constant dense<0.000000e+00> : vector<8x16xf32>
    %156 = tpu.matmul %154, %155, %cst_72 {dimension_numbers = #tpu.dot_dimension_numbers<[1], [0], [0], [1], [0, 0, 1, 1], [], []>} : vector<8x8xf32>, vector<8x16xf32>, vector<8x16xf32> -> vector<8x16xf32>
    %cst_73 = arith.constant dense<0xFF800000> : vector<8xf32>
    %157 = vector.multi_reduction <maximumf>, %156, %cst_73 [1] : vector<8x16xf32> to vector<8xf32>
    %158 = vector.shape_cast %157 : vector<8xf32> to vector<8x1xf32>
    %159 = vector.broadcast %158 : vector<8x1xf32> to vector<8x16xf32>
    %160 = arith.subf %156, %159 : vector<8x16xf32>
    %161 = math.exp %160 : vector<8x16xf32>
    %cst_74 = arith.constant dense<0.000000e+00> : vector<8xf32>
    %162 = vector.multi_reduction <add>, %161, %cst_74 [1] : vector<8x16xf32> to vector<8xf32>
    %163 = vector.shape_cast %162 : vector<8xf32> to vector<8x1xf32>
    %164 = tpu.reciprocal %163 {approx = true} : vector<8x1xf32> -> vector<8x1xf32>
    %165 = vector.broadcast %164 : vector<8x1xf32> to vector<8x16xf32>
    %166 = arith.mulf %161, %165 : vector<8x16xf32>
    %167 = vector.extract_strided_slice %135 {offsets = [0, 8], sizes = [16, 8], strides = [1, 1]} : vector<16x32xf32> to vector<16x8xf32>
    %cst_75 = arith.constant dense<0.000000e+00> : vector<8x8xf32>
    %168 = tpu.matmul %166, %167, %cst_75 {dimension_numbers = #tpu.dot_dimension_numbers<[1], [0], [0], [1], [0, 0, 1, 1], [], []>} : vector<8x16xf32>, vector<16x8xf32>, vector<8x8xf32> -> vector<8x8xf32>
    %169 = vector.extract_strided_slice %137 {offsets = [0, 16], sizes = [8, 8], strides = [1, 1]} : vector<8x32xf32> to vector<8x8xf32>
    %170 = vector.extract_strided_slice %138 {offsets = [16, 0], sizes = [8, 16], strides = [1, 1]} : vector<32x16xf32> to vector<8x16xf32>
    %cst_76 = arith.constant dense<0.000000e+00> : vector<8x16xf32>
    %171 = tpu.matmul %169, %170, %cst_76 {dimension_numbers = #tpu.dot_dimension_numbers<[1], [0], [0], [1], [0, 0, 1, 1], [], []>} : vector<8x8xf32>, vector<8x16xf32>, vector<8x16xf32> -> vector<8x16xf32>
    %cst_77 = arith.constant dense<0xFF800000> : vector<8xf32>
    %172 = vector.multi_reduction <maximumf>, %171, %cst_77 [1] : vector<8x16xf32> to vector<8xf32>
    %173 = vector.shape_cast %172 : vector<8xf32> to vector<8x1xf32>
    %174 = vector.broadcast %173 : vector<8x1xf32> to vector<8x16xf32>
    %175 = arith.subf %171, %174 : vector<8x16xf32>
    %176 = math.exp %175 : vector<8x16xf32>
    %cst_78 = arith.constant dense<0.000000e+00> : vector<8xf32>
    %177 = vector.multi_reduction <add>, %176, %cst_78 [1] : vector<8x16xf32> to vector<8xf32>
    %178 = vector.shape_cast %177 : vector<8xf32> to vector<8x1xf32>
    %179 = tpu.reciprocal %178 {approx = true} : vector<8x1xf32> -> vector<8x1xf32>
    %180 = vector.broadcast %179 : vector<8x1xf32> to vector<8x16xf32>
    %181 = arith.mulf %176, %180 : vector<8x16xf32>
    %182 = vector.extract_strided_slice %135 {offsets = [0, 16], sizes = [16, 8], strides = [1, 1]} : vector<16x32xf32> to vector<16x8xf32>
    %cst_79 = arith.constant dense<0.000000e+00> : vector<8x8xf32>
    %183 = tpu.matmul %181, %182, %cst_79 {dimension_numbers = #tpu.dot_dimension_numbers<[1], [0], [0], [1], [0, 0, 1, 1], [], []>} : vector<8x16xf32>, vector<16x8xf32>, vector<8x8xf32> -> vector<8x8xf32>
    %184 = vector.extract_strided_slice %137 {offsets = [0, 24], sizes = [8, 8], strides = [1, 1]} : vector<8x32xf32> to vector<8x8xf32>
    %185 = vector.extract_strided_slice %138 {offsets = [24, 0], sizes = [8, 16], strides = [1, 1]} : vector<32x16xf32> to vector<8x16xf32>
    %cst_80 = arith.constant dense<0.000000e+00> : vector<8x16xf32>
    %186 = tpu.matmul %184, %185, %cst_80 {dimension_numbers = #tpu.dot_dimension_numbers<[1], [0], [0], [1], [0, 0, 1, 1], [], []>} : vector<8x8xf32>, vector<8x16xf32>, vector<8x16xf32> -> vector<8x16xf32>
    %cst_81 = arith.constant dense<0xFF800000> : vector<8xf32>
    %187 = vector.multi_reduction <maximumf>, %186, %cst_81 [1] : vector<8x16xf32> to vector<8xf32>
    %188 = vector.shape_cast %187 : vector<8xf32> to vector<8x1xf32>
    %189 = vector.broadcast %188 : vector<8x1xf32> to vector<8x16xf32>
    %190 = arith.subf %186, %189 : vector<8x16xf32>
    %191 = math.exp %190 : vector<8x16xf32>
    %cst_82 = arith.constant dense<0.000000e+00> : vector<8xf32>
    %192 = vector.multi_reduction <add>, %191, %cst_82 [1] : vector<8x16xf32> to vector<8xf32>
    %193 = vector.shape_cast %192 : vector<8xf32> to vector<8x1xf32>
    %194 = tpu.reciprocal %193 {approx = true} : vector<8x1xf32> -> vector<8x1xf32>
    %195 = vector.broadcast %194 : vector<8x1xf32> to vector<8x16xf32>
    %196 = arith.mulf %191, %195 : vector<8x16xf32>
    %197 = vector.extract_strided_slice %135 {offsets = [0, 24], sizes = [16, 8], strides = [1, 1]} : vector<16x32xf32> to vector<16x8xf32>
    %cst_83 = arith.constant dense<0.000000e+00> : vector<8x8xf32>
    %198 = tpu.matmul %196, %197, %cst_83 {dimension_numbers = #tpu.dot_dimension_numbers<[1], [0], [0], [1], [0, 0, 1, 1], [], []>} : vector<8x16xf32>, vector<16x8xf32>, vector<8x8xf32> -> vector<8x8xf32>
    %199 = tpu.concatenate %153, %168, %183, %198 in 1 : vector<8x8xf32>, vector<8x8xf32>, vector<8x8xf32>, vector<8x8xf32> -> vector<8x32xf32>
    %c0_84 = arith.constant 0 : index
    %c0_85 = arith.constant 0 : index
    %c0_86 = arith.constant 0 : index
    %200 = vector.load %arg11[%c0_84, %c0_85, %c0_86] : memref<2x32x32xf32, #tpu.memory_space<vmem>>, vector<1x32x32xf32>
    %201 = vector.shape_cast %200 : vector<1x32x32xf32> to vector<32x32xf32>
    %cst_87 = arith.constant dense<0.000000e+00> : vector<8x32xf32>
    %202 = tpu.matmul %199, %201, %cst_87 {dimension_numbers = #tpu.dot_dimension_numbers<[1], [0], [0], [1], [0, 0, 1, 1], [], []>} : vector<8x32xf32>, vector<32x32xf32>, vector<8x32xf32> -> vector<8x32xf32>
    %c0_88 = arith.constant 0 : index
    %c0_89 = arith.constant 0 : index
    %c0_90 = arith.constant 0 : index
    %203 = vector.load %arg12[%c0_88, %c0_89, %c0_90] : memref<2x1x32xf32, #tpu.memory_space<vmem>>, vector<1x1x32xf32>
    %204 = vector.shape_cast %203 : vector<1x1x32xf32> to vector<1x32xf32>
    %205 = vector.broadcast %204 : vector<1x32xf32> to vector<8x32xf32>
    %206 = arith.addf %202, %205 : vector<8x32xf32>
    %207 = arith.addf %122, %206 : vector<8x32xf32>
    %208 = vector.extract_strided_slice %11 {offsets = [0, 1, 0, 0], sizes = [1, 1, 1, 32], strides = [1, 1, 1, 1]} : vector<2x3x1x32xf32> to vector<1x1x1x32xf32>
    %209 = vector.shape_cast %208 : vector<1x1x1x32xf32> to vector<1x32xf32>
    %210 = vector.extract_strided_slice %12 {offsets = [0, 1, 0, 0], sizes = [1, 1, 1, 32], strides = [1, 1, 1, 1]} : vector<2x3x1x32xf32> to vector<1x1x1x32xf32>
    %211 = vector.shape_cast %210 : vector<1x1x1x32xf32> to vector<1x32xf32>
    %cst_91 = arith.constant dense<0.000000e+00> : vector<8xf32>
    %212 = vector.multi_reduction <add>, %207, %cst_91 [1] : vector<8x32xf32> to vector<8xf32>
    %213 = vector.shape_cast %212 : vector<8xf32> to vector<8x1xf32>
    %cst_92 = arith.constant 3.200000e+01 : f32
    %214 = vector.broadcast %cst_92 : f32 to vector<8x1xf32>
    %215 = arith.divf %213, %214 : vector<8x1xf32>
    %216 = vector.broadcast %215 : vector<8x1xf32> to vector<8x32xf32>
    %217 = arith.subf %207, %216 : vector<8x32xf32>
    %218 = arith.mulf %217, %217 : vector<8x32xf32>
    %cst_93 = arith.constant dense<0.000000e+00> : vector<8xf32>
    %219 = vector.multi_reduction <add>, %218, %cst_93 [1] : vector<8x32xf32> to vector<8xf32>
    %220 = vector.shape_cast %219 : vector<8xf32> to vector<8x1xf32>
    %cst_94 = arith.constant 3.200000e+01 : f32
    %221 = vector.broadcast %cst_94 : f32 to vector<8x1xf32>
    %222 = arith.divf %220, %221 : vector<8x1xf32>
    %223 = vector.broadcast %215 : vector<8x1xf32> to vector<8x32xf32>
    %224 = arith.subf %207, %223 : vector<8x32xf32>
    %cst_95 = arith.constant 9.99999974E-6 : f32
    %225 = vector.broadcast %cst_95 : f32 to vector<8x1xf32>
    %226 = arith.addf %222, %225 : vector<8x1xf32>
    %227 = math.rsqrt %226 : vector<8x1xf32>
    %228 = vector.broadcast %227 : vector<8x1xf32> to vector<8x32xf32>
    %229 = arith.mulf %224, %228 : vector<8x32xf32>
    %230 = vector.broadcast %209 : vector<1x32xf32> to vector<8x32xf32>
    %231 = arith.mulf %229, %230 : vector<8x32xf32>
    %232 = vector.broadcast %211 : vector<1x32xf32> to vector<8x32xf32>
    %233 = arith.addf %231, %232 : vector<8x32xf32>
    %c0_96 = arith.constant 0 : index
    %c0_97 = arith.constant 0 : index
    %c0_98 = arith.constant 0 : index
    %234 = vector.load %arg13[%c0_96, %c0_97, %c0_98] : memref<2x32x64xf32, #tpu.memory_space<vmem>>, vector<1x32x64xf32>
    %235 = vector.shape_cast %234 : vector<1x32x64xf32> to vector<32x64xf32>
    %cst_99 = arith.constant dense<0.000000e+00> : vector<8x64xf32>
    %236 = tpu.matmul %233, %235, %cst_99 {dimension_numbers = #tpu.dot_dimension_numbers<[1], [0], [0], [1], [0, 0, 1, 1], [], []>} : vector<8x32xf32>, vector<32x64xf32>, vector<8x64xf32> -> vector<8x64xf32>
    %c0_100 = arith.constant 0 : index
    %c0_101 = arith.constant 0 : index
    %c0_102 = arith.constant 0 : index
    %237 = vector.load %arg14[%c0_100, %c0_101, %c0_102] : memref<2x1x64xf32, #tpu.memory_space<vmem>>, vector<1x1x64xf32>
    %238 = vector.shape_cast %237 : vector<1x1x64xf32> to vector<1x64xf32>
    %239 = vector.broadcast %238 : vector<1x64xf32> to vector<8x64xf32>
    %240 = arith.addf %236, %239 : vector<8x64xf32>
    %cst_103 = arith.constant 0.000000e+00 : f32
    %241 = vector.broadcast %cst_103 : f32 to vector<8x64xf32>
    %242 = arith.maximumf %240, %241 : vector<8x64xf32>
    %c0_104 = arith.constant 0 : index
    %c0_105 = arith.constant 0 : index
    %c0_106 = arith.constant 0 : index
    %243 = vector.load %arg15[%c0_104, %c0_105, %c0_106] : memref<2x64x32xf32, #tpu.memory_space<vmem>>, vector<1x64x32xf32>
    %244 = vector.shape_cast %243 : vector<1x64x32xf32> to vector<64x32xf32>
    %cst_107 = arith.constant dense<0.000000e+00> : vector<8x32xf32>
    %245 = tpu.matmul %242, %244, %cst_107 {dimension_numbers = #tpu.dot_dimension_numbers<[1], [0], [0], [1], [0, 0, 1, 1], [], []>} : vector<8x64xf32>, vector<64x32xf32>, vector<8x32xf32> -> vector<8x32xf32>
    %c0_108 = arith.constant 0 : index
    %c0_109 = arith.constant 0 : index
    %c0_110 = arith.constant 0 : index
    %246 = vector.load %arg16[%c0_108, %c0_109, %c0_110] : memref<2x1x32xf32, #tpu.memory_space<vmem>>, vector<1x1x32xf32>
    %247 = vector.shape_cast %246 : vector<1x1x32xf32> to vector<1x32xf32>
    %248 = vector.broadcast %247 : vector<1x32xf32> to vector<8x32xf32>
    %249 = arith.addf %245, %248 : vector<8x32xf32>
    %250 = arith.addf %233, %249 : vector<8x32xf32>
    %251 = vector.extract_strided_slice %11 {offsets = [0, 2, 0, 0], sizes = [1, 1, 1, 32], strides = [1, 1, 1, 1]} : vector<2x3x1x32xf32> to vector<1x1x1x32xf32>
    %252 = vector.shape_cast %251 : vector<1x1x1x32xf32> to vector<1x32xf32>
    %253 = vector.extract_strided_slice %12 {offsets = [0, 2, 0, 0], sizes = [1, 1, 1, 32], strides = [1, 1, 1, 1]} : vector<2x3x1x32xf32> to vector<1x1x1x32xf32>
    %254 = vector.shape_cast %253 : vector<1x1x1x32xf32> to vector<1x32xf32>
    %cst_111 = arith.constant dense<0.000000e+00> : vector<8xf32>
    %255 = vector.multi_reduction <add>, %250, %cst_111 [1] : vector<8x32xf32> to vector<8xf32>
    %256 = vector.shape_cast %255 : vector<8xf32> to vector<8x1xf32>
    %cst_112 = arith.constant 3.200000e+01 : f32
    %257 = vector.broadcast %cst_112 : f32 to vector<8x1xf32>
    %258 = arith.divf %256, %257 : vector<8x1xf32>
    %259 = vector.broadcast %258 : vector<8x1xf32> to vector<8x32xf32>
    %260 = arith.subf %250, %259 : vector<8x32xf32>
    %261 = arith.mulf %260, %260 : vector<8x32xf32>
    %cst_113 = arith.constant dense<0.000000e+00> : vector<8xf32>
    %262 = vector.multi_reduction <add>, %261, %cst_113 [1] : vector<8x32xf32> to vector<8xf32>
    %263 = vector.shape_cast %262 : vector<8xf32> to vector<8x1xf32>
    %cst_114 = arith.constant 3.200000e+01 : f32
    %264 = vector.broadcast %cst_114 : f32 to vector<8x1xf32>
    %265 = arith.divf %263, %264 : vector<8x1xf32>
    %266 = vector.broadcast %258 : vector<8x1xf32> to vector<8x32xf32>
    %267 = arith.subf %250, %266 : vector<8x32xf32>
    %cst_115 = arith.constant 9.99999974E-6 : f32
    %268 = vector.broadcast %cst_115 : f32 to vector<8x1xf32>
    %269 = arith.addf %265, %268 : vector<8x1xf32>
    %270 = math.rsqrt %269 : vector<8x1xf32>
    %271 = vector.broadcast %270 : vector<8x1xf32> to vector<8x32xf32>
    %272 = arith.mulf %267, %271 : vector<8x32xf32>
    %273 = vector.broadcast %252 : vector<1x32xf32> to vector<8x32xf32>
    %274 = arith.mulf %272, %273 : vector<8x32xf32>
    %275 = vector.broadcast %254 : vector<1x32xf32> to vector<8x32xf32>
    %276 = arith.addf %274, %275 : vector<8x32xf32>
    %277 = arith.addf %276, %5 : vector<8x32xf32>
    %278 = tpu.concatenate %277, %276 in 0 : vector<8x32xf32>, vector<8x32xf32> -> vector<16x32xf32>
    %c1 = arith.constant 1 : index
    %c0_116 = arith.constant 0 : index
    %c0_117 = arith.constant 0 : index
    %279 = vector.load %arg5[%c1, %c0_116, %c0_117] : memref<2x32x96xf32, #tpu.memory_space<vmem>>, vector<1x32x96xf32>
    %280 = vector.shape_cast %279 : vector<1x32x96xf32> to vector<32x96xf32>
    %cst_118 = arith.constant dense<0.000000e+00> : vector<16x96xf32>
    %281 = tpu.matmul %278, %280, %cst_118 {dimension_numbers = #tpu.dot_dimension_numbers<[1], [0], [0], [1], [0, 0, 1, 1], [], []>} : vector<16x32xf32>, vector<32x96xf32>, vector<16x96xf32> -> vector<16x96xf32>
    %c1_119 = arith.constant 1 : index
    %c0_120 = arith.constant 0 : index
    %c0_121 = arith.constant 0 : index
    %282 = vector.load %arg6[%c1_119, %c0_120, %c0_121] : memref<2x1x96xf32, #tpu.memory_space<vmem>>, vector<1x1x96xf32>
    %283 = vector.shape_cast %282 : vector<1x1x96xf32> to vector<1x96xf32>
    %284 = vector.broadcast %283 : vector<1x96xf32> to vector<16x96xf32>
    %285 = arith.addf %281, %284 : vector<16x96xf32>
    %286 = vector.extract_strided_slice %285 {offsets = [0, 0], sizes = [8, 32], strides = [1, 1]} : vector<16x96xf32> to vector<8x32xf32>
    %287 = vector.extract_strided_slice %285 {offsets = [0, 32], sizes = [8, 32], strides = [1, 1]} : vector<16x96xf32> to vector<8x32xf32>
    %288 = vector.extract_strided_slice %285 {offsets = [8, 64], sizes = [8, 32], strides = [1, 1]} : vector<16x96xf32> to vector<8x32xf32>
    %cst_122 = arith.constant 0.353553385 : f32
    %289 = vector.broadcast %cst_122 : f32 to vector<8x32xf32>
    %290 = arith.mulf %286, %289 : vector<8x32xf32>
    %291 = tpu.transpose %287, [1, 0] : vector<8x32xf32> -> vector<32x8xf32>
    %292 = vector.extract_strided_slice %290 {offsets = [0, 0], sizes = [8, 8], strides = [1, 1]} : vector<8x32xf32> to vector<8x8xf32>
    %293 = vector.extract_strided_slice %291 {offsets = [0, 0], sizes = [8, 8], strides = [1, 1]} : vector<32x8xf32> to vector<8x8xf32>
    %cst_123 = arith.constant dense<0.000000e+00> : vector<8x8xf32>
    %294 = tpu.matmul %292, %293, %cst_123 {dimension_numbers = #tpu.dot_dimension_numbers<[1], [0], [0], [1], [0, 0, 1, 1], [], []>} : vector<8x8xf32>, vector<8x8xf32>, vector<8x8xf32> -> vector<8x8xf32>
    %cst_124 = arith.constant dense<0xFF800000> : vector<8xf32>
    %295 = vector.multi_reduction <maximumf>, %294, %cst_124 [1] : vector<8x8xf32> to vector<8xf32>
    %296 = vector.shape_cast %295 : vector<8xf32> to vector<8x1xf32>
    %297 = vector.broadcast %296 : vector<8x1xf32> to vector<8x8xf32>
    %298 = arith.subf %294, %297 : vector<8x8xf32>
    %299 = math.exp %298 : vector<8x8xf32>
    %cst_125 = arith.constant dense<0.000000e+00> : vector<8xf32>
    %300 = vector.multi_reduction <add>, %299, %cst_125 [1] : vector<8x8xf32> to vector<8xf32>
    %301 = vector.shape_cast %300 : vector<8xf32> to vector<8x1xf32>
    %302 = tpu.reciprocal %301 {approx = true} : vector<8x1xf32> -> vector<8x1xf32>
    %303 = vector.broadcast %302 : vector<8x1xf32> to vector<8x8xf32>
    %304 = arith.mulf %299, %303 : vector<8x8xf32>
    %305 = vector.extract_strided_slice %288 {offsets = [0, 0], sizes = [8, 8], strides = [1, 1]} : vector<8x32xf32> to vector<8x8xf32>
    %cst_126 = arith.constant dense<0.000000e+00> : vector<8x8xf32>
    %306 = tpu.matmul %304, %305, %cst_126 {dimension_numbers = #tpu.dot_dimension_numbers<[1], [0], [0], [1], [0, 0, 1, 1], [], []>} : vector<8x8xf32>, vector<8x8xf32>, vector<8x8xf32> -> vector<8x8xf32>
    %307 = vector.extract_strided_slice %290 {offsets = [0, 8], sizes = [8, 8], strides = [1, 1]} : vector<8x32xf32> to vector<8x8xf32>
    %308 = vector.extract_strided_slice %291 {offsets = [8, 0], sizes = [8, 8], strides = [1, 1]} : vector<32x8xf32> to vector<8x8xf32>
    %cst_127 = arith.constant dense<0.000000e+00> : vector<8x8xf32>
    %309 = tpu.matmul %307, %308, %cst_127 {dimension_numbers = #tpu.dot_dimension_numbers<[1], [0], [0], [1], [0, 0, 1, 1], [], []>} : vector<8x8xf32>, vector<8x8xf32>, vector<8x8xf32> -> vector<8x8xf32>
    %cst_128 = arith.constant dense<0xFF800000> : vector<8xf32>
    %310 = vector.multi_reduction <maximumf>, %309, %cst_128 [1] : vector<8x8xf32> to vector<8xf32>
    %311 = vector.shape_cast %310 : vector<8xf32> to vector<8x1xf32>
    %312 = vector.broadcast %311 : vector<8x1xf32> to vector<8x8xf32>
    %313 = arith.subf %309, %312 : vector<8x8xf32>
    %314 = math.exp %313 : vector<8x8xf32>
    %cst_129 = arith.constant dense<0.000000e+00> : vector<8xf32>
    %315 = vector.multi_reduction <add>, %314, %cst_129 [1] : vector<8x8xf32> to vector<8xf32>
    %316 = vector.shape_cast %315 : vector<8xf32> to vector<8x1xf32>
    %317 = tpu.reciprocal %316 {approx = true} : vector<8x1xf32> -> vector<8x1xf32>
    %318 = vector.broadcast %317 : vector<8x1xf32> to vector<8x8xf32>
    %319 = arith.mulf %314, %318 : vector<8x8xf32>
    %320 = vector.extract_strided_slice %288 {offsets = [0, 8], sizes = [8, 8], strides = [1, 1]} : vector<8x32xf32> to vector<8x8xf32>
    %cst_130 = arith.constant dense<0.000000e+00> : vector<8x8xf32>
    %321 = tpu.matmul %319, %320, %cst_130 {dimension_numbers = #tpu.dot_dimension_numbers<[1], [0], [0], [1], [0, 0, 1, 1], [], []>} : vector<8x8xf32>, vector<8x8xf32>, vector<8x8xf32> -> vector<8x8xf32>
    %322 = vector.extract_strided_slice %290 {offsets = [0, 16], sizes = [8, 8], strides = [1, 1]} : vector<8x32xf32> to vector<8x8xf32>
    %323 = vector.extract_strided_slice %291 {offsets = [16, 0], sizes = [8, 8], strides = [1, 1]} : vector<32x8xf32> to vector<8x8xf32>
    %cst_131 = arith.constant dense<0.000000e+00> : vector<8x8xf32>
    %324 = tpu.matmul %322, %323, %cst_131 {dimension_numbers = #tpu.dot_dimension_numbers<[1], [0], [0], [1], [0, 0, 1, 1], [], []>} : vector<8x8xf32>, vector<8x8xf32>, vector<8x8xf32> -> vector<8x8xf32>
    %cst_132 = arith.constant dense<0xFF800000> : vector<8xf32>
    %325 = vector.multi_reduction <maximumf>, %324, %cst_132 [1] : vector<8x8xf32> to vector<8xf32>
    %326 = vector.shape_cast %325 : vector<8xf32> to vector<8x1xf32>
    %327 = vector.broadcast %326 : vector<8x1xf32> to vector<8x8xf32>
    %328 = arith.subf %324, %327 : vector<8x8xf32>
    %329 = math.exp %328 : vector<8x8xf32>
    %cst_133 = arith.constant dense<0.000000e+00> : vector<8xf32>
    %330 = vector.multi_reduction <add>, %329, %cst_133 [1] : vector<8x8xf32> to vector<8xf32>
    %331 = vector.shape_cast %330 : vector<8xf32> to vector<8x1xf32>
    %332 = tpu.reciprocal %331 {approx = true} : vector<8x1xf32> -> vector<8x1xf32>
    %333 = vector.broadcast %332 : vector<8x1xf32> to vector<8x8xf32>
    %334 = arith.mulf %329, %333 : vector<8x8xf32>
    %335 = vector.extract_strided_slice %288 {offsets = [0, 16], sizes = [8, 8], strides = [1, 1]} : vector<8x32xf32> to vector<8x8xf32>
    %cst_134 = arith.constant dense<0.000000e+00> : vector<8x8xf32>
    %336 = tpu.matmul %334, %335, %cst_134 {dimension_numbers = #tpu.dot_dimension_numbers<[1], [0], [0], [1], [0, 0, 1, 1], [], []>} : vector<8x8xf32>, vector<8x8xf32>, vector<8x8xf32> -> vector<8x8xf32>
    %337 = vector.extract_strided_slice %290 {offsets = [0, 24], sizes = [8, 8], strides = [1, 1]} : vector<8x32xf32> to vector<8x8xf32>
    %338 = vector.extract_strided_slice %291 {offsets = [24, 0], sizes = [8, 8], strides = [1, 1]} : vector<32x8xf32> to vector<8x8xf32>
    %cst_135 = arith.constant dense<0.000000e+00> : vector<8x8xf32>
    %339 = tpu.matmul %337, %338, %cst_135 {dimension_numbers = #tpu.dot_dimension_numbers<[1], [0], [0], [1], [0, 0, 1, 1], [], []>} : vector<8x8xf32>, vector<8x8xf32>, vector<8x8xf32> -> vector<8x8xf32>
    %cst_136 = arith.constant dense<0xFF800000> : vector<8xf32>
    %340 = vector.multi_reduction <maximumf>, %339, %cst_136 [1] : vector<8x8xf32> to vector<8xf32>
    %341 = vector.shape_cast %340 : vector<8xf32> to vector<8x1xf32>
    %342 = vector.broadcast %341 : vector<8x1xf32> to vector<8x8xf32>
    %343 = arith.subf %339, %342 : vector<8x8xf32>
    %344 = math.exp %343 : vector<8x8xf32>
    %cst_137 = arith.constant dense<0.000000e+00> : vector<8xf32>
    %345 = vector.multi_reduction <add>, %344, %cst_137 [1] : vector<8x8xf32> to vector<8xf32>
    %346 = vector.shape_cast %345 : vector<8xf32> to vector<8x1xf32>
    %347 = tpu.reciprocal %346 {approx = true} : vector<8x1xf32> -> vector<8x1xf32>
    %348 = vector.broadcast %347 : vector<8x1xf32> to vector<8x8xf32>
    %349 = arith.mulf %344, %348 : vector<8x8xf32>
    %350 = vector.extract_strided_slice %288 {offsets = [0, 24], sizes = [8, 8], strides = [1, 1]} : vector<8x32xf32> to vector<8x8xf32>
    %cst_138 = arith.constant dense<0.000000e+00> : vector<8x8xf32>
    %351 = tpu.matmul %349, %350, %cst_138 {dimension_numbers = #tpu.dot_dimension_numbers<[1], [0], [0], [1], [0, 0, 1, 1], [], []>} : vector<8x8xf32>, vector<8x8xf32>, vector<8x8xf32> -> vector<8x8xf32>
    %352 = tpu.concatenate %306, %321, %336, %351 in 1 : vector<8x8xf32>, vector<8x8xf32>, vector<8x8xf32>, vector<8x8xf32> -> vector<8x32xf32>
    %c1_139 = arith.constant 1 : index
    %c0_140 = arith.constant 0 : index
    %c0_141 = arith.constant 0 : index
    %353 = vector.load %arg7[%c1_139, %c0_140, %c0_141] : memref<2x32x32xf32, #tpu.memory_space<vmem>>, vector<1x32x32xf32>
    %354 = vector.shape_cast %353 : vector<1x32x32xf32> to vector<32x32xf32>
    %cst_142 = arith.constant dense<0.000000e+00> : vector<8x32xf32>
    %355 = tpu.matmul %352, %354, %cst_142 {dimension_numbers = #tpu.dot_dimension_numbers<[1], [0], [0], [1], [0, 0, 1, 1], [], []>} : vector<8x32xf32>, vector<32x32xf32>, vector<8x32xf32> -> vector<8x32xf32>
    %c1_143 = arith.constant 1 : index
    %c0_144 = arith.constant 0 : index
    %c0_145 = arith.constant 0 : index
    %356 = vector.load %arg8[%c1_143, %c0_144, %c0_145] : memref<2x1x32xf32, #tpu.memory_space<vmem>>, vector<1x1x32xf32>
    %357 = vector.shape_cast %356 : vector<1x1x32xf32> to vector<1x32xf32>
    %358 = vector.broadcast %357 : vector<1x32xf32> to vector<8x32xf32>
    %359 = arith.addf %355, %358 : vector<8x32xf32>
    %360 = arith.addf %276, %359 : vector<8x32xf32>
    %361 = vector.extract_strided_slice %11 {offsets = [1, 0, 0, 0], sizes = [1, 1, 1, 32], strides = [1, 1, 1, 1]} : vector<2x3x1x32xf32> to vector<1x1x1x32xf32>
    %362 = vector.shape_cast %361 : vector<1x1x1x32xf32> to vector<1x32xf32>
    %363 = vector.extract_strided_slice %12 {offsets = [1, 0, 0, 0], sizes = [1, 1, 1, 32], strides = [1, 1, 1, 1]} : vector<2x3x1x32xf32> to vector<1x1x1x32xf32>
    %364 = vector.shape_cast %363 : vector<1x1x1x32xf32> to vector<1x32xf32>
    %cst_146 = arith.constant dense<0.000000e+00> : vector<8xf32>
    %365 = vector.multi_reduction <add>, %360, %cst_146 [1] : vector<8x32xf32> to vector<8xf32>
    %366 = vector.shape_cast %365 : vector<8xf32> to vector<8x1xf32>
    %cst_147 = arith.constant 3.200000e+01 : f32
    %367 = vector.broadcast %cst_147 : f32 to vector<8x1xf32>
    %368 = arith.divf %366, %367 : vector<8x1xf32>
    %369 = vector.broadcast %368 : vector<8x1xf32> to vector<8x32xf32>
    %370 = arith.subf %360, %369 : vector<8x32xf32>
    %371 = arith.mulf %370, %370 : vector<8x32xf32>
    %cst_148 = arith.constant dense<0.000000e+00> : vector<8xf32>
    %372 = vector.multi_reduction <add>, %371, %cst_148 [1] : vector<8x32xf32> to vector<8xf32>
    %373 = vector.shape_cast %372 : vector<8xf32> to vector<8x1xf32>
    %cst_149 = arith.constant 3.200000e+01 : f32
    %374 = vector.broadcast %cst_149 : f32 to vector<8x1xf32>
    %375 = arith.divf %373, %374 : vector<8x1xf32>
    %376 = vector.broadcast %368 : vector<8x1xf32> to vector<8x32xf32>
    %377 = arith.subf %360, %376 : vector<8x32xf32>
    %cst_150 = arith.constant 9.99999974E-6 : f32
    %378 = vector.broadcast %cst_150 : f32 to vector<8x1xf32>
    %379 = arith.addf %375, %378 : vector<8x1xf32>
    %380 = math.rsqrt %379 : vector<8x1xf32>
    %381 = vector.broadcast %380 : vector<8x1xf32> to vector<8x32xf32>
    %382 = arith.mulf %377, %381 : vector<8x32xf32>
    %383 = vector.broadcast %362 : vector<1x32xf32> to vector<8x32xf32>
    %384 = arith.mulf %382, %383 : vector<8x32xf32>
    %385 = vector.broadcast %364 : vector<1x32xf32> to vector<8x32xf32>
    %386 = arith.addf %384, %385 : vector<8x32xf32>
    %387 = arith.addf %386, %5 : vector<8x32xf32>
    %c0_151 = arith.constant 0 : index
    %c0_152 = arith.constant 0 : index
    %388 = vector.load %arg22[%c0_151, %c0_152] : memref<40x32xf32, #tpu.memory_space<vmem>>, vector<8x32xf32>
    tpu.vector_store %arg22[%c0_151, %c0_152], %387 {strides = array<i32>} : memref<40x32xf32, #tpu.memory_space<vmem>>, vector<8x32xf32>,
    %c0_153 = arith.constant 0 : index
    %c0_154 = arith.constant 0 : index
    %389 = vector.load %arg22[%c0_153, %c0_154] : memref<40x32xf32, #tpu.memory_space<vmem>>, vector<40x32xf32>
    %c1_155 = arith.constant 1 : index
    %c0_156 = arith.constant 0 : index
    %c0_157 = arith.constant 0 : index
    %390 = vector.load %arg9[%c1_155, %c0_156, %c0_157] : memref<2x32x96xf32, #tpu.memory_space<vmem>>, vector<1x32x96xf32>
    %391 = vector.shape_cast %390 : vector<1x32x96xf32> to vector<32x96xf32>
    %cst_158 = arith.constant dense<0.000000e+00> : vector<40x96xf32>
    %392 = tpu.matmul %389, %391, %cst_158 {dimension_numbers = #tpu.dot_dimension_numbers<[1], [0], [0], [1], [0, 0, 1, 1], [], []>} : vector<40x32xf32>, vector<32x96xf32>, vector<40x96xf32> -> vector<40x96xf32>
    %c1_159 = arith.constant 1 : index
    %c0_160 = arith.constant 0 : index
    %c0_161 = arith.constant 0 : index
    %393 = vector.load %arg10[%c1_159, %c0_160, %c0_161] : memref<2x1x96xf32, #tpu.memory_space<vmem>>, vector<1x1x96xf32>
    %394 = vector.shape_cast %393 : vector<1x1x96xf32> to vector<1x96xf32>
    %395 = vector.broadcast %394 : vector<1x96xf32> to vector<40x96xf32>
    %396 = arith.addf %392, %395 : vector<40x96xf32>
    %397 = vector.extract_strided_slice %396 {offsets = [0, 0], sizes = [8, 32], strides = [1, 1]} : vector<40x96xf32> to vector<8x32xf32>
    %398 = vector.extract_strided_slice %396 {offsets = [8, 32], sizes = [16, 32], strides = [1, 1]} : vector<40x96xf32> to vector<16x32xf32>
    %399 = vector.extract_strided_slice %396 {offsets = [24, 64], sizes = [16, 32], strides = [1, 1]} : vector<40x96xf32> to vector<16x32xf32>
    %cst_162 = arith.constant 0.353553385 : f32
    %400 = vector.broadcast %cst_162 : f32 to vector<8x32xf32>
    %401 = arith.mulf %397, %400 : vector<8x32xf32>
    %402 = tpu.transpose %398, [1, 0] : vector<16x32xf32> -> vector<32x16xf32>
    %403 = vector.extract_strided_slice %401 {offsets = [0, 0], sizes = [8, 8], strides = [1, 1]} : vector<8x32xf32> to vector<8x8xf32>
    %404 = vector.extract_strided_slice %402 {offsets = [0, 0], sizes = [8, 16], strides = [1, 1]} : vector<32x16xf32> to vector<8x16xf32>
    %cst_163 = arith.constant dense<0.000000e+00> : vector<8x16xf32>
    %405 = tpu.matmul %403, %404, %cst_163 {dimension_numbers = #tpu.dot_dimension_numbers<[1], [0], [0], [1], [0, 0, 1, 1], [], []>} : vector<8x8xf32>, vector<8x16xf32>, vector<8x16xf32> -> vector<8x16xf32>
    %cst_164 = arith.constant dense<0xFF800000> : vector<8xf32>
    %406 = vector.multi_reduction <maximumf>, %405, %cst_164 [1] : vector<8x16xf32> to vector<8xf32>
    %407 = vector.shape_cast %406 : vector<8xf32> to vector<8x1xf32>
    %408 = vector.broadcast %407 : vector<8x1xf32> to vector<8x16xf32>
    %409 = arith.subf %405, %408 : vector<8x16xf32>
    %410 = math.exp %409 : vector<8x16xf32>
    %cst_165 = arith.constant dense<0.000000e+00> : vector<8xf32>
    %411 = vector.multi_reduction <add>, %410, %cst_165 [1] : vector<8x16xf32> to vector<8xf32>
    %412 = vector.shape_cast %411 : vector<8xf32> to vector<8x1xf32>
    %413 = tpu.reciprocal %412 {approx = true} : vector<8x1xf32> -> vector<8x1xf32>
    %414 = vector.broadcast %413 : vector<8x1xf32> to vector<8x16xf32>
    %415 = arith.mulf %410, %414 : vector<8x16xf32>
    %416 = vector.extract_strided_slice %399 {offsets = [0, 0], sizes = [16, 8], strides = [1, 1]} : vector<16x32xf32> to vector<16x8xf32>
    %cst_166 = arith.constant dense<0.000000e+00> : vector<8x8xf32>
    %417 = tpu.matmul %415, %416, %cst_166 {dimension_numbers = #tpu.dot_dimension_numbers<[1], [0], [0], [1], [0, 0, 1, 1], [], []>} : vector<8x16xf32>, vector<16x8xf32>, vector<8x8xf32> -> vector<8x8xf32>
    %418 = vector.extract_strided_slice %401 {offsets = [0, 8], sizes = [8, 8], strides = [1, 1]} : vector<8x32xf32> to vector<8x8xf32>
    %419 = vector.extract_strided_slice %402 {offsets = [8, 0], sizes = [8, 16], strides = [1, 1]} : vector<32x16xf32> to vector<8x16xf32>
    %cst_167 = arith.constant dense<0.000000e+00> : vector<8x16xf32>
    %420 = tpu.matmul %418, %419, %cst_167 {dimension_numbers = #tpu.dot_dimension_numbers<[1], [0], [0], [1], [0, 0, 1, 1], [], []>} : vector<8x8xf32>, vector<8x16xf32>, vector<8x16xf32> -> vector<8x16xf32>
    %cst_168 = arith.constant dense<0xFF800000> : vector<8xf32>
    %421 = vector.multi_reduction <maximumf>, %420, %cst_168 [1] : vector<8x16xf32> to vector<8xf32>
    %422 = vector.shape_cast %421 : vector<8xf32> to vector<8x1xf32>
    %423 = vector.broadcast %422 : vector<8x1xf32> to vector<8x16xf32>
    %424 = arith.subf %420, %423 : vector<8x16xf32>
    %425 = math.exp %424 : vector<8x16xf32>
    %cst_169 = arith.constant dense<0.000000e+00> : vector<8xf32>
    %426 = vector.multi_reduction <add>, %425, %cst_169 [1] : vector<8x16xf32> to vector<8xf32>
    %427 = vector.shape_cast %426 : vector<8xf32> to vector<8x1xf32>
    %428 = tpu.reciprocal %427 {approx = true} : vector<8x1xf32> -> vector<8x1xf32>
    %429 = vector.broadcast %428 : vector<8x1xf32> to vector<8x16xf32>
    %430 = arith.mulf %425, %429 : vector<8x16xf32>
    %431 = vector.extract_strided_slice %399 {offsets = [0, 8], sizes = [16, 8], strides = [1, 1]} : vector<16x32xf32> to vector<16x8xf32>
    %cst_170 = arith.constant dense<0.000000e+00> : vector<8x8xf32>
    %432 = tpu.matmul %430, %431, %cst_170 {dimension_numbers = #tpu.dot_dimension_numbers<[1], [0], [0], [1], [0, 0, 1, 1], [], []>} : vector<8x16xf32>, vector<16x8xf32>, vector<8x8xf32> -> vector<8x8xf32>
    %433 = vector.extract_strided_slice %401 {offsets = [0, 16], sizes = [8, 8], strides = [1, 1]} : vector<8x32xf32> to vector<8x8xf32>
    %434 = vector.extract_strided_slice %402 {offsets = [16, 0], sizes = [8, 16], strides = [1, 1]} : vector<32x16xf32> to vector<8x16xf32>
    %cst_171 = arith.constant dense<0.000000e+00> : vector<8x16xf32>
    %435 = tpu.matmul %433, %434, %cst_171 {dimension_numbers = #tpu.dot_dimension_numbers<[1], [0], [0], [1], [0, 0, 1, 1], [], []>} : vector<8x8xf32>, vector<8x16xf32>, vector<8x16xf32> -> vector<8x16xf32>
    %cst_172 = arith.constant dense<0xFF800000> : vector<8xf32>
    %436 = vector.multi_reduction <maximumf>, %435, %cst_172 [1] : vector<8x16xf32> to vector<8xf32>
    %437 = vector.shape_cast %436 : vector<8xf32> to vector<8x1xf32>
    %438 = vector.broadcast %437 : vector<8x1xf32> to vector<8x16xf32>
    %439 = arith.subf %435, %438 : vector<8x16xf32>
    %440 = math.exp %439 : vector<8x16xf32>
    %cst_173 = arith.constant dense<0.000000e+00> : vector<8xf32>
    %441 = vector.multi_reduction <add>, %440, %cst_173 [1] : vector<8x16xf32> to vector<8xf32>
    %442 = vector.shape_cast %441 : vector<8xf32> to vector<8x1xf32>
    %443 = tpu.reciprocal %442 {approx = true} : vector<8x1xf32> -> vector<8x1xf32>
    %444 = vector.broadcast %443 : vector<8x1xf32> to vector<8x16xf32>
    %445 = arith.mulf %440, %444 : vector<8x16xf32>
    %446 = vector.extract_strided_slice %399 {offsets = [0, 16], sizes = [16, 8], strides = [1, 1]} : vector<16x32xf32> to vector<16x8xf32>
    %cst_174 = arith.constant dense<0.000000e+00> : vector<8x8xf32>
    %447 = tpu.matmul %445, %446, %cst_174 {dimension_numbers = #tpu.dot_dimension_numbers<[1], [0], [0], [1], [0, 0, 1, 1], [], []>} : vector<8x16xf32>, vector<16x8xf32>, vector<8x8xf32> -> vector<8x8xf32>
    %448 = vector.extract_strided_slice %401 {offsets = [0, 24], sizes = [8, 8], strides = [1, 1]} : vector<8x32xf32> to vector<8x8xf32>
    %449 = vector.extract_strided_slice %402 {offsets = [24, 0], sizes = [8, 16], strides = [1, 1]} : vector<32x16xf32> to vector<8x16xf32>
    %cst_175 = arith.constant dense<0.000000e+00> : vector<8x16xf32>
    %450 = tpu.matmul %448, %449, %cst_175 {dimension_numbers = #tpu.dot_dimension_numbers<[1], [0], [0], [1], [0, 0, 1, 1], [], []>} : vector<8x8xf32>, vector<8x16xf32>, vector<8x16xf32> -> vector<8x16xf32>
    %cst_176 = arith.constant dense<0xFF800000> : vector<8xf32>
    %451 = vector.multi_reduction <maximumf>, %450, %cst_176 [1] : vector<8x16xf32> to vector<8xf32>
    %452 = vector.shape_cast %451 : vector<8xf32> to vector<8x1xf32>
    %453 = vector.broadcast %452 : vector<8x1xf32> to vector<8x16xf32>
    %454 = arith.subf %450, %453 : vector<8x16xf32>
    %455 = math.exp %454 : vector<8x16xf32>
    %cst_177 = arith.constant dense<0.000000e+00> : vector<8xf32>
    %456 = vector.multi_reduction <add>, %455, %cst_177 [1] : vector<8x16xf32> to vector<8xf32>
    %457 = vector.shape_cast %456 : vector<8xf32> to vector<8x1xf32>
    %458 = tpu.reciprocal %457 {approx = true} : vector<8x1xf32> -> vector<8x1xf32>
    %459 = vector.broadcast %458 : vector<8x1xf32> to vector<8x16xf32>
    %460 = arith.mulf %455, %459 : vector<8x16xf32>
    %461 = vector.extract_strided_slice %399 {offsets = [0, 24], sizes = [16, 8], strides = [1, 1]} : vector<16x32xf32> to vector<16x8xf32>
    %cst_178 = arith.constant dense<0.000000e+00> : vector<8x8xf32>
    %462 = tpu.matmul %460, %461, %cst_178 {dimension_numbers = #tpu.dot_dimension_numbers<[1], [0], [0], [1], [0, 0, 1, 1], [], []>} : vector<8x16xf32>, vector<16x8xf32>, vector<8x8xf32> -> vector<8x8xf32>
    %463 = tpu.concatenate %417, %432, %447, %462 in 1 : vector<8x8xf32>, vector<8x8xf32>, vector<8x8xf32>, vector<8x8xf32> -> vector<8x32xf32>
    %c1_179 = arith.constant 1 : index
    %c0_180 = arith.constant 0 : index
    %c0_181 = arith.constant 0 : index
    %464 = vector.load %arg11[%c1_179, %c0_180, %c0_181] : memref<2x32x32xf32, #tpu.memory_space<vmem>>, vector<1x32x32xf32>
    %465 = vector.shape_cast %464 : vector<1x32x32xf32> to vector<32x32xf32>
    %cst_182 = arith.constant dense<0.000000e+00> : vector<8x32xf32>
    %466 = tpu.matmul %463, %465, %cst_182 {dimension_numbers = #tpu.dot_dimension_numbers<[1], [0], [0], [1], [0, 0, 1, 1], [], []>} : vector<8x32xf32>, vector<32x32xf32>, vector<8x32xf32> -> vector<8x32xf32>
    %c1_183 = arith.constant 1 : index
    %c0_184 = arith.constant 0 : index
    %c0_185 = arith.constant 0 : index
    %467 = vector.load %arg12[%c1_183, %c0_184, %c0_185] : memref<2x1x32xf32, #tpu.memory_space<vmem>>, vector<1x1x32xf32>
    %468 = vector.shape_cast %467 : vector<1x1x32xf32> to vector<1x32xf32>
    %469 = vector.broadcast %468 : vector<1x32xf32> to vector<8x32xf32>
    %470 = arith.addf %466, %469 : vector<8x32xf32>
    %471 = arith.addf %386, %470 : vector<8x32xf32>
    %472 = vector.extract_strided_slice %11 {offsets = [1, 1, 0, 0], sizes = [1, 1, 1, 32], strides = [1, 1, 1, 1]} : vector<2x3x1x32xf32> to vector<1x1x1x32xf32>
    %473 = vector.shape_cast %472 : vector<1x1x1x32xf32> to vector<1x32xf32>
    %474 = vector.extract_strided_slice %12 {offsets = [1, 1, 0, 0], sizes = [1, 1, 1, 32], strides = [1, 1, 1, 1]} : vector<2x3x1x32xf32> to vector<1x1x1x32xf32>
    %475 = vector.shape_cast %474 : vector<1x1x1x32xf32> to vector<1x32xf32>
    %cst_186 = arith.constant dense<0.000000e+00> : vector<8xf32>
    %476 = vector.multi_reduction <add>, %471, %cst_186 [1] : vector<8x32xf32> to vector<8xf32>
    %477 = vector.shape_cast %476 : vector<8xf32> to vector<8x1xf32>
    %cst_187 = arith.constant 3.200000e+01 : f32
    %478 = vector.broadcast %cst_187 : f32 to vector<8x1xf32>
    %479 = arith.divf %477, %478 : vector<8x1xf32>
    %480 = vector.broadcast %479 : vector<8x1xf32> to vector<8x32xf32>
    %481 = arith.subf %471, %480 : vector<8x32xf32>
    %482 = arith.mulf %481, %481 : vector<8x32xf32>
    %cst_188 = arith.constant dense<0.000000e+00> : vector<8xf32>
    %483 = vector.multi_reduction <add>, %482, %cst_188 [1] : vector<8x32xf32> to vector<8xf32>
    %484 = vector.shape_cast %483 : vector<8xf32> to vector<8x1xf32>
    %cst_189 = arith.constant 3.200000e+01 : f32
    %485 = vector.broadcast %cst_189 : f32 to vector<8x1xf32>
    %486 = arith.divf %484, %485 : vector<8x1xf32>
    %487 = vector.broadcast %479 : vector<8x1xf32> to vector<8x32xf32>
    %488 = arith.subf %471, %487 : vector<8x32xf32>
    %cst_190 = arith.constant 9.99999974E-6 : f32
    %489 = vector.broadcast %cst_190 : f32 to vector<8x1xf32>
    %490 = arith.addf %486, %489 : vector<8x1xf32>
    %491 = math.rsqrt %490 : vector<8x1xf32>
    %492 = vector.broadcast %491 : vector<8x1xf32> to vector<8x32xf32>
    %493 = arith.mulf %488, %492 : vector<8x32xf32>
    %494 = vector.broadcast %473 : vector<1x32xf32> to vector<8x32xf32>
    %495 = arith.mulf %493, %494 : vector<8x32xf32>
    %496 = vector.broadcast %475 : vector<1x32xf32> to vector<8x32xf32>
    %497 = arith.addf %495, %496 : vector<8x32xf32>
    %c1_191 = arith.constant 1 : index
    %c0_192 = arith.constant 0 : index
    %c0_193 = arith.constant 0 : index
    %498 = vector.load %arg13[%c1_191, %c0_192, %c0_193] : memref<2x32x64xf32, #tpu.memory_space<vmem>>, vector<1x32x64xf32>
    %499 = vector.shape_cast %498 : vector<1x32x64xf32> to vector<32x64xf32>
    %cst_194 = arith.constant dense<0.000000e+00> : vector<8x64xf32>
    %500 = tpu.matmul %497, %499, %cst_194 {dimension_numbers = #tpu.dot_dimension_numbers<[1], [0], [0], [1], [0, 0, 1, 1], [], []>} : vector<8x32xf32>, vector<32x64xf32>, vector<8x64xf32> -> vector<8x64xf32>
    %c1_195 = arith.constant 1 : index
    %c0_196 = arith.constant 0 : index
    %c0_197 = arith.constant 0 : index
    %501 = vector.load %arg14[%c1_195, %c0_196, %c0_197] : memref<2x1x64xf32, #tpu.memory_space<vmem>>, vector<1x1x64xf32>
    %502 = vector.shape_cast %501 : vector<1x1x64xf32> to vector<1x64xf32>
    %503 = vector.broadcast %502 : vector<1x64xf32> to vector<8x64xf32>
    %504 = arith.addf %500, %503 : vector<8x64xf32>
    %cst_198 = arith.constant 0.000000e+00 : f32
    %505 = vector.broadcast %cst_198 : f32 to vector<8x64xf32>
    %506 = arith.maximumf %504, %505 : vector<8x64xf32>
    %c1_199 = arith.constant 1 : index
    %c0_200 = arith.constant 0 : index
    %c0_201 = arith.constant 0 : index
    %507 = vector.load %arg15[%c1_199, %c0_200, %c0_201] : memref<2x64x32xf32, #tpu.memory_space<vmem>>, vector<1x64x32xf32>
    %508 = vector.shape_cast %507 : vector<1x64x32xf32> to vector<64x32xf32>
    %cst_202 = arith.constant dense<0.000000e+00> : vector<8x32xf32>
    %509 = tpu.matmul %506, %508, %cst_202 {dimension_numbers = #tpu.dot_dimension_numbers<[1], [0], [0], [1], [0, 0, 1, 1], [], []>} : vector<8x64xf32>, vector<64x32xf32>, vector<8x32xf32> -> vector<8x32xf32>
    %c1_203 = arith.constant 1 : index
    %c0_204 = arith.constant 0 : index
    %c0_205 = arith.constant 0 : index
    %510 = vector.load %arg16[%c1_203, %c0_204, %c0_205] : memref<2x1x32xf32, #tpu.memory_space<vmem>>, vector<1x1x32xf32>
    %511 = vector.shape_cast %510 : vector<1x1x32xf32> to vector<1x32xf32>
    %512 = vector.broadcast %511 : vector<1x32xf32> to vector<8x32xf32>
    %513 = arith.addf %509, %512 : vector<8x32xf32>
    %514 = arith.addf %497, %513 : vector<8x32xf32>
    %515 = vector.extract_strided_slice %11 {offsets = [1, 2, 0, 0], sizes = [1, 1, 1, 32], strides = [1, 1, 1, 1]} : vector<2x3x1x32xf32> to vector<1x1x1x32xf32>
    %516 = vector.shape_cast %515 : vector<1x1x1x32xf32> to vector<1x32xf32>
    %517 = vector.extract_strided_slice %12 {offsets = [1, 2, 0, 0], sizes = [1, 1, 1, 32], strides = [1, 1, 1, 1]} : vector<2x3x1x32xf32> to vector<1x1x1x32xf32>
    %518 = vector.shape_cast %517 : vector<1x1x1x32xf32> to vector<1x32xf32>
    %cst_206 = arith.constant dense<0.000000e+00> : vector<8xf32>
    %519 = vector.multi_reduction <add>, %514, %cst_206 [1] : vector<8x32xf32> to vector<8xf32>
    %520 = vector.shape_cast %519 : vector<8xf32> to vector<8x1xf32>
    %cst_207 = arith.constant 3.200000e+01 : f32
    %521 = vector.broadcast %cst_207 : f32 to vector<8x1xf32>
    %522 = arith.divf %520, %521 : vector<8x1xf32>
    %523 = vector.broadcast %522 : vector<8x1xf32> to vector<8x32xf32>
    %524 = arith.subf %514, %523 : vector<8x32xf32>
    %525 = arith.mulf %524, %524 : vector<8x32xf32>
    %cst_208 = arith.constant dense<0.000000e+00> : vector<8xf32>
    %526 = vector.multi_reduction <add>, %525, %cst_208 [1] : vector<8x32xf32> to vector<8xf32>
    %527 = vector.shape_cast %526 : vector<8xf32> to vector<8x1xf32>
    %cst_209 = arith.constant 3.200000e+01 : f32
    %528 = vector.broadcast %cst_209 : f32 to vector<8x1xf32>
    %529 = arith.divf %527, %528 : vector<8x1xf32>
    %530 = vector.broadcast %522 : vector<8x1xf32> to vector<8x32xf32>
    %531 = arith.subf %514, %530 : vector<8x32xf32>
    %cst_210 = arith.constant 9.99999974E-6 : f32
    %532 = vector.broadcast %cst_210 : f32 to vector<8x1xf32>
    %533 = arith.addf %529, %532 : vector<8x1xf32>
    %534 = math.rsqrt %533 : vector<8x1xf32>
    %535 = vector.broadcast %534 : vector<8x1xf32> to vector<8x32xf32>
    %536 = arith.mulf %531, %535 : vector<8x32xf32>
    %537 = vector.broadcast %516 : vector<1x32xf32> to vector<8x32xf32>
    %538 = arith.mulf %536, %537 : vector<8x32xf32>
    %539 = vector.broadcast %518 : vector<1x32xf32> to vector<8x32xf32>
    %540 = arith.addf %538, %539 : vector<8x32xf32>
    %c0_211 = arith.constant 0 : index
    %c0_212 = arith.constant 0 : index
    %541 = vector.load %arg19[%c0_211, %c0_212] : memref<1x32xf32, #tpu.memory_space<vmem>>, vector<1x32xf32>
    %c0_213 = arith.constant 0 : index
    %c0_214 = arith.constant 0 : index
    %542 = vector.load %arg20[%c0_213, %c0_214] : memref<1x32xf32, #tpu.memory_space<vmem>>, vector<1x32xf32>
    %cst_215 = arith.constant dense<0.000000e+00> : vector<8xf32>
    %543 = vector.multi_reduction <add>, %540, %cst_215 [1] : vector<8x32xf32> to vector<8xf32>
    %544 = vector.shape_cast %543 : vector<8xf32> to vector<8x1xf32>
    %cst_216 = arith.constant 3.200000e+01 : f32
    %545 = vector.broadcast %cst_216 : f32 to vector<8x1xf32>
    %546 = arith.divf %544, %545 : vector<8x1xf32>
    %547 = vector.broadcast %546 : vector<8x1xf32> to vector<8x32xf32>
    %548 = arith.subf %540, %547 : vector<8x32xf32>
    %549 = arith.mulf %548, %548 : vector<8x32xf32>
    %cst_217 = arith.constant dense<0.000000e+00> : vector<8xf32>
    %550 = vector.multi_reduction <add>, %549, %cst_217 [1] : vector<8x32xf32> to vector<8xf32>
    %551 = vector.shape_cast %550 : vector<8xf32> to vector<8x1xf32>
    %cst_218 = arith.constant 3.200000e+01 : f32
    %552 = vector.broadcast %cst_218 : f32 to vector<8x1xf32>
    %553 = arith.divf %551, %552 : vector<8x1xf32>
    %554 = vector.broadcast %546 : vector<8x1xf32> to vector<8x32xf32>
    %555 = arith.subf %540, %554 : vector<8x32xf32>
    %cst_219 = arith.constant 9.99999974E-6 : f32
    %556 = vector.broadcast %cst_219 : f32 to vector<8x1xf32>
    %557 = arith.addf %553, %556 : vector<8x1xf32>
    %558 = math.rsqrt %557 : vector<8x1xf32>
    %559 = vector.broadcast %558 : vector<8x1xf32> to vector<8x32xf32>
    %560 = arith.mulf %555, %559 : vector<8x32xf32>
    %561 = vector.broadcast %541 : vector<1x32xf32> to vector<8x32xf32>
    %562 = arith.mulf %560, %561 : vector<8x32xf32>
    %563 = vector.broadcast %542 : vector<1x32xf32> to vector<8x32xf32>
    %564 = arith.addf %562, %563 : vector<8x32xf32>
    %c0_220 = arith.constant 0 : index
    %c0_221 = arith.constant 0 : index
    %c0_222 = arith.constant 0 : index
    %565 = vector.load %arg21[%c0_220, %c0_221, %c0_222] : memref<1x8x32xf32, #tpu.memory_space<vmem>>, vector<1x8x32xf32>
    %566 = vector.shape_cast %565 : vector<1x8x32xf32> to vector<8x32xf32>
    %567 = vector.shape_cast %564 : vector<8x32xf32> to vector<1x8x32xf32>
    tpu.vector_store %arg21[%c0_220, %c0_221, %c0_222], %567 {strides = array<i32>} : memref<1x8x32xf32, #tpu.memory_space<vmem>>, vector<1x8x32xf32>,
    return
  }
  func.func @transform_0(%arg0: i32) -> (i32, i32, i32) {
    %c0_i32 = arith.constant 0 : i32
    %c0_i32_0 = arith.constant 0 : i32
    %c0_i32_1 = arith.constant 0 : i32
    return %arg0, %c0_i32, %c0_i32_0 : i32, i32, i32
  }
  func.func @transform_1(%arg0: i32) -> (i32, i32, i32) {
    %c0_i32 = arith.constant 0 : i32
    %c0_i32_0 = arith.constant 0 : i32
    %c0_i32_1 = arith.constant 0 : i32
    return %arg0, %c0_i32, %c0_i32_0 : i32, i32, i32
  }
  func.func @transform_2(%arg0: i32) -> (i32, i32, i32) {
    %c0_i32 = arith.constant 0 : i32
    %c0_i32_0 = arith.constant 0 : i32
    %c0_i32_1 = arith.constant 0 : i32
    return %arg0, %c0_i32, %c0_i32_0 : i32, i32, i32
  }
  func.func @transform_3(%arg0: i32) -> (i32, i32, i32) {
    %c0_i32 = arith.constant 0 : i32
    %c0_i32_0 = arith.constant 0 : i32
    %c0_i32_1 = arith.constant 0 : i32
    return %arg0, %c0_i32, %c0_i32_0 : i32, i32, i32
  }
  func.func @transform_4(%arg0: i32) -> (i32, i32, i32) {
    %c0_i32 = arith.constant 0 : i32
    %c0_i32_0 = arith.constant 0 : i32
    %c0_i32_1 = arith.constant 0 : i32
    %c0_i32_2 = arith.constant 0 : i32
    return %c0_i32, %c0_i32_0, %c0_i32_1 : i32, i32, i32
  }
  func.func @transform_5(%arg0: i32) -> (i32, i32, i32) {
    %c0_i32 = arith.constant 0 : i32
    %c0_i32_0 = arith.constant 0 : i32
    %c0_i32_1 = arith.constant 0 : i32
    %c0_i32_2 = arith.constant 0 : i32
    return %c0_i32, %c0_i32_0, %c0_i32_1 : i32, i32, i32
  }
  func.func @transform_6(%arg0: i32) -> (i32, i32, i32) {
    %c0_i32 = arith.constant 0 : i32
    %c0_i32_0 = arith.constant 0 : i32
    %c0_i32_1 = arith.constant 0 : i32
    %c0_i32_2 = arith.constant 0 : i32
    return %c0_i32, %c0_i32_0, %c0_i32_1 : i32, i32, i32
  }
  func.func @transform_7(%arg0: i32) -> (i32, i32, i32) {
    %c0_i32 = arith.constant 0 : i32
    %c0_i32_0 = arith.constant 0 : i32
    %c0_i32_1 = arith.constant 0 : i32
    %c0_i32_2 = arith.constant 0 : i32
    return %c0_i32, %c0_i32_0, %c0_i32_1 : i32, i32, i32
  }
  func.func @transform_8(%arg0: i32) -> (i32, i32, i32) {
    %c0_i32 = arith.constant 0 : i32
    %c0_i32_0 = arith.constant 0 : i32
    %c0_i32_1 = arith.constant 0 : i32
    %c0_i32_2 = arith.constant 0 : i32
    return %c0_i32, %c0_i32_0, %c0_i32_1 : i32, i32, i32
  }
  func.func @transform_9(%arg0: i32) -> (i32, i32, i32) {
    %c0_i32 = arith.constant 0 : i32
    %c0_i32_0 = arith.constant 0 : i32
    %c0_i32_1 = arith.constant 0 : i32
    %c0_i32_2 = arith.constant 0 : i32
    return %c0_i32, %c0_i32_0, %c0_i32_1 : i32, i32, i32
  }
  func.func @transform_10(%arg0: i32) -> (i32, i32, i32) {
    %c0_i32 = arith.constant 0 : i32
    %c0_i32_0 = arith.constant 0 : i32
    %c0_i32_1 = arith.constant 0 : i32
    %c0_i32_2 = arith.constant 0 : i32
    return %c0_i32, %c0_i32_0, %c0_i32_1 : i32, i32, i32
  }
  func.func @transform_11(%arg0: i32) -> (i32, i32, i32) {
    %c0_i32 = arith.constant 0 : i32
    %c0_i32_0 = arith.constant 0 : i32
    %c0_i32_1 = arith.constant 0 : i32
    %c0_i32_2 = arith.constant 0 : i32
    return %c0_i32, %c0_i32_0, %c0_i32_1 : i32, i32, i32
  }
  func.func @transform_12(%arg0: i32) -> (i32, i32, i32) {
    %c0_i32 = arith.constant 0 : i32
    %c0_i32_0 = arith.constant 0 : i32
    %c0_i32_1 = arith.constant 0 : i32
    %c0_i32_2 = arith.constant 0 : i32
    return %c0_i32, %c0_i32_0, %c0_i32_1 : i32, i32, i32
  }
  func.func @transform_13(%arg0: i32) -> (i32, i32, i32) {
    %c0_i32 = arith.constant 0 : i32
    %c0_i32_0 = arith.constant 0 : i32
    %c0_i32_1 = arith.constant 0 : i32
    %c0_i32_2 = arith.constant 0 : i32
    return %c0_i32, %c0_i32_0, %c0_i32_1 : i32, i32, i32
  }
  func.func @transform_14(%arg0: i32) -> (i32, i32, i32) {
    %c0_i32 = arith.constant 0 : i32
    %c0_i32_0 = arith.constant 0 : i32
    %c0_i32_1 = arith.constant 0 : i32
    %c0_i32_2 = arith.constant 0 : i32
    return %c0_i32, %c0_i32_0, %c0_i32_1 : i32, i32, i32
  }
  func.func @transform_15(%arg0: i32) -> (i32, i32, i32) {
    %c0_i32 = arith.constant 0 : i32
    %c0_i32_0 = arith.constant 0 : i32
    %c0_i32_1 = arith.constant 0 : i32
    %c0_i32_2 = arith.constant 0 : i32
    return %c0_i32, %c0_i32_0, %c0_i32_1 : i32, i32, i32
  }
  func.func @transform_16(%arg0: i32) -> (i32, i32, i32, i32) {
    %c0_i32 = arith.constant 0 : i32
    %c0_i32_0 = arith.constant 0 : i32
    %c0_i32_1 = arith.constant 0 : i32
    %c0_i32_2 = arith.constant 0 : i32
    %c0_i32_3 = arith.constant 0 : i32
    return %c0_i32, %c0_i32_0, %c0_i32_1, %c0_i32_2 : i32, i32, i32, i32
  }
  func.func @transform_17(%arg0: i32) -> (i32, i32, i32, i32) {
    %c0_i32 = arith.constant 0 : i32
    %c0_i32_0 = arith.constant 0 : i32
    %c0_i32_1 = arith.constant 0 : i32
    %c0_i32_2 = arith.constant 0 : i32
    %c0_i32_3 = arith.constant 0 : i32
    return %c0_i32, %c0_i32_0, %c0_i32_1, %c0_i32_2 : i32, i32, i32, i32
  }
  func.func @transform_18(%arg0: i32) -> (i32, i32) {
    %c0_i32 = arith.constant 0 : i32
    %c0_i32_0 = arith.constant 0 : i32
    %c0_i32_1 = arith.constant 0 : i32
    return %c0_i32, %c0_i32_0 : i32, i32
  }
  func.func @transform_19(%arg0: i32) -> (i32, i32) {
    %c0_i32 = arith.constant 0 : i32
    %c0_i32_0 = arith.constant 0 : i32
    %c0_i32_1 = arith.constant 0 : i32
    return %c0_i32, %c0_i32_0 : i32, i32
  }
  func.func @transform_20(%arg0: i32) -> (i32, i32, i32) {
    %c0_i32 = arith.constant 0 : i32
    %c0_i32_0 = arith.constant 0 : i32
    %c0_i32_1 = arith.constant 0 : i32
    return %arg0, %c0_i32, %c0_i32_0 : i32, i32, i32
  }
}

</mosaic_0001>

<bundles_post_ra>
// kernel: tpu_custom_call.1
= control target key start
LH: loop header
LB: loop body
LE: loop exit
PB: predicated region body
PF: predicated region fallthrough
CT: control target
= control target key end

     0   :  { %s7579_s0 = inlined_call_operand.hbm [shape: f32[2,8,32], index: 0, kind: input, shape index: {}]   ;;  %s7580_s1 = inlined_call_operand.hbm [shape: f32[2,16,32], index: 1, kind: input, shape index: {}]   ;;  %s7581_s2 = inlined_call_operand.hbm [shape: f32[2,16,32], index: 2, kind: input, shape index: {}]   ;;  %s7582_s3 = inlined_call_operand.hbm [shape: f32[2,8,32], index: 3, kind: input, shape index: {}]   ;;  %s7583_s4 = inlined_call_operand.vmem [shape: f32[2,32,96], index: 4, kind: input, shape index: {}]   ;;  %s7584_s5 = inlined_call_operand.vmem [shape: f32[2,1,96], index: 5, kind: input, shape index: {}]   ;;  %s7585_s6 = inlined_call_operand.vmem [shape: f32[2,32,32], index: 6, kind: input, shape index: {}]   ;;  %s7586_s7 = inlined_call_operand.vmem [shape: f32[2,1,32], index: 7, kind: input, shape index: {}]   ;;  %s7587_s8 = inlined_call_operand.vmem [shape: f32[2,32,96], index: 8, kind: input, shape index: {}]   ;;  %s7588_s9 = inlined_call_operand.vmem [shape: f32[2,1,96], index: 9, kind: input, shape index: {}]   ;;  %s7589_s10 = inlined_call_operand.hbm [shape: f32[2,32,32], index: 10, kind: input, shape index: {}]   ;;  %s7590_s11 = inlined_call_operand.vmem [shape: f32[2,1,32], index: 11, kind: input, shape index: {}]   ;;  %s7591_s12 = inlined_call_operand.hbm [shape: f32[2,32,64], index: 12, kind: input, shape index: {}]   ;;  %s7592_s13 = inlined_call_operand.vmem [shape: f32[2,1,64], index: 13, kind: input, shape index: {}]   ;;  %s7593_s14 = inlined_call_operand.vmem [shape: f32[2,64,32], index: 14, kind: input, shape index: {}]   ;;  %s7594_s15 = inlined_call_operand.vmem [shape: f32[2,1,32], index: 15, kind: input, shape index: {}]   ;;  %s7595_s16 = inlined_call_operand.vmem [shape: f32[2,3,1,32], index: 16, kind: input, shape index: {}]   ;;  %s7596_s17 = inlined_call_operand.vmem [shape: f32[2,3,1,32], index: 17, kind: input, shape index: {}]   ;;  %s7597_s18 = inlined_call_operand.vmem [shape: f32[1,32], index: 18, kind: input, shape index: {}]   ;;  %s7598_s19 = inlined_call_operand.vmem [shape: f32[1,32], index: 19, kind: input, shape index: {}]   ;;  %s7599_s20 = inlined_call_operand.hbm [shape: f32[2,8,32], index: 20, kind: output, shape index: {}]  }
   0x1   :  { %7680 = sst [smem:[#allocation31_spill]] %s7579_s0 }
   0x2   :  { %7681 = sst [smem:[#allocation32_spill]] %s7580_s1 }
   0x3   :  { %7682 = sst [smem:[#allocation33_spill]] %s7581_s2 }
   0x4   :  { %7683 = sst [smem:[#allocation34_spill]] %s7582_s3 }
   0x5   :  { %7684 = sst [smem:[#allocation35_spill]] %s7583_s4 }
   0x6   :  { %7685 = sst [smem:[#allocation36_spill]] %s7584_s5 }
   0x7   :  { %7686 = sst [smem:[#allocation37_spill]] %s7585_s6 }
   0x8   :  { %7687 = sst [smem:[#allocation38_spill]] %s7586_s7 }
   0x9   :  { %7688 = sst [smem:[#allocation39_spill]] %s7587_s8 }
   0xa   :  { %7689 = sst [smem:[#allocation40_spill]] %s7588_s9 }
   0xb   :  { %7690 = sst [smem:[#allocation41_spill]] %s7589_s10 }
   0xc   :  { %7691 = sst [smem:[#allocation42_spill]] %s7590_s11 }
   0xd   :  { %7692 = sst [smem:[#allocation43_spill]] %s7591_s12 }
   0xe   :  { %7693 = sst [smem:[#allocation44_spill]] %s7592_s13 }
   0xf   :  { %7694 = sst [smem:[#allocation45_spill]] %s7593_s14 }
  0x10   :  { %7695 = sst [smem:[#allocation46_spill]] %s7594_s15 }
  0x11   :  { %7696 = sst [smem:[#allocation47_spill]] %s7595_s16 }
  0x12   :  { %7697 = sst [smem:[#allocation48_spill]] %s7596_s17 }
  0x13   :  { %7698 = sst [smem:[#allocation49_spill]] %s7597_s18 }
  0x14   :  { %7699 = sst [smem:[#allocation50_spill]] %s7598_s19 }
  0x15   :  { %7700 = sst [smem:[#allocation51_spill]] %s7599_s20 }
  0x16   :  { %25 = vsyncpa [#allocation4], 0 }
  0x17   :  { %27 = vsyncpa [#allocation4 + $0x1], 0 }
  0x18   :  { %28 = vsyncpa [#allocation7], 0 }
  0x19   :  { %30 = vsyncpa [#allocation7 + $0x1], 0 }
  0x1a   :  { %31 = vsyncpa [#allocation10], 0 }
  0x1b   :  { %33 = vsyncpa [#allocation10 + $0x1], 0 }
  0x1c   :  { %34 = vsyncpa [#allocation13], 0 }
  0x1d   :  { %35 = vsyncpa [#allocation5], 0 }
  0x1e   :  { %37 = vsyncpa [#allocation5 + $0x1], 0  ;;  %s6555_s1 = smov 0   ;;  %s6557_s22 = smov 0  }
  0x1f   :  { %s6559_s23 = smov 0   ;;  %s6561_s24 = smov 0  }
  0x20 LB: > { %7701 = sst [smem:[#allocation21_spill]] %s6410_s1  ;;  %s6576_s2 = sadd.s32 4294967295, %s6422_s24   ;;  %s6422_s24 = sphi %s6561_s24, %s7788_s24   ;;  %s6418_s23 = sphi %s6559_s23, %s7791_s23   ;;  %s6414_s22 = sphi %s6557_s22, %s7790_s22   ;;  %s6410_s1 = sphi %s6555_s1, %s7789_s1  }
  0x21   : > { %7702 = sst [smem:[#allocation22_spill]] %s6414_s22  ;;  %s5079_s25 = sadd.s32 4294967294, %s6422_s24  }
  0x22   : > { %7703 = sst [smem:[#allocation23_spill]] %s6418_s23  ;;  %s6580_s3 = sadd.s32 1, %s6422_s24  }
  0x23   : > { %7704 = sst [smem:[#allocation24_spill]] %s6422_s24  ;;  %s50_s26 = sadd.s32 1, %s6418_s23 }
  0x24   : > { %7705 = sst [smem:[#allocation25_spill]] %s6580_s3  ;;  %s47_s27 = ssub.s32 %s6422_s24, %s6580_s3 }
  0x25   : > { %p57_p0 = scmp.ne.s32.totalorder %s6418_s23, %s6414_s22  ;;  %p48_p1 = scmp.eq.s32.totalorder %s47_s27, 0 }
  0x26   : > { %p58_p2 = scmp.eq.s32.totalorder %s6422_s24, 0  ;;  %p63_p3 = scmp.ne.s32.totalorder %s6414_s22, %s6410_s1 }
  0x27   : > { %p7612_p4 = scmp.eq.s32.totalorder %s6576_s2, 0  ;;  %p501_p7 = scmp.eq.s32.totalorder %s6576_s2, 1 }
  0x28   : > { %s6592_s28 = scalar_select %p48_p1, %s6418_s23, %s50_s26  }
  0x29   : > { %p6594_p5 = por %p58_p2, %p57_p0  ;;  %p6600_p6 = por %p7612_p4, %p63_p3 }
  0x2a   : > { %7706 = sst [smem:[#allocation26_spill]] %s6592_s28  ;;  %p507_p8 = scmp.eq.s32.totalorder %s5079_s25, 1 }
  0x2b   : > { %s7707_s4 = scalar_select %p6594_p5, 1, 0 }
  0x2c   : > { %s7708_s29 = scalar_select %p6600_p6, 1, 0 }
  0x2d   : > { %p5080_p9 = scmp.ge.s32.totalorder %s6422_s24, 1  ;;  %p514_p10 = scmp.lt.s32.totalorder %s6422_s24, 3 }
  0x2e   : > { %p6607_p11 = por %p501_p7, %p57_p0  ;;  %p6611_p12 = por %p507_p8, %p63_p3 }
  0x2f   : > { %p6615_p13 = pnand %p5080_p9, %p514_p10  ;;  %s6424_s26 = smov [#allocation11]  }
  0x30   : > { %s7709_s30 = scalar_select %p6607_p11, 1, 0 }
  0x31   : > { %s7711_s0 = scalar_select %p6611_p12, 1, 0 }
  0x32   : > { %7710 = sst [smem:[#allocation27_spill]] %s7709_s30  ;;  %p5922_p1 = pneg %p6615_p13 }
  0x33   : > { %7712 = sst [smem:[#allocation28_spill]] %s7711_s0  ;;  %s544_s27 = sshll.u32 %s6424_s26, 4  ;;  %s545_s27 = int_to_ptr.vmem [resolvable:$true] %s544_s27 }
  0x34   : > { %s7713_s21 = scalar_select %p6615_p13, 1, 0 }
  0x35   : > { %p6623_p2 = pnand %p5922_p1, %p7612_p4  ;;  %s6630_s28 = sand.u32 1, %s6418_s23  }
  0x36   : > { %s7715_s10 = sld [smem:[#allocation41_spill]] }
  0x37   : > { %s7714_s25 = scalar_select %p6623_p2, 1, 0 }
  0x38   : > { %p7625_p8 = pneg %p6623_p2 }
  0x3c   : > { %s6164_s20 = scalar_lea.hbm %s7715_s10, 1024 }
  0x3d   : > { %p6165_p7 = scmp.ne.s32.totalorder %s7715_s10, %s6164_s20  ;;  %p6171_p1 = scmp.lt.u32.totalorder %s6164_s20, %s7715_s10 }
  0x3f   : > { %p6167_p9 = pnand %p7625_p8, %p6165_p7 }
  0x41   : > { %p6168_p10 = pneg %p6167_p9 }
  0x43   : > { %p6173_p0 = pnand %p6171_p1, %p6168_p10 }
  0x45   : > { %6176 = shalt.err (!%p6173_p0)
}
  0x46   : > { %s6177_s3 = scalar_lea.vmem %s545_s27, 1024  ;;  %p6185_p11 = scmp.lt.s32.totalorder %s545_s27, %s545_s27 }
  0x47   : > { %p6178_p4 = scmp.ne.s32.totalorder %s545_s27, %s6177_s3  ;;  %p6186_p6 = scmp.lt.s32.totalorder %s6177_s3, %s6177_s3 }
  0x49   : > { %p6180_p3 = pnand %p6178_p4, %p7625_p8  ;;  %p6187_p13 = por %p6186_p6, %p6185_p11 }
  0x4b   : > { %p6181_p12 = pneg %p6180_p3 }
  0x4d   : > { %p6188_p5 = pnand %p6187_p13, %p6181_p12 }
  0x4f   : > { %6191 = shalt.err (!%p6188_p5)
}
  0x50   : > { %s7619_s18 = smov 128   ;;  %s7621_s19 = smov 8  }
  0x51   : > { %5925 = dma.hbm_to_vmem [thread:$0]  (!%p6623_p2), %s7715_s10, 1024, %s545_s27, [#allocation10], %s7619_s18, %s7619_s18, %s7621_s19  }
  0x52   : > { %p7716_p4 = scmp.ne.s32.totalorder %s7707_s4, 0  ;;  %p7717_p5 = scmp.lt.s32.totalorder %s6422_s24, 2 }
  0x53   : > { %s7623_s30 = sshll.u32 %s6630_s28, 4  ;;  %s7624_s0 = sshll.u32 %s6422_s24, 8 }
  0x54   : > { %p6662_p6 = pnand %p7717_p5, %p7716_p4  ;;  %s7719_s15 = sld [smem:[#allocation32_spill]] }
  0x55   : > { %s617_s4 = scalar_lea.vmem [#allocation6], %s7623_s30  ;;  %s7720_s20 = sand.u32 1, %s6422_s24  }
  0x56   : > { %s7718_s3 = scalar_select %p6662_p6, 1, 0 }
  0x57   : > { %s624_s27 = sshll.u32 %s617_s4, 4  ;;  %s6681_s1 = scalar_lea.sflag [#allocation7], %s7720_s20  ;;  %s6677_s27 = int_to_ptr.vmem [resolvable:$true] %s624_s27 }
  0x58   : > { %p6687_p12 = pneg %p6662_p6 }
  0x5a   : > { %s6673_s13 = scalar_lea.hbm %s7719_s15, %s7624_s0  ;;  %s6197_s4 = scalar_lea.hbm %s7719_s15, 512 }
  0x5b   : > { %s6192_s18 = scalar_lea.hbm %s6673_s13, 256  ;;  %p6198_p3 = scmp.lt.u32.totalorder %s6673_s13, %s7719_s15 }
  0x5c   : > { %p6193_p11 = scmp.ne.s32.totalorder %s6673_s13, %s6192_s18  ;;  %p6199_p7 = scmp.lt.u32.totalorder %s6197_s4, %s6192_s18 }
  0x5d   : > { %s7721_s19 = scalar_select %p6687_p12, 1, 0 }
  0x5e   : > { %p6195_p13 = pnand %p6687_p12, %p6193_p11  ;;  %p6200_p9 = por %p6199_p7, %p6198_p3 }
  0x5f   : > { %p6201_p10 = scmp.lt.u32.totalorder %s6192_s18, %s6673_s13 }
  0x60   : > { %p6196_p0 = pneg %p6195_p13 }
  0x61   : > { %p6202_p1 = por %p6201_p10, %p6200_p9 }
  0x63   : > { %p6203_p4 = pnand %p6202_p1, %p6196_p0 }
  0x65   : > { %6206 = shalt.err (!%p6203_p4)
}
  0x66   : > { %s6207_s20 = scalar_lea.vmem %s6677_s27, 256  ;;  %s6427_s23 = smov [#allocation6]  }
  0x67   : > { %p6208_p5 = scmp.ne.s32.totalorder %s6677_s27, %s6207_s20  ;;  %s6212_s26 = sshll.u32 %s6427_s23, 4  ;;  %s6213_s26 = int_to_ptr.vmem [resolvable:$false] %s6212_s26 }
  0x68   : > { %s6214_s30 = scalar_lea.vmem %s6213_s26, 512  ;;  %p6215_p8 = scmp.lt.s32.totalorder %s6677_s27, %s6213_s26 }
  0x69   : > { %p6210_p11 = pnand %p6208_p5, %p6687_p12  ;;  %p6216_p2 = scmp.lt.s32.totalorder %s6214_s30, %s6207_s20 }
  0x6b   : > { %p6211_p13 = pneg %p6210_p11  ;;  %p6217_p3 = por %p6216_p2, %p6215_p8 }
  0x6d   : > { %p6218_p7 = pnand %p6217_p3, %p6211_p13 }
  0x6f   : > { %6221 = shalt.err (!%p6218_p7)
}
  0x70   : > { %s7722_s18 = smov 8   ;;  %s7723_s0 = smov 128  }
  0x71   : > { %5935 = dma.hbm_to_vmem [thread:$0]  (!%p6662_p6), %s6673_s13, 256, %s6677_s27, %s6681_s1, %s7723_s0, %s7723_s0, %s7722_s18  }
  0x72   : > { %s7724_s4 = sshll.u32 %s6422_s24, 8  ;;  %s7725_s20 = sld [smem:[#allocation33_spill]] }
  0x73   : > { %s7726_s10 = sshll.u32 %s6630_s28, 4  ;;  %s6428_s11 = smov [#allocation12]  }
  0x74   : > { %s638_s15 = scalar_lea.vmem [#allocation8], %s7726_s10  ;;  %s560_s9 = sshll.u32 %s6428_s11, 4  ;;  %s561_s9 = int_to_ptr.vmem [resolvable:$true] %s560_s9 }
  0x75   : > { %s645_s14 = sshll.u32 %s638_s15, 4  ;;  %s7640_s17 = sshll.u32 %s6630_s28, 3  ;;  %s6723_s14 = int_to_ptr.vmem [resolvable:$true] %s645_s14 }
  0x76   : > { %s7727_s12 = sld [smem:[#allocation43_spill]]  ;;  %p7728_p8 = scmp.ne.s32.totalorder %s7714_s25, 0 }
  0x78   : > { %s6719_s30 = scalar_lea.hbm %s7725_s20, %s7724_s4  ;;  %p7729_p0 = pneg %p7728_p8 }
  0x7c   : > { %s6222_s7 = scalar_lea.hbm %s7727_s12, 1024 }
  0x7d   : > { %p6223_p2 = scmp.ne.s32.totalorder %s7727_s12, %s6222_s7  ;;  %p6229_p1 = scmp.lt.u32.totalorder %s6222_s7, %s7727_s12 }
  0x7f   : > { %p6225_p9 = pnand %p6223_p2, %p7729_p0 }
  0x81   : > { %p6226_p10 = pneg %p6225_p9 }
  0x83   : > { %p6231_p4 = pnand %p6229_p1, %p6226_p10 }
  0x85   : > { %6234 = shalt.err (!%p6231_p4)
}
  0x86   : > { %s6235_s11 = scalar_lea.vmem %s561_s9, 1024  ;;  %p7730_p11 = pmov %p7729_p0 }
  0x87   : > { %p6236_p5 = scmp.ne.s32.totalorder %s561_s9, %s6235_s11  ;;  %p6243_p7 = scmp.lt.s32.totalorder %s561_s9, %s561_s9 }
  0x88   : > { %p6244_p6 = scmp.lt.s32.totalorder %s6235_s11, %s6235_s11 }
  0x89   : > { %p6238_p13 = pnand %p6236_p5, %p7730_p11 }
  0x8a   : > { %p6245_p12 = por %p6244_p6, %p6243_p7 }
  0x8b   : > { %p6239_p3 = pneg %p6238_p13 }
  0x8d   : > { %p6246_p0 = pnand %p6245_p12, %p6239_p3 }
  0x8f   : > { %6249 = shalt.err (!%p6246_p0)
}
  0x90   : > { %5928 = dma.hbm_to_vmem [thread:$0]  (!%p7728_p8), %s7727_s12, 1024, %s561_s9, [#allocation13], %s7723_s0, %s7723_s0, %s7722_s18  }
  0x91   : > { %s5085_s16 = sshll.u32 %s6422_s24, 7  ;;  %s7731_s26 = sld [smem:[#allocation31_spill]] }
  0x92   : > { %s599_s25 = scalar_lea.vmem [#allocation3], %s7640_s17  ;;  %s596_s10 = scalar_lea.sflag [#allocation4], %s6630_s28 }
  0x93   : > { %s606_s27 = sshll.u32 %s599_s25, 4  ;;  %p7732_p12 = scmp.ne.s32.totalorder %s7721_s19, 0  ;;  %s607_s27 = int_to_ptr.vmem [resolvable:$true] %s606_s27 }
  0x97   : > { %s6755_s13 = scalar_lea.hbm %s7731_s26, %s5085_s16  ;;  %s6255_s7 = scalar_lea.hbm %s7731_s26, 256 }
  0x98   : > { %s6250_s15 = scalar_lea.hbm %s6755_s13, 128  ;;  %p6256_p9 = scmp.lt.u32.totalorder %s6755_s13, %s7731_s26 }
  0x99   : > { %p6251_p6 = scmp.ne.s32.totalorder %s6755_s13, %s6250_s15  ;;  %p6257_p10 = scmp.lt.u32.totalorder %s6255_s7, %s6250_s15 }
  0x9a   : > { %p6259_p4 = scmp.lt.u32.totalorder %s6250_s15, %s6755_s13 }
  0x9b   : > { %p6253_p2 = pnand %p6251_p6, %p7732_p12  ;;  %p6258_p1 = por %p6257_p10, %p6256_p9 }
  0x9d   : > { %p6254_p8 = pneg %p6253_p2  ;;  %p6260_p5 = por %p6259_p4, %p6258_p1 }
  0x9f   : > { %p6261_p11 = pnand %p6260_p5, %p6254_p8 }
  0xa1   : > { %6264 = shalt.err (!%p6261_p11)
}
  0xa2   : > { %s6265_s23 = scalar_lea.vmem %s607_s27, 128  ;;  %s6429_s25 = smov [#allocation3]  }
  0xa3   : > { %p6266_p13 = scmp.ne.s32.totalorder %s607_s27, %s6265_s23  ;;  %s6270_s17 = sshll.u32 %s6429_s25, 4  ;;  %s6271_s17 = int_to_ptr.vmem [resolvable:$false] %s6270_s17 }
  0xa4   : > { %s6272_s9 = scalar_lea.vmem %s6271_s17, 256  ;;  %p6273_p0 = scmp.lt.s32.totalorder %s607_s27, %s6271_s17 }
  0xa5   : > { %p6268_p3 = pnand %p6266_p13, %p7732_p12  ;;  %p6274_p6 = scmp.lt.s32.totalorder %s6272_s9, %s6265_s23 }
  0xa7   : > { %p6269_p7 = pneg %p6268_p3  ;;  %p6275_p2 = por %p6274_p6, %p6273_p0 }
  0xa9   : > { %p6276_p9 = pnand %p6275_p2, %p6269_p7 }
  0xab   : > { %6279 = shalt.err (!%p6276_p9)
}
  0xac   : > { %p7733_p10 = scmp.ne.s32.totalorder %s7718_s3, 0  ;;  %s7734_s7 = sld [smem:[#allocation34_spill]] }
  0xad   : > { %s6280_s17 = scalar_lea.hbm %s6719_s30, 256  ;;  %s6285_s25 = scalar_lea.hbm %s7725_s20, 512 }
  0xae   : > { %5932 = dma.hbm_to_vmem [thread:$0]  (!%p7733_p10), %s6755_s13, 128, %s607_s27, %s596_s10  }
  0xaf   : > { %p6281_p8 = scmp.ne.s32.totalorder %s6719_s30, %s6280_s17  ;;  %p6286_p5 = scmp.lt.u32.totalorder %s6719_s30, %s7725_s20 }
  0xb0   : > { %p6287_p11 = scmp.lt.u32.totalorder %s6285_s25, %s6280_s17  ;;  %p6289_p3 = scmp.lt.u32.totalorder %s6280_s17, %s6719_s30 }
  0xb1   : > { %p6283_p1 = pnand %p6281_p8, %p7732_p12 }
  0xb2   : > { %s6782_s8 = scalar_lea.hbm %s7734_s7, %s5085_s16  ;;  %p6288_p13 = por %p6287_p11, %p6286_p5 }
  0xb3   : > { %p6284_p4 = pneg %p6283_p1 }
  0xb4   : > { %p6290_p7 = por %p6289_p3, %p6288_p13 }
  0xb6   : > { %p6291_p0 = pnand %p6290_p7, %p6284_p4 }
  0xb8   : > { %6294 = shalt.err (!%p6291_p0)
}
  0xb9   : > { %s6295_s16 = scalar_lea.vmem %s6723_s14, 256  ;;  %s6430_s13 = smov [#allocation8]  }
  0xba   : > { %p6296_p6 = scmp.ne.s32.totalorder %s6723_s14, %s6295_s16  ;;  %s6300_s27 = sshll.u32 %s6430_s13, 4  ;;  %s6301_s27 = int_to_ptr.vmem [resolvable:$false] %s6300_s27 }
  0xbb   : > { %s6302_s12 = scalar_lea.vmem %s6301_s27, 512  ;;  %p6303_p8 = scmp.lt.s32.totalorder %s6723_s14, %s6301_s27 }
  0xbc   : > { %p6298_p2 = pnand %p6296_p6, %p7732_p12  ;;  %p6304_p1 = scmp.lt.s32.totalorder %s6302_s12, %s6295_s16 }
  0xbe   : > { %p6299_p9 = pneg %p6298_p2  ;;  %p6305_p5 = por %p6304_p1, %p6303_p8 }
  0xc0   : > { %p6306_p11 = pnand %p6305_p5, %p6299_p9 }
  0xc2   : > { %6309 = shalt.err (!%p6306_p11)
}
  0xc3   : > { %5938 = dma.hbm_to_vmem [thread:$0]  (!%p7733_p10), %s6719_s30, 256, %s6723_s14, %s6681_s1, %s7723_s0, %s7723_s0, %s7722_s18  }
  0xc4   : > { %s7735_s10 = sshll.u32 %s6630_s28, 3  ;;  %s7736_s17 = sand.u32 1, %s6422_s24  }
  0xc5   : > { %s659_s15 = scalar_lea.vmem [#allocation9], %s7735_s10  ;;  %s656_s4 = scalar_lea.sflag [#allocation10], %s7736_s17 }
  0xc6   : > { %s666_s11 = sshll.u32 %s659_s15, 4  ;;  %s6310_s23 = scalar_lea.hbm %s6782_s8, 128  ;;  %s667_s11 = int_to_ptr.vmem [resolvable:$true] %s666_s11 }
  0xc7   : > { %p6311_p4 = scmp.ne.s32.totalorder %s6782_s8, %s6310_s23  ;;  %s6315_s16 = scalar_lea.hbm %s7734_s7, 256 }
  0xc8   : > { %p6316_p7 = scmp.lt.u32.totalorder %s6782_s8, %s7734_s7  ;;  %p6317_p0 = scmp.lt.u32.totalorder %s6315_s16, %s6310_s23 }
  0xc9   : > { %p6313_p13 = pnand %p6311_p4, %p7732_p12  ;;  %p6319_p2 = scmp.lt.u32.totalorder %s6310_s23, %s6782_s8 }
  0xca   : > { %p6318_p6 = por %p6317_p0, %p6316_p7 }
  0xcb   : > { %p6314_p3 = pneg %p6313_p13 }
  0xcc   : > { %p6320_p9 = por %p6319_p2, %p6318_p6 }
  0xce   : > { %p6321_p8 = pnand %p6320_p9, %p6314_p3 }
  0xd0   : > { %6324 = shalt.err (!%p6321_p8)
}
  0xd1   : > { %s6325_s14 = scalar_lea.vmem %s667_s11, 128  ;;  %s6431_s28 = smov [#allocation9]  }
  0xd2   : > { %p6326_p1 = scmp.ne.s32.totalorder %s667_s11, %s6325_s14  ;;  %s6330_s1 = sshll.u32 %s6431_s28, 4  ;;  %s6331_s1 = int_to_ptr.vmem [resolvable:$false] %s6330_s1 }
  0xd3   : > { %s6332_s18 = scalar_lea.vmem %s6331_s1, 256  ;;  %p6333_p4 = scmp.lt.s32.totalorder %s667_s11, %s6331_s1 }
  0xd4   : > { %p6328_p5 = pnand %p6326_p1, %p7732_p12  ;;  %p6334_p13 = scmp.lt.s32.totalorder %s6332_s18, %s6325_s14 }
  0xd6   : > { %p6329_p11 = pneg %p6328_p5  ;;  %p6335_p10 = por %p6334_p13, %p6333_p4 }
  0xd8   : > { %p6336_p0 = pnand %p6335_p10, %p6329_p11 }
  0xda   : > { %6339 = shalt.err (!%p6336_p0)
}
  0xdb   : > { %p7737_p7 = scmp.ne.s32.totalorder %s7718_s3, 0  ;;  %p7738_p3 = scmp.ne.s32.totalorder %s7713_s21, 0 }
  0xdd   : > { %5941 = dma.hbm_to_vmem [thread:$0]  (!%p7737_p7), %s6782_s8, 128, %s667_s11, %s656_s4  }
  0xde   : > { %675 = sbr.rel (%p7738_p3) target bundleno = 11280 (0x2c10), region = 100 }
  0xe5   : > { %s6833_s19 = sand.u32 1, %s6414_s22   ;;  %p7741_p12 = scmp.ne.s32.totalorder %s7708_s29, 0 }
  0xe6   : > { %7739 = sst [smem:[#allocation29_spill]] %s6833_s19  ;;  %s6836_s0 = sshll.u32 %s6833_s19, 3 }
  0xe7   : > { %7740 = sst [smem:[#allocation30_spill]] %s6836_s0  ;;  %s678_s30 = scalar_lea.sflag [#allocation4], %s6833_s19 }
  0xe8   : > { %s681_s12 = scalar_lea.vmem [#allocation3], %s6836_s0 }
  0xe9   : > { %6385 = dma.done.wait (%p7741_p12), %s678_s30, 128  }
  0xea   : > { %6387 = vsyncadd (%p7741_p12), %s678_s30, 4294967168  ;;  %s686_s21 = sand.u32 1, %s6576_s2   ;;  %s5096_s3 = sshll.u32 %s6833_s19, 4 }
  0xeb   : > { %s687_s8 = scalar_lea.sflag [#allocation7], %s686_s21  ;;  %s6846_s10 = scalar_lea.vmem [#allocation6], %s5096_s3 }
  0xec   : > { %6389 = dma.done.wait (%p7741_p12), %s687_s8, 512  }
  0xed   : > { %6391 = vsyncadd (%p7741_p12), %s687_s8, 4294966784  ;;  %s6852_s15 = scalar_lea.vmem [#allocation8], %s5096_s3  ;;  %s705_s11 = scalar_lea.sflag [#allocation10], %s686_s21 }
  0xee   : > { %s7642_s17 = scalar_lea.vmem [#allocation9], %s6836_s0 }
  0xef   : > { %6393 = dma.done.wait (%p7741_p12), %s705_s11, 128  }
  0xf0   : > { %6395 = vsyncadd (%p7741_p12), %s705_s11, 4294967168  ;;  %p7742_p10 = scmp.eq.s32.totalorder %s6576_s2, 0 }
  0xf2   : > { %6397 = dma.done.wait (%p7742_p10), [#allocation10], 1024   ;;  %p7743_p6 = pmov %p7742_p10 }
  0xf4   : > { %6399 = vsyncadd (%p7743_p6), [#allocation10], 4294966272  ;;  %p7744_p2 = pmov %p7743_p6 }
  0xf6   : > { %6401 = dma.done.wait (%p7744_p2), [#allocation13], 1024   ;;  %p7745_p9 = pmov %p7744_p2 }
  0xf7   : > { %s7746_s25 = sld [smem:[#allocation35_spill]]  ;;  %v6879_v5 = vld [vmem:[%s681_s12] sm:$0xff]  ;;  %v6883_v6 = vld [vmem:[%s7642_s17] sm:$0xff]  ;;  %vm796_vm0 = vcmask 261120   ;;  %v6432_v9 = vmov 0.0   ;;  %vm6433_vm1 = vmmov 0  }
  0xf8   : > { %6403 = vsyncadd (%p7745_p9), [#allocation13], 4294966272  ;;  %v813_v8 = vadd.f32 %v6883_v6, %v6879_v5  ;;  %5417 = vmatprep.subr.mxu0 %v6432_v9  ;;  %5419 = vmatprep.mubr.msk.f32.mxu0 %vm6433_vm1, %v6432_v9  ;;  %s7747_s5 = sld [smem:[#allocation36_spill]]  ;;  %s7667_s18 = smov 96   ;;  %vm910_vm2 = vcmask 64512   ;;  %vm1582_vm3 = vcmask 130048  }
  0xf9   : > { %s7663_s30 = smov 120   ;;  %s7669_s12 = smov 88   ;;  %vm1584_vm4 = vcmask 195584   ;;  %vm7066_vm5 = vmpackc.low %vm910_vm2, %vm910_vm2  ;;  %vm2741_vm6 = vcmask 523264  }
  0xfa   : > { %5404 = vmatprep.mubr.msk.f32.mxu1 %vm796_vm0, %v813_v8  ;;  %s7661_s21 = smov 80   ;;  %s7665_s3 = smov 112  }
  0xfb   : > { %s7659_s8 = smov 72   ;;  %s7653_s11 = smov 104  }
  0xfc   : > { %s7657_s4 = smov 56   ;;  %s7655_s23 = smov 64  }
  0xfd   : > { %v814_v0 = vld [vmem:[%s7746_s25] sm:$0xff]  ;;  %v815_v1 = vld [vmem:[%s7746_s25 + $0x8] sm:$0xff]  ;;  %v816_v2 = vld [vmem:[%s7746_s25 + $0x10] sm:$0xff]  ;;  %s7651_s9 = smov 48   ;;  %s7649_s29 = smov 40  }
  0xfe   : > { %v5760_v3 = vpack.c.bf16 %v815_v1, %v814_v0  ;;  %v817_v4 = vld [vmem:[%s7746_s25 + $0x18] sm:$0xff]  ;;  %v5102_v10 = vld [vmem:[%s7747_s5] ss:$0 sm:$0xff]  ;;  %s7748_s6 = sld [smem:[#allocation37_spill]]  ;;  %s7645_s28 = smov 8  }
  0xff   : > { %v5764_v7 = vpack.c.bf16 %v817_v4, %v816_v2  ;;  %s7647_s14 = smov 16   ;;  %s7643_s17 = smov 24  }
 0x100   : > { %5761 = vmatprep.subr.bf16.mxu1 %v5760_v3  ;;  %s7749_s13 = sld [smem:[#allocation38_spill]]  ;;  %s7750_s16 = sld [smem:[#allocation39_spill]] }
 0x101   : > { %5763 = vmatpush3.bf16.msra.mxu1 %v5760_v3  ;;  %s7753_s27 = sld [smem:[#allocation40_spill]]  ;;  %s7756_s1 = smov 104  }
 0x102   : > { %5765 = vmatprep.subr.bf16.mxu1 %v5764_v7  ;;  %s7770_s26 = smov 120   ;;  %s7773_s7 = smov 56  }
 0x103   : > { %s7774_s20 = smov 64   ;;  %s7779_s19 = sld [smem:[#allocation50_spill]] }
 0x105   : > { %5767 = vmatpush3.bf16.msra.mxu1 %v5764_v7 }
 0x106   : > { %5407 = vmatprep.subr.mxu1 %v6432_v9 }
 0x108   : > { %5405 = vmatmul.mubr.msk.f32.vlgmr.msra.gmra.mrb[0].mxu1 %vm796_vm0, %v6879_v5 }
 0x109   : > { %5409 = vmatprep.mubr.msk.f32.mxu1 %vm6433_vm1, %v6432_v9 }
 0x1db   : > { %v5406_v11 = vpop.f32.mrb[0].mxu1 }
 0x1dc   : > { %v6899_v12 = vadd.f32 %v5406_v11, %v5102_v10  ;;  %v897_v13 = vpop.f32.mrb[1].mxu1  ;;  %v1587_v11 = vld [vmem:[%s7748_s6 + $0x8] sm:$0xff] }
 0x1dd   : > { %v898_v14 = vadd.f32 %v5102_v10, %v897_v13  ;;  %v1586_v10 = vld [vmem:[%s7748_s6] sm:$0xff] }
 0x1de   : > { %v5769_v13 = vpack.c.bf16 %v1587_v11, %v1586_v10 }
 0x1df   : > { %908 = vrot.lane.b32.xlu0 %v898_v14, %s7667_s18  ;;  %v906_v15 = vmul.f32 0.35355338, %v898_v14 }
 0x1e1   : > { %1074 = vrot.lane.b32.xlu1 %v906_v15, %s7663_s30 }
 0x1e3   : > { %1076 = vrot.lane.b32.xlu0 %v898_v14, %s7669_s12 }
 0x1e5   : > { %1241 = vrot.lane.b32.xlu1 %v898_v14, %s7661_s21 }
 0x1e7   : > { %1239 = vrot.lane.b32.xlu0 %v906_v15, %s7665_s3 }
 0x1e9   : > { %1406 = vrot.lane.b32.xlu1 %v898_v14, %s7659_s8 }
 0x1eb   : > { %1404 = vrot.lane.b32.xlu0 %v906_v15, %s7653_s11  ;;  %s7758_s11 = smov 40  }
 0x251   : > { %v909_v16 = vpop.permute.xlu0 %908 }
 0x252   : > { %5408 = vmatpush3.xpose.msk.msra.mxu1 %vm910_vm2, %v909_v16 }
 0x253   : > { %v1075_v17 = vpop.permute.xlu1 %1074  ;;  %5412 = vmatprep.subr.mxu1 %v6432_v9 }
 0x255   : > { %v1077_v18 = vpop.permute.xlu0 %1076  ;;  %5410 = vmatmul.mubr.msk.f32.vlgmr.msra.gmra.mrb[2].mxu1 %vm910_vm2, %v906_v15 }
 0x256   : > { %5418 = vmatpush3.xpose.msk.msra.mxu0 %vm910_vm2, %v1077_v18  ;;  %5414 = vmatprep.mubr.msk.f32.mxu1 %vm6433_vm1, %v6432_v9  ;;  %v1588_v18 = vld [vmem:[%s7748_s6 + $0x10] sm:$0xff] }
 0x257   : > { %v1242_v19 = vpop.permute.xlu1 %1241  ;;  %5427 = vmatprep.subr.mxu0 %v6432_v9 }
 0x259   : > { %5420 = vmatmul.mubr.msk.f32.vlgmr.msra.gmra.mrb[0].mxu0 %vm910_vm2, %v1075_v17  ;;  %v1240_v20 = vpop.permute.xlu0 %1239 }
 0x25a   : > { %5428 = vmatpush3.xpose.msk.msra.mxu0 %vm910_vm2, %v1242_v19  ;;  %5429 = vmatprep.mubr.msk.f32.mxu0 %vm6433_vm1, %v6432_v9  ;;  %v1589_v19 = vld [vmem:[%s7748_s6 + $0x18] sm:$0xff] }
 0x25b   : > { %5437 = vmatprep.subr.mxu0 %v6432_v9  ;;  %v1407_v21 = vpop.permute.xlu1 %1406 }
 0x25d   : > { %5430 = vmatmul.mubr.msk.f32.vlgmr.msra.gmra.mrb[2].mxu0 %vm910_vm2, %v1240_v20  ;;  %v1405_v22 = vpop.permute.xlu0 %1404  ;;  %v5772_v20 = vpack.c.bf16 %v1589_v19, %v1588_v18 }
 0x25e   : > { %5438 = vmatpush3.xpose.msk.msra.mxu0 %vm910_vm2, %v1407_v21  ;;  %5439 = vmatprep.mubr.msk.f32.mxu0 %vm6433_vm1, %v6432_v9 }
 0x261   : > { %5440 = vmatmul.mubr.msk.f32.vlgmr.msra.gmra.mrb[4].mxu0 %vm910_vm2, %v1405_v22 }
 0x262   : > { %5455 = vmatprep.mubr.msk.f32.mxu0 %vm6433_vm1, %v6432_v9 }
 0x328   : > { %v982_v23 = vpop.f32.mrb[2].mxu1 }
 0x329   : > { %v5411_v24 = vpop.f32.mrb[3].mxu1  ;;  %v986_v25 = vsel %vm910_vm2, %v982_v23, -inf }
 0x32a   : > { %987 = vmax.xlane.f32.xlu1 %v986_v25 }
 0x32c   : > { %v1148_v26 = vpop.f32.mrb[0].mxu0 }
 0x32d   : > { %v5421_v27 = vpop.f32.mrb[1].mxu0  ;;  %v1152_v28 = vsel %vm910_vm2, %v1148_v26, -inf }
 0x32e   : > { %1153 = vmax.xlane.f32.xlu0 %v1152_v28 }
 0x330   : > { %v1313_v29 = vpop.f32.mrb[2].mxu0 }
 0x331   : > { %v5431_v30 = vpop.f32.mrb[3].mxu0  ;;  %v1317_v31 = vsel %vm910_vm2, %v1313_v29, -inf }
 0x332   : > { %1318 = vmax.xlane.f32.xlu0 %v1317_v31  ;;  %v5117_v31 = vld [vmem:[%s7749_s13] ss:$0 sm:$0xff] }
 0x334   : > { %v1478_v32 = vpop.f32.mrb[4].mxu0 }
 0x335   : > { %v5441_v33 = vpop.f32.mrb[5].mxu0  ;;  %v1482_v34 = vsel %vm910_vm2, %v1478_v32, -inf }
 0x336   : > { %1483 = vmax.xlane.f32.xlu1 %v1482_v34 }
 0x347   : > { %1163 = vrot.lane.b32.xlu1 %v6899_v12, %s7657_s4 }
 0x3b7   : > { %v988_v35 = vpop.xlane.xlu1 %987 }
 0x3b8   : > { %v989_v36 = vsub.f32 %v982_v23, %v988_v35 }
 0x3ba   : > { %v990_v37 = vmul.f32 1.442695, %v989_v36 }
 0x3bb   : > { %v1154_v38 = vpop.xlane.xlu0 %1153 }
 0x3bc   : > { %6085 = vpow2.f32 %v990_v37  ;;  %v1155_v39 = vsub.f32 %v1148_v26, %v1154_v38 }
 0x3be   : > { %v1156_v40 = vmul.f32 1.442695, %v1155_v39 }
 0x3bf   : > { %v1319_v50 = vpop.xlane.xlu0 %1318 }
 0x3c0   : > { %6087 = vpow2.f32 %v1156_v40  ;;  %v1320_v51 = vsub.f32 %v1313_v29, %v1319_v50  ;;  %v790_v50 = vld [vmem:[%s6846_s10 + $0x8] sm:$0xff] }
 0x3c1   : > { %800 = vst.msk [vmem:[#allocation2 + $0x20] sm:$0xff] %vm796_vm0, %v790_v50 }
 0x3c2   : > { %v1321_v52 = vmul.f32 1.442695, %v1320_v51  ;;  %v793_v51 = vld [vmem:[%s6852_s15 + $0x8] sm:$0xff] }
 0x3c3   : > { %v1484_v41 = vpop.xlane.xlu1 %1483 }
 0x3c4   : > { %v1485_v42 = vsub.f32 %v1478_v32, %v1484_v41 }
 0x3c6   : > { %v6086_v43 = vpop.eup %6085  ;;  %v1486_v44 = vmul.f32 1.442695, %v1485_v42  ;;  %v1706_v42 = vld [vmem:[%s7750_s16] sm:$0xff] }
 0x3c7   : > { %v992_v45 = vsel %vm910_vm2, %v6086_v43, 0.0  ;;  %v1164_v55 = vpop.permute.xlu1 %1163 }
 0x3c8   : > { %6089 = vpow2.f32 %v1486_v44  ;;  %993 = vadd.xlane.f32.xlu0 %v992_v45  ;;  %v1708_v44 = vld [vmem:[%s7750_s16 + $0x10] sm:$0xff]  ;;  %v1709_v45 = vld [vmem:[%s7750_s16 + $0x18] sm:$0xff] }
 0x3c9   : > { %6091 = vpow2.f32 %v1321_v52  ;;  %v795_v52 = vadd.f32 %v793_v51, %v790_v50 }
 0x3ca   : > { %v6088_v46 = vpop.eup %6087 }
 0x3cb   : > { %v1158_v47 = vsel %vm910_vm2, %v6088_v46, 0.0  ;;  %798 = vst.msk [vmem:[#allocation2 + $0x10] sm:$0xff] %vm796_vm0, %v795_v52 }
 0x3cc   : > { %1159 = vadd.xlane.f32.xlu1 %v1158_v47  ;;  %v789_v47 = vld [vmem:[%s6846_s10] sm:$0xff]  ;;  %s7760_s10 = smov 8  }
 0x3cd   : > { %799 = vst.msk [vmem:[#allocation2 + $0x18] sm:$0xff] %vm796_vm0, %v789_v47 }
 0x3d2   : > { %v6090_v48 = vpop.eup %6089 }
 0x3d3   : > { %v1488_v49 = vsel %vm910_vm2, %v6090_v48, 0.0  ;;  %v6092_v53 = vpop.eup %6091 }
 0x3d4   : > { %1489 = vadd.xlane.f32.xlu1 %v1488_v49  ;;  %v1323_v54 = vsel %vm910_vm2, %v6092_v53, 0.0 }
 0x3de   : > { %998 = vrot.lane.b32.xlu0 %v6899_v12, %s7655_s23 }
 0x3e5   : > { %1328 = vrot.lane.b32.xlu1 %v6899_v12, %s7651_s9  ;;  %s7751_s9 = sld [smem:[#allocation47_spill]] }
 0x3fd   : > { %1324 = vadd.xlane.f32.xlu0 %v1323_v54 }
 0x413   : > { %1493 = vrot.lane.b32.xlu0 %v6899_v12, %s7649_s29  ;;  %v6445_v12 = vmov 0.0|0.0   ;;  %s7759_s29 = smov 16  }
 0x414   : > { %5768 = vmatprep.subr.bf16.mxu0 %v6445_v12 }
 0x415   : > { %5770 = vmatpush3.bf16.msra.mxu0 %v5769_v13 }
 0x416   : > { %5771 = vmatprep.subr.bf16.mxu0 %v6445_v12 }
 0x419   : > { %5773 = vmatpush3.bf16.msra.mxu0 %v5772_v20 }
 0x41a   : > { %5780 = vmatprep.subr.bf16.mxu0 %v6445_v12 }
 0x455   : > { %v994_v56 = vpop.xlane.xlu0 %993 }
 0x456   : > { %6093 = vrcp.f32 %v994_v56 }
 0x459   : > { %v999_v57 = vpop.permute.xlu0 %998  ;;  %v1160_v58 = vpop.xlane.xlu1 %1159 }
 0x45a   : > { %6095 = vrcp.f32 %v1160_v58  ;;  %5413 = vmatpush3.msra.mxu1 %v999_v57  ;;  %v5119_v57 = vld [vmem:[%s7751_s9] ss:$0 sm:$0xff] }
 0x45b   : > { %5422 = vmatprep.subr.mxu1 %v6432_v9 }
 0x460   : > { %v6094_v59 = vpop.eup %6093 }
 0x461   : > { %v996_v60 = vmul.f32 %v6094_v59, %v6086_v43  ;;  %v1490_v61 = vpop.xlane.xlu1 %1489 }
 0x463   : > { %5415 = vmatmul.mubr.msk.f32.vlgmr.msra.gmra.mrb[4].mxu1 %vm910_vm2, %v996_v60 }
 0x464   : > { %v6096_v62 = vpop.eup %6095  ;;  %5423 = vmatpush3.msra.mxu1 %v1164_v55  ;;  %5424 = vmatprep.mubr.msk.f32.mxu1 %vm6433_vm1, %v6432_v9 }
 0x465   : > { %v1162_v63 = vmul.f32 %v6096_v62, %v6088_v46  ;;  %v1329_v0 = vpop.permute.xlu1 %1328  ;;  %5432 = vmatprep.subr.mxu1 %v6432_v9  ;;  %v5778_v46 = vpack.c.bf16 %v1709_v45, %v1708_v44 }
 0x467   : > { %5425 = vmatmul.mubr.msk.f32.vlgmr.msra.gmra.mrb[6].mxu1 %vm910_vm2, %v1162_v63 }
 0x468   : > { %5433 = vmatpush3.msra.mxu1 %v1329_v0  ;;  %5434 = vmatprep.mubr.msk.f32.mxu1 %vm6433_vm1, %v6432_v9 }
 0x469   : > { %5442 = vmatprep.subr.mxu1 %v6432_v9 }
 0x48a   : > { %v1325_v1 = vpop.xlane.xlu0 %1324 }
 0x48b   : > { %6097 = vrcp.f32 %v1325_v1  ;;  %v7031_v1 = vld [vmem:[#allocation2 + $0x10] sm:$0xff] }
 0x48c   : > { %6099 = vrcp.f32 %v1490_v61 }
 0x48e   : > { %v1494_v7 = vpop.permute.xlu0 %1493 }
 0x495   : > { %v6098_v2 = vpop.eup %6097 }
 0x496   : > { %v1327_v3 = vmul.f32 %v6098_v2, %v6092_v53  ;;  %v6100_v4 = vpop.eup %6099 }
 0x497   : > { %v1492_v8 = vmul.f32 %v6100_v4, %v6090_v48  ;;  %v792_v48 = vld [vmem:[%s6852_s15] sm:$0xff]  ;;  %s7752_s15 = sld [smem:[#allocation48_spill]] }
 0x498   : > { %5435 = vmatmul.mubr.msk.f32.vlgmr.msra.gmra.mrb[8].mxu1 %vm910_vm2, %v1327_v3  ;;  %v794_v49 = vadd.f32 %v792_v48, %v789_v47 }
 0x499   : > { %5443 = vmatpush3.msra.mxu1 %v1494_v7  ;;  %5444 = vmatprep.mubr.msk.f32.mxu1 %vm6433_vm1, %v6432_v9  ;;  %v5121_v7 = vld [vmem:[%s7753_s27] ss:$0 sm:$0xff] }
 0x49a   : > { %5774 = vmatprep.subr.bf16.mxu1 %v6445_v12  ;;  %797 = vst.msk [vmem:[#allocation2 + $0x8] sm:$0xff] %vm796_vm0, %v794_v49 }
 0x49c   : > { %5445 = vmatmul.mubr.msk.f32.vlgmr.msra.gmra.mrb[10].mxu1 %vm910_vm2, %v1492_v8 }
 0x49d   : > { %5466 = vmatprep.mubr.msk.f32.mxu1 %vm6433_vm1, %v6432_v9  ;;  %v5120_v59 = vld [vmem:[%s7752_s15] ss:$0 sm:$0xff] }
 0x4a1   : > { %v7025_v0 = vld [vmem:[#allocation2 + $0x8] sm:$0xff] }
 0x536   : > { %v1070_v14 = vpop.f32.mrb[4].mxu1 }
 0x537   : > { %v5416_v15 = vpop.f32.mrb[5].mxu1 }
 0x538   : > { %v7044_v15 = vld [vmem:[#allocation2 + $0x18] sm:$0xff] }
 0x53a   : > { %v1235_v16 = vpop.f32.mrb[6].mxu1 }
 0x53b   : > { %1570 = vrot.lane.b32.xlu1 %v1235_v16, %s7645_s28  ;;  %v5426_v17 = vpop.f32.mrb[7].mxu1  ;;  %s7761_s28 = smov 24  }
 0x53c   : > { %v7050_v17 = vld [vmem:[#allocation2 + $0x20] sm:$0xff] }
 0x56b   : > { %v1400_v21 = vpop.f32.mrb[8].mxu1 }
 0x56c   : > { %1574 = vrot.lane.b32.xlu0 %v1400_v21, %s7647_s14  ;;  %v5436_v22 = vpop.f32.mrb[9].mxu1  ;;  %s7771_s14 = smov 80  }
 0x56f   : > { %v1565_v23 = vpop.f32.mrb[10].mxu1 }
 0x570   : > { %1578 = vrot.lane.b32.xlu1 %v1565_v23, %s7643_s17  ;;  %v5446_v24 = vpop.f32.mrb[11].mxu1  ;;  %s7757_s17 = smov 48  }
 0x5ad   : > { %v1571_v25 = vpop.permute.xlu1 %1570 }
 0x5ae   : > { %v1581_v27 = vsel %vm910_vm2, %v1070_v14, %v1571_v25 }
 0x5de   : > { %v1575_v26 = vpop.permute.xlu0 %1574 }
 0x5df   : > { %v1583_v28 = vsel %vm1582_vm3, %v1581_v27, %v1575_v26 }
 0x5e2   : > { %v1579_v29 = vpop.permute.xlu1 %1578 }
 0x5e3   : > { %v1585_v30 = vsel %vm1584_vm4, %v1583_v28, %v1579_v29 }
 0x5e4   : > { %5456 = vmatmul.mubr.msk.f32.vlgmr.msra.gmra.mrb[6].mxu0 %vm796_vm0, %v1585_v30 }
 0x5e5   : > { %5485 = vmatprep.mubr.msk.f32.mxu0 %vm6433_vm1, %v6432_v9 }
 0x6b7   : > { %v1666_v32 = vpop.f32.mrb[6].mxu0 }
 0x6b8   : > { %v1667_v33 = vadd.f32 %v5117_v31, %v1666_v32  ;;  %v5457_v34 = vpop.f32.mrb[7].mxu0 }
 0x6ba   : > { %v1670_v35 = vadd.f32 %v1667_v33, %v6879_v5  ;;  %v1707_v5 = vld [vmem:[%s7750_s16 + $0x8] sm:$0xff] }
 0x6bb   : > { %v5775_v43 = vpack.c.bf16 %v1707_v5, %v1706_v42 }
 0x6bc   : > { %v1671_v36 = vsel %vm796_vm0, %v1670_v35, 0.0 }
 0x6bd   : > { %1672 = vadd.xlane.f32.xlu0 %v1671_v36  ;;  %5776 = vmatpush3.bf16.msra.mxu1 %v5775_v43 }
 0x6be   : > { %5777 = vmatprep.subr.bf16.mxu1 %v6445_v12 }
 0x6c1   : > { %5779 = vmatpush3.bf16.msra.mxu1 %v5778_v46 }
 0x6c2   : > { %5791 = vmatprep.subr.bf16.mxu1 %v6445_v12 }
 0x74a   : > { %v1673_v37 = vpop.xlane.xlu0 %1672 }
 0x74b   : > { %v1675_v38 = vmul.f32 0.03125, %v1673_v37 }
 0x74d   : > { %v1676_v39 = vsub.f32 %v1670_v35, %v1675_v38 }
 0x74f   : > { %v1677_v40 = vmul.f32 %v1676_v39, %v1676_v39 }
 0x751   : > { %v1678_v41 = vsel %vm796_vm0, %v1677_v40, 0.0 }
 0x752   : > { %1679 = vadd.xlane.f32.xlu1 %v1678_v41 }
 0x7df   : > { %v1680_v53 = vpop.xlane.xlu1 %1679 }
 0x7e0   : > { %v1681_v54 = vmul.f32 0.03125, %v1680_v53 }
 0x7e2   : > { %v1682_v55 = vadd.f32 1e-05, %v1681_v54 }
 0x7e4   : > { %6101 = vrsqrt.f32 %v1682_v55 }
 0x7ee   : > { %v6102_v56 = vpop.eup %6101 }
 0x7ef   : > { %v1684_v58 = vmul.f32 %v6102_v56, %v1676_v39 }
 0x7f1   : > { %v1691_v60 = vmul.f32 %v5119_v57, %v1684_v58 }
 0x7f3   : > { %v7017_v61 = vadd.f32 %v5120_v59, %v1691_v60 }
 0x7f5   : > { %v1699_v62 = vadd.f32 %v7017_v61, %v6883_v6 }
 0x7f7   : > { %1700 = vst.msk [vmem:[#allocation2] sm:$0xff] %vm796_vm0, %v1699_v62 }
 0x7fe   : > { %v1701_v63 = vld [vmem:[#allocation2] sm:$0xff] }
 0x7ff   : > { %5467 = vmatmul.mubr.msk.f32.vlgmr.msra.gmra.mrb[12].mxu1 %vm796_vm0, %v1701_v63 }
 0x800   : > { %5469 = vmatprep.mubr.msk.f32.mxu1 %vm6433_vm1, %v6432_v9 }
 0x803   : > { %5470 = vmatmul.mubr.msk.f32.gmra.mrb[14].mxu1 %vm796_vm0, %v7025_v0 }
 0x804   : > { %5472 = vmatprep.mubr.msk.f32.mxu1 %vm6433_vm1, %v6432_v9 }
 0x807   : > { %5473 = vmatmul.mubr.msk.f32.gmra.mrb[16].mxu1 %vm796_vm0, %v7031_v1 }
 0x808   : > { %5475 = vmatprep.mubr.msk.f32.mxu1 %vm6433_vm1, %v6432_v9 }
 0x80b   : > { %5476 = vmatmul.mubr.msk.f32.gmra.mrb[18].mxu1 %vm796_vm0, %v7044_v15 }
 0x80c   : > { %5478 = vmatprep.mubr.msk.f32.mxu1 %vm6433_vm1, %v6432_v9 }
 0x80f   : > { %5479 = vmatmul.mubr.msk.f32.gmra.mrb[20].mxu1 %vm796_vm0, %v7050_v17 }
 0x810   : > { %5506 = vmatprep.mubr.msk.f32.mxu1 %vm6433_vm1, %v6432_v9 }
 0x8d2   : > { %v1798_v6 = vpop.f32.mrb[12].mxu1 }
 0x8d3   : > { %v5468_v2 = vpop.f32.mrb[13].mxu1  ;;  %v1799_v16 = vadd.f32 %v5121_v7, %v1798_v6 }
 0x8d5   : > { %v7054_v18 = vmul.f32 0.35355338, %v1799_v16 }
 0x8d6   : > { %v1803_v3 = vpop.f32.mrb[14].mxu1 }
 0x8d7   : > { %v5471_v4 = vpop.f32.mrb[15].mxu1  ;;  %v1804_v10 = vadd.f32 %v5121_v7, %v1803_v3 }
 0x8da   : > { %v1808_v8 = vpop.f32.mrb[16].mxu1 }
 0x8db   : > { %v1809_v11 = vadd.f32 %v5121_v7, %v1808_v8  ;;  %v5474_v13 = vpop.f32.mrb[17].mxu1 }
 0x8dd   : > { %v7040_v14 = vpack.i.bf16 %v1809_v11, %v1804_v10 }
 0x8de   : > { %v1813_v27 = vpop.f32.mrb[18].mxu1 }
 0x8df   : > { %6006 = vrot.lane.b32.xlu0 %v7040_v14, %s7667_s18  ;;  %v1814_v28 = vadd.f32 %v5121_v7, %v1813_v27  ;;  %v5477_v29 = vpop.f32.mrb[19].mxu1  ;;  %s7764_s18 = sld [smem:[#allocation44_spill]] }
 0x8e2   : > { %v1818_v30 = vpop.f32.mrb[20].mxu1 }
 0x8e3   : > { %6016 = vrot.lane.b32.xlu0 %v7040_v14, %s7669_s12  ;;  %v1819_v31 = vadd.f32 %v5121_v7, %v1818_v30  ;;  %v5480_v32 = vpop.f32.mrb[21].mxu1  ;;  %s7767_s12 = smov 88  }
 0x8e5   : > { %v7078_v33 = vpack.i.bf16 %v1819_v31, %v1814_v28 }
 0x8e7   : > { %1998 = vrot.lane.b32.xlu0 %v7054_v18, %s7663_s30  ;;  %s7766_s30 = scalar_lea.vmem [#allocation9], %s6836_s0  ;;  %s5233_s0 = sshll.u32 %s6576_s2, 7 }
 0x8e8   : > { %s6449_s2 = smov [#allocation14]  }
 0x8eb   : > { %6021 = vrot.lane.b32.xlu0 %v7040_v14, %s7661_s21  ;;  %s7765_s21 = sld [smem:[#allocation46_spill]] }
 0x951   : > { %v6007_v19 = vpop.permute.xlu0 %6006 }
 0x952   : > { %v6009_v20 = vunpack.i.h.bf16 %v6007_v19  ;;  %v6008_v21 = vunpack.i.l.bf16 %v6007_v19 }
 0x954   : > { %v5781_v23 = vpack.c.bf16 %v6009_v20, %v6008_v21 }
 0x955   : > { %v6017_v41 = vpop.permute.xlu0 %6016 }
 0x956   : > { %5783 = vmatpush3.bf16.xpose.msk.msra.mxu0 %vm7066_vm5, %v5781_v23  ;;  %v6019_v46 = vunpack.i.h.bf16 %v6017_v41  ;;  %v6018_v47 = vunpack.i.l.bf16 %v6017_v41 }
 0x957   : > { %5784 = vmatprep.subr.bf16.mxu0 %v6445_v12 }
 0x958   : > { %v5788_v49 = vpack.c.bf16 %v6019_v46, %v6018_v47 }
 0x959   : > { %v1999_v45 = vpop.permute.xlu0 %1998 }
 0x95d   : > { %5486 = vmatmul.mubr.msk.f32.vlgmr.msra.gmra.mrb[8].mxu0 %vm910_vm2, %v7054_v18  ;;  %v6022_v50 = vpop.permute.xlu0 %6021 }
 0x95e   : > { %5492 = vmatprep.mubr.msk.f32.mxu0 %vm6433_vm1, %v6432_v9  ;;  %v6024_v51 = vunpack.i.h.bf16 %v6022_v50  ;;  %v6023_v52 = vunpack.i.l.bf16 %v6022_v50 }
 0x960   : > { %v5795_v53 = vpack.c.bf16 %v6024_v51, %v6023_v52 }
 0xa30   : > { %v1902_v24 = vpop.f32.mrb[8].mxu0 }
 0xa31   : > { %v5487_v25 = vpop.f32.mrb[9].mxu0  ;;  %v1906_v26 = vsel %vm1582_vm3, %v1902_v24, -inf }
 0xa32   : > { %1907 = vmax.xlane.f32.xlu1 %v1906_v26 }
 0xabf   : > { %v1908_v34 = vpop.xlane.xlu1 %1907 }
 0xac0   : > { %v1909_v35 = vsub.f32 %v1902_v24, %v1908_v34 }
 0xac2   : > { %v1910_v36 = vmul.f32 1.442695, %v1909_v35 }
 0xac4   : > { %6103 = vpow2.f32 %v1910_v36 }
 0xace   : > { %v6104_v37 = vpop.eup %6103 }
 0xacf   : > { %v1912_v38 = vsel %vm1582_vm3, %v6104_v37, 0.0 }
 0xad0   : > { %1913 = vadd.xlane.f32.xlu1 %v1912_v38 }
 0xae1   : > { %6011 = vrot.lane.b32.xlu1 %v7078_v33, %s7655_s23  ;;  %s7769_s23 = smov 112  }
 0xae5   : > { %2170 = vrot.lane.b32.xlu1 %v7054_v18, %s7665_s3  ;;  %s7768_s3 = smov 96  }
 0xb5d   : > { %v1914_v39 = vpop.xlane.xlu1 %1913 }
 0xb5e   : > { %6105 = vrcp.f32 %v1914_v39 }
 0xb61   : > { %v6012_v40 = vpop.permute.xlu1 %6011 }
 0xb62   : > { %v6014_v42 = vunpack.i.h.bf16 %v6012_v40  ;;  %v6013_v5 = vunpack.i.l.bf16 %v6012_v40 }
 0xb64   : > { %v5785_v43 = vpack.c.bf16 %v6014_v42, %v6013_v5 }
 0xb65   : > { %v2171_v54 = vpop.permute.xlu1 %2170 }
 0xb66   : > { %5786 = vmatpush3.bf16.msra.mxu0 %v5785_v43 }
 0xb67   : > { %5787 = vmatprep.subr.bf16.mxu0 %v6445_v12 }
 0xb68   : > { %v6106_v44 = vpop.eup %6105 }
 0xb69   : > { %v1916_v48 = vmul.f32 %v6106_v44, %v6104_v37 }
 0xb6b   : > { %5493 = vmatmul.mubr.msk.f32.vlgmr.msra.gmra.mrb[10].mxu0 %vm1582_vm3, %v1916_v48 }
 0xb6c   : > { %5499 = vmatprep.mubr.msk.f32.mxu0 %vm6433_vm1, %v6432_v9 }
 0xb6f   : > { %5790 = vmatpush3.bf16.xpose.msk.msra.mxu0 %vm7066_vm5, %v5788_v49 }
 0xb70   : > { %5794 = vmatprep.subr.bf16.mxu0 %v6445_v12 }
 0xb76   : > { %5500 = vmatmul.mubr.msk.f32.vlgmr.msra.gmra.mrb[12].mxu0 %vm910_vm2, %v1999_v45 }
 0xb77   : > { %5797 = vmatpush3.bf16.xpose.msk.msra.mxu0 %vm7066_vm5, %v5795_v53  ;;  %5513 = vmatprep.mubr.msk.f32.mxu0 %vm6433_vm1, %v6432_v9 }
 0xb78   : > { %5805 = vmatprep.subr.bf16.mxu0 %v6445_v12 }
 0xb7e   : > { %5514 = vmatmul.mubr.msk.f32.vlgmr.msra.gmra.mrb[14].mxu0 %vm910_vm2, %v2171_v54 }
 0xb7f   : > { %5534 = vmatprep.mubr.msk.f32.mxu0 %vm6433_vm1, %v6432_v9 }
 0xc3e   : > { %v7101_v55 = vpop.f32.mrb[10].mxu0 }
 0xc3f   : > { %v5494_v56 = vpop.f32.mrb[11].mxu0 }
 0xc40   : > { %v2529_v56 = vld [vmem:[#allocation11] sm:$0xff] }
 0xc49   : > { %v2076_v57 = vpop.f32.mrb[12].mxu0 }
 0xc4a   : > { %v5501_v58 = vpop.f32.mrb[13].mxu0  ;;  %v2080_v59 = vsel %vm1582_vm3, %v2076_v57, -inf }
 0xc4b   : > { %2081 = vmax.xlane.f32.xlu0 %v2080_v59  ;;  %v2531_v58 = vld [vmem:[#allocation11 + $0x10] sm:$0xff] }
 0xc51   : > { %v2248_v60 = vpop.f32.mrb[14].mxu0 }
 0xc52   : > { %v5515_v62 = vpop.f32.mrb[15].mxu0  ;;  %v2252_v63 = vsel %vm1582_vm3, %v2248_v60, -inf }
 0xc53   : > { %2253 = vmax.xlane.f32.xlu1 %v2252_v63 }
 0xc64   : > { %6026 = vrot.lane.b32.xlu1 %v7078_v33, %s7657_s4  ;;  %s7762_s4 = sld [smem:[#allocation42_spill]] }
 0xc68   : > { %6036 = vrot.lane.b32.xlu1 %v7040_v14, %s7659_s8  ;;  %s7763_s8 = sld [smem:[#allocation45_spill]] }
 0xc6c   : > { %2342 = vrot.lane.b32.xlu1 %v7054_v18, %s7756_s1 }
 0xcd8   : > { %v2082_v6 = vpop.xlane.xlu0 %2081 }
 0xcd9   : > { %v2083_v2 = vsub.f32 %v2076_v57, %v2082_v6  ;;  %v2530_v57 = vld [vmem:[#allocation11 + $0x8] sm:$0xff] }
 0xcda   : > { %v5809_v59 = vpack.c.bf16 %v2530_v57, %v2529_v56  ;;  %v5149_v56 = vld [vmem:[%s7765_s21] ss:$0 sm:$0xff] }
 0xcdb   : > { %v2084_v3 = vmul.f32 1.442695, %v2083_v2 }
 0xcdd   : > { %6107 = vpow2.f32 %v2084_v3 }
 0xce0   : > { %v2254_v4 = vpop.xlane.xlu1 %2253 }
 0xce1   : > { %v2255_v7 = vsub.f32 %v2248_v60, %v2254_v4  ;;  %v2532_v60 = vld [vmem:[#allocation11 + $0x18] sm:$0xff] }
 0xce2   : > { %v5812_v62 = vpack.c.bf16 %v2532_v60, %v2531_v58 }
 0xce3   : > { %v2256_v8 = vmul.f32 1.442695, %v2255_v7 }
 0xce4   : > { %v6027_v10 = vpop.permute.xlu1 %6026 }
 0xce5   : > { %6109 = vpow2.f32 %v2256_v8  ;;  %v6029_v11 = vunpack.i.h.bf16 %v6027_v10  ;;  %v6028_v13 = vunpack.i.l.bf16 %v6027_v10 }
 0xce7   : > { %v6108_v16 = vpop.eup %6107  ;;  %v5792_v19 = vpack.c.bf16 %v6029_v11, %v6028_v13  ;;  %v5143_v11 = vld [vmem:[%s7762_s4] ss:$0 sm:$0xff] }
 0xce8   : > { %v2086_v20 = vsel %vm1582_vm3, %v6108_v16, 0.0  ;;  %v6037_v30 = vpop.permute.xlu1 %6036 }
 0xce9   : > { %2087 = vadd.xlane.f32.xlu0 %v2086_v20  ;;  %5793 = vmatpush3.bf16.msra.mxu1 %v5792_v19  ;;  %v6039_v32 = vunpack.i.h.bf16 %v6037_v30  ;;  %v6038_v34 = vunpack.i.l.bf16 %v6037_v30 }
 0xcea   : > { %5798 = vmatprep.subr.bf16.mxu1 %v6445_v12 }
 0xceb   : > { %v5802_v36 = vpack.c.bf16 %v6039_v32, %v6038_v34  ;;  %v2728_v32 = vld [vmem:[%s7763_s8 + $0x10] sm:$0xff] }
 0xcec   : > { %v2343_v37 = vpop.permute.xlu1 %2342 }
 0xcef   : > { %v6110_v14 = vpop.eup %6109 }
 0xcf0   : > { %v2258_v18 = vsel %vm1582_vm3, %v6110_v14, 0.0 }
 0xcf1   : > { %2259 = vadd.xlane.f32.xlu0 %v2258_v18 }
 0xd07   : > { %6031 = vrot.lane.b32.xlu0 %v7078_v33, %s7757_s17 }
 0xd76   : > { %v2088_v21 = vpop.xlane.xlu0 %2087 }
 0xd77   : > { %6111 = vrcp.f32 %v2088_v21 }
 0xd7e   : > { %v2260_v23 = vpop.xlane.xlu0 %2259 }
 0xd7f   : > { %6113 = vrcp.f32 %v2260_v23 }
 0xd81   : > { %v6112_v24 = vpop.eup %6111 }
 0xd82   : > { %v2090_v25 = vmul.f32 %v6112_v24, %v6108_v16  ;;  %v6032_v26 = vpop.permute.xlu0 %6031 }
 0xd83   : > { %v6034_v27 = vunpack.i.h.bf16 %v6032_v26  ;;  %v6033_v28 = vunpack.i.l.bf16 %v6032_v26  ;;  %v2642_v26 = vld [vmem:[#allocation12 + $0x8] sm:$0xff] }
 0xd84   : > { %5507 = vmatmul.mubr.msk.f32.vlgmr.msra.gmra.mrb[22].mxu1 %vm1582_vm3, %v2090_v25  ;;  %v2641_v25 = vld [vmem:[#allocation12] sm:$0xff] }
 0xd85   : > { %v5799_v29 = vpack.c.bf16 %v6034_v27, %v6033_v28  ;;  %5520 = vmatprep.mubr.msk.f32.mxu1 %vm6433_vm1, %v6432_v9  ;;  %v5815_v27 = vpack.c.bf16 %v2642_v26, %v2641_v25  ;;  %v2643_v28 = vld [vmem:[#allocation12 + $0x10] sm:$0xff] }
 0xd86   : > { %v7225_v26 = vld [vmem:[%s7766_s30] sm:$0xff]  ;;  %s7772_s30 = smov 72  }
 0xd87   : > { %5800 = vmatpush3.bf16.msra.mxu1 %v5799_v29  ;;  %v2644_v29 = vld [vmem:[#allocation12 + $0x18] sm:$0xff] }
 0xd88   : > { %5801 = vmatprep.subr.bf16.mxu1 %v6445_v12  ;;  %v5818_v30 = vpack.c.bf16 %v2644_v29, %v2643_v28  ;;  %v5158_v28 = vld [vmem:[%s7747_s5 + $0x1] ss:$0 sm:$0xff] }
 0xd89   : > { %v6114_v31 = vpop.eup %6113 }
 0xd8a   : > { %v2262_v35 = vmul.f32 %v6114_v31, %v6110_v14  ;;  %v2727_v31 = vld [vmem:[%s7763_s8 + $0x8] sm:$0xff] }
 0xd8c   : > { %5521 = vmatmul.mubr.msk.f32.vlgmr.msra.gmra.mrb[24].mxu1 %vm1582_vm3, %v2262_v35  ;;  %v2729_v35 = vld [vmem:[%s7763_s8 + $0x18] sm:$0xff] }
 0xd8d   : > { %5527 = vmatprep.mubr.msk.f32.mxu1 %vm6433_vm1, %v6432_v9 }
 0xd90   : > { %5804 = vmatpush3.bf16.xpose.msk.msra.mxu1 %vm7066_vm5, %v5802_v36  ;;  %v5824_v36 = vpack.c.bf16 %v2729_v35, %v2728_v32 }
 0xd91   : > { %5814 = vmatprep.subr.bf16.mxu1 %v6445_v12 }
 0xd97   : > { %5528 = vmatmul.mubr.msk.f32.vlgmr.msra.gmra.mrb[26].mxu1 %vm910_vm2, %v2343_v37  ;;  %v2730_v37 = vld [vmem:[%s7763_s8 + $0x20] sm:$0xff] }
 0xd98   : > { %5556 = vmatprep.mubr.msk.f32.mxu1 %vm6433_vm1, %v6432_v9  ;;  %5816 = vmatpush3.bf16.msra.mxu1 %v5815_v27 }
 0xd99   : > { %5817 = vmatprep.subr.bf16.mxu1 %v6445_v12 }
 0xd9c   : > { %5819 = vmatpush3.bf16.msra.mxu1 %v5818_v30 }
 0xe57   : > { %v2166_v38 = vpop.f32.mrb[22].mxu1 }
 0xe58   : > { %v5508_v39 = vpop.f32.mrb[23].mxu1 }
 0xe5f   : > { %v2338_v40 = vpop.f32.mrb[24].mxu1 }
 0xe60   : > { %v5522_v41 = vpop.f32.mrb[25].mxu1 }
 0xe6a   : > { %v2420_v42 = vpop.f32.mrb[26].mxu1 }
 0xe6b   : > { %v5529_v5 = vpop.f32.mrb[27].mxu1  ;;  %v2424_v43 = vsel %vm1582_vm3, %v2420_v42, -inf }
 0xe6c   : > { %2425 = vmax.xlane.f32.xlu0 %v2424_v43  ;;  %v5145_v43 = vld [vmem:[%s7751_s9 + $0x1] ss:$0 sm:$0xff] }
 0xe82   : > { %6041 = vrot.lane.b32.xlu0 %v7078_v33, %s7758_s11 }
 0xe86   : > { %2519 = vrot.lane.b32.xlu0 %v2338_v40, %s7759_s29 }
 0xef9   : > { %v2426_v44 = vpop.xlane.xlu0 %2425 }
 0xefa   : > { %v2427_v45 = vsub.f32 %v2420_v42, %v2426_v44 }
 0xefc   : > { %v2428_v46 = vmul.f32 1.442695, %v2427_v45  ;;  %v5146_v45 = vld [vmem:[%s7752_s15 + $0x1] ss:$0 sm:$0xff] }
 0xefd   : > { %v6042_v47 = vpop.permute.xlu0 %6041 }
 0xefe   : > { %6115 = vpow2.f32 %v2428_v46  ;;  %v6044_v48 = vunpack.i.h.bf16 %v6042_v47  ;;  %v6043_v49 = vunpack.i.l.bf16 %v6042_v47 }
 0xf00   : > { %v5806_v50 = vpack.c.bf16 %v6044_v48, %v6043_v49  ;;  %v2732_v48 = vld [vmem:[%s7763_s8 + $0x30] sm:$0xff]  ;;  %v2733_v49 = vld [vmem:[%s7763_s8 + $0x38] sm:$0xff] }
 0xf01   : > { %v2520_v4 = vpop.permute.xlu0 %2519 }
 0xf02   : > { %5807 = vmatpush3.bf16.msra.mxu0 %v5806_v50  ;;  %v5830_v50 = vpack.c.bf16 %v2733_v49, %v2732_v48 }
 0xf03   : > { %5808 = vmatprep.subr.bf16.mxu0 %v6445_v12 }
 0xf08   : > { %v6116_v51 = vpop.eup %6115 }
 0xf09   : > { %v2430_v52 = vsel %vm1582_vm3, %v6116_v51, 0.0 }
 0xf0a   : > { %2431 = vadd.xlane.f32.xlu1 %v2430_v52 }
 0xf1b   : > { %2515 = vrot.lane.b32.xlu1 %v2166_v38, %s7760_s10  ;;  %v2731_v38 = vld [vmem:[%s7763_s8 + $0x28] sm:$0xff] }
 0xf1c   : > { %v5827_v39 = vpack.c.bf16 %v2731_v38, %v2730_v37 }
 0xf97   : > { %v2432_v33 = vpop.xlane.xlu1 %2431 }
 0xf98   : > { %6117 = vrcp.f32 %v2432_v33 }
 0xf9b   : > { %v2516_v2 = vpop.permute.xlu1 %2515 }
 0xf9c   : > { %v2526_v3 = vsel %vm910_vm2, %v7101_v55, %v2516_v2 }
 0xf9d   : > { %v2527_v7 = vsel %vm1582_vm3, %v2526_v3, %v2520_v4 }
 0xfa2   : > { %v6118_v53 = vpop.eup %6117 }
 0xfa3   : > { %v2434_v54 = vmul.f32 %v6118_v53, %v6116_v51  ;;  %v5147_v51 = vld [vmem:[%s7764_s18] ss:$0 sm:$0xff] }
 0xfa5   : > { %5535 = vmatmul.mubr.msk.f32.vlgmr.msra.gmra.mrb[16].mxu0 %vm1582_vm3, %v2434_v54 }
 0xfa6   : > { %5545 = vmatprep.mubr.msk.f32.mxu0 %vm6433_vm1, %v6432_v9  ;;  %5810 = vmatpush3.bf16.msra.mxu0 %v5809_v59 }
 0xfa7   : > { %5811 = vmatprep.subr.bf16.mxu0 %v6445_v12 }
 0xfaa   : > { %5813 = vmatpush3.bf16.msra.mxu0 %v5812_v62 }
 0xfab   : > { %5820 = vmatprep.subr.bf16.mxu0 %v6445_v12 }
0x1078   : > { %v2510_v63 = vpop.f32.mrb[16].mxu0 }
0x1079   : > { %2523 = vrot.lane.b32.xlu1 %v2510_v63, %s7761_s28  ;;  %v5536_v6 = vpop.f32.mrb[17].mxu0 }
0x10eb   : > { %v2524_v8 = vpop.permute.xlu1 %2523 }
0x10ec   : > { %v2528_v10 = vsel %vm1584_vm4, %v2527_v7, %v2524_v8  ;;  %v5153_v7 = vld [vmem:[%s7746_s25 + $0x20] sm:$0xff]  ;;  %v5154_v8 = vld [vmem:[%s7746_s25 + $0x28] sm:$0xff] }
0x10ed   : > { %5546 = vmatmul.mubr.msk.f32.vlgmr.msra.gmra.mrb[18].mxu0 %vm796_vm0, %v2528_v10  ;;  %v5832_v10 = vpack.c.bf16 %v5154_v8, %v5153_v7 }
0x10ee   : > { %5575 = vmatprep.mubr.msk.f32.mxu0 %vm6433_vm1, %v6432_v9 }
0x10ef   : > { %5833 = vmatprep.subr.bf16.mxu1 %v5832_v10 }
0x11c0   : > { %v2609_v13 = vpop.f32.mrb[18].mxu0 }
0x11c1   : > { %v2610_v16 = vadd.f32 %v5143_v11, %v2609_v13  ;;  %v5547_v19 = vpop.f32.mrb[19].mxu0  ;;  %v5155_v11 = vld [vmem:[%s7746_s25 + $0x30] sm:$0xff]  ;;  %v5156_v13 = vld [vmem:[%s7746_s25 + $0x38] sm:$0xff] }
0x11c3   : > { %v2613_v55 = vadd.f32 %v2610_v16, %v7017_v61  ;;  %v2726_v61 = vld [vmem:[%s7763_s8] sm:$0xff]  ;;  %v5836_v16 = vpack.c.bf16 %v5156_v13, %v5155_v11 }
0x11c4   : > { %v5821_v34 = vpack.c.bf16 %v2727_v31, %v2726_v61 }
0x11c5   : > { %v2614_v20 = vsel %vm796_vm0, %v2613_v55, 0.0 }
0x11c6   : > { %2615 = vadd.xlane.f32.xlu0 %v2614_v20  ;;  %5822 = vmatpush3.bf16.msra.mxu0 %v5821_v34 }
0x11c7   : > { %5823 = vmatprep.subr.bf16.mxu0 %v6445_v12 }
0x11ca   : > { %5825 = vmatpush3.bf16.msra.mxu0 %v5824_v36 }
0x11cb   : > { %5826 = vmatprep.subr.bf16.mxu0 %v6445_v12 }
0x11ce   : > { %5828 = vmatpush3.bf16.msra.mxu0 %v5827_v39 }
0x11cf   : > { %5829 = vmatprep.subr.bf16.mxu0 %v6445_v12 }
0x11d2   : > { %5831 = vmatpush3.bf16.msra.mxu0 %v5830_v50 }
0x11d3   : > { %5599 = vmatprep.subr.mxu0 %v6432_v9 }
0x1253   : > { %v2616_v14 = vpop.xlane.xlu0 %2615 }
0x1254   : > { %v2617_v18 = vmul.f32 0.03125, %v2616_v14 }
0x1256   : > { %v2618_v21 = vsub.f32 %v2613_v55, %v2617_v18  ;;  %v5151_v18 = vld [vmem:[%s7751_s9 + $0x2] ss:$0 sm:$0xff] }
0x1258   : > { %v2619_v23 = vmul.f32 %v2618_v21, %v2618_v21 }
0x125a   : > { %v2620_v24 = vsel %vm796_vm0, %v2619_v23, 0.0  ;;  %v5152_v23 = vld [vmem:[%s7752_s15 + $0x2] ss:$0 sm:$0xff] }
0x125b   : > { %2621 = vadd.xlane.f32.xlu1 %v2620_v24 }
0x12e8   : > { %v2622_v40 = vpop.xlane.xlu1 %2621 }
0x12e9   : > { %v2623_v41 = vmul.f32 0.03125, %v2622_v40 }
0x12eb   : > { %v2624_v42 = vadd.f32 1e-05, %v2623_v41 }
0x12ed   : > { %6119 = vrsqrt.f32 %v2624_v42 }
0x12f7   : > { %v6120_v5 = vpop.eup %6119 }
0x12f8   : > { %v2626_v44 = vmul.f32 %v6120_v5, %v2618_v21 }
0x12fa   : > { %v2633_v46 = vmul.f32 %v5145_v43, %v2626_v44 }
0x12fc   : > { %v2640_v47 = vadd.f32 %v5146_v45, %v2633_v46 }
0x12fe   : > { %5557 = vmatmul.mubr.msk.f32.vlgmr.msra.gmra.mrb[28].mxu1 %vm796_vm0, %v2640_v47 }
0x12ff   : > { %5835 = vmatpush3.bf16.msra.mxu1 %v5832_v10 }
0x1300   : > { %5837 = vmatprep.subr.bf16.mxu1 %v5836_v16 }
0x1303   : > { %5839 = vmatpush3.bf16.msra.mxu1 %v5836_v16 }
0x1304   : > { %5589 = vmatprep.subr.mxu1 %v6432_v9 }
0x13d1   : > { %v2721_v52 = vpop.f32.mrb[28].mxu1 }
0x13d2   : > { %v2722_v33 = vadd.f32 %v5147_v51, %v2721_v52  ;;  %v5558_v53 = vpop.f32.mrb[29].mxu1 }
0x13d4   : > { %v2725_v54 = vmax.f32 %v2722_v33, 0.0 }
0x13d6   : > { %5576 = vmatmul.mubr.msk.f32.vlgmr.msra.gmra.mrb[20].mxu0 %vm2741_vm6, %v2725_v54 }
0x13d7   : > { %5601 = vmatprep.mubr.msk.f32.mxu0 %vm6433_vm1, %v6432_v9 }
0x14a9   : > { %v2811_v57 = vpop.f32.mrb[20].mxu0 }
0x14aa   : > { %v2812_v58 = vadd.f32 %v5149_v56, %v2811_v57  ;;  %v5577_v59 = vpop.f32.mrb[21].mxu0 }
0x14ac   : > { %v2815_v60 = vadd.f32 %v2812_v58, %v2640_v47 }
0x14ae   : > { %v2816_v62 = vsel %vm796_vm0, %v2815_v60, 0.0 }
0x14af   : > { %2817 = vadd.xlane.f32.xlu0 %v2816_v62 }
0x153c   : > { %v2818_v63 = vpop.xlane.xlu0 %2817 }
0x153d   : > { %v2819_v6 = vmul.f32 0.03125, %v2818_v63 }
0x153f   : > { %v2820_v2 = vsub.f32 %v2815_v60, %v2819_v6 }
0x1541   : > { %v2821_v3 = vmul.f32 %v2820_v2, %v2820_v2 }
0x1543   : > { %v2822_v4 = vsel %vm796_vm0, %v2821_v3, 0.0 }
0x1544   : > { %2823 = vadd.xlane.f32.xlu0 %v2822_v4 }
0x15d1   : > { %v2824_v19 = vpop.xlane.xlu0 %2823 }
0x15d2   : > { %v2825_v55 = vmul.f32 0.03125, %v2824_v19 }
0x15d4   : > { %v2826_v20 = vadd.f32 1e-05, %v2825_v55 }
0x15d6   : > { %6121 = vrsqrt.f32 %v2826_v20 }
0x15e0   : > { %v6122_v14 = vpop.eup %6121 }
0x15e1   : > { %v2828_v21 = vmul.f32 %v6122_v14, %v2820_v2 }
0x15e3   : > { %v2835_v24 = vmul.f32 %v5151_v18, %v2828_v21 }
0x15e5   : > { %v7221_v25 = vadd.f32 %v5152_v23, %v2835_v24 }
0x15e7   : > { %v2843_v27 = vadd.f32 %v7225_v26, %v7221_v25 }
0x15e9   : > { %5586 = vmatprep.mubr.msk.f32.mxu1 %vm796_vm0, %v2843_v27 }
0x15ea   : > { %5587 = vmatmul.mubr.msk.f32.vlgmr.msra.gmra.mrb[30].mxu1 %vm796_vm0, %v7221_v25 }
0x15eb   : > { %5591 = vmatprep.mubr.msk.f32.mxu1 %vm6433_vm1, %v6432_v9 }
0x16bd   : > { %v5588_v29 = vpop.f32.mrb[30].mxu1 }
0x16be   : > { %v7237_v30 = vadd.f32 %v5588_v29, %v5158_v28  ;;  %v2929_v61 = vpop.f32.mrb[31].mxu1 }
0x16bf   : > { %v2930_v31 = vadd.f32 %v5158_v28, %v2929_v61 }
0x16c1   : > { %3107 = vrot.lane.b32.xlu0 %v2930_v31, %s7767_s12  ;;  %2940 = vrot.lane.b32.xlu1 %v2930_v31, %s7768_s3  ;;  %v2938_v32 = vmul.f32 0.35355338, %v2930_v31 }
0x16c5   : > { %3270 = vrot.lane.b32.xlu0 %v2938_v32, %s7769_s23  ;;  %3105 = vrot.lane.b32.xlu1 %v2938_v32, %s7770_s26 }
0x16c9   : > { %3435 = vrot.lane.b32.xlu0 %v2938_v32, %s7756_s1  ;;  %3272 = vrot.lane.b32.xlu1 %v2930_v31, %s7771_s14 }
0x16cd   : > { %3437 = vrot.lane.b32.xlu1 %v2930_v31, %s7772_s30 }
0x1733   : > { %v3108_v34 = vpop.permute.xlu0 %3107  ;;  %v2941_v35 = vpop.permute.xlu1 %2940 }
0x1734   : > { %5590 = vmatpush3.xpose.msk.msra.mxu1 %vm910_vm2, %v2941_v35  ;;  %5600 = vmatpush3.xpose.msk.msra.mxu0 %vm910_vm2, %v3108_v34  ;;  %v5173_v34 = vld [vmem:[%s7748_s6 + $0x20] sm:$0xff]  ;;  %v5174_v35 = vld [vmem:[%s7748_s6 + $0x28] sm:$0xff] }
0x1735   : > { %5609 = vmatprep.subr.mxu0 %v6432_v9  ;;  %5594 = vmatprep.subr.mxu1 %v6432_v9 }
0x1737   : > { %v3106_v36 = vpop.permute.xlu1 %3105  ;;  %5592 = vmatmul.mubr.msk.f32.vlgmr.msra.gmra.mrb[32].mxu1 %vm910_vm2, %v2938_v32  ;;  %v3271_v38 = vpop.permute.xlu0 %3270 }
0x1738   : > { %5602 = vmatmul.mubr.msk.f32.vlgmr.msra.gmra.mrb[22].mxu0 %vm910_vm2, %v3106_v36  ;;  %5596 = vmatprep.mubr.msk.f32.mxu1 %vm6433_vm1, %v6432_v9  ;;  %v5841_v36 = vpack.c.bf16 %v5174_v35, %v5173_v34 }
0x1739   : > { %5611 = vmatprep.mubr.msk.f32.mxu0 %vm6433_vm1, %v6432_v9 }
0x173b   : > { %v3273_v37 = vpop.permute.xlu1 %3272  ;;  %v3436_v40 = vpop.permute.xlu0 %3435 }
0x173c   : > { %5610 = vmatpush3.xpose.msk.msra.mxu0 %vm910_vm2, %v3273_v37 }
0x173d   : > { %5619 = vmatprep.subr.mxu0 %v6432_v9 }
0x173f   : > { %5612 = vmatmul.mubr.msk.f32.vlgmr.msra.gmra.mrb[24].mxu0 %vm910_vm2, %v3271_v38  ;;  %v3438_v39 = vpop.permute.xlu1 %3437 }
0x1740   : > { %5620 = vmatpush3.xpose.msk.msra.mxu0 %vm910_vm2, %v3438_v39  ;;  %5621 = vmatprep.mubr.msk.f32.mxu0 %vm6433_vm1, %v6432_v9 }
0x1741   : > { %5840 = vmatprep.subr.bf16.mxu0 %v6445_v12 }
0x1743   : > { %5622 = vmatmul.mubr.msk.f32.vlgmr.msra.gmra.mrb[26].mxu0 %vm910_vm2, %v3436_v40 }
0x1744   : > { %5637 = vmatprep.mubr.msk.f32.mxu0 %vm6433_vm1, %v6432_v9  ;;  %5842 = vmatpush3.bf16.msra.mxu0 %v5841_v36 }
0x1745   : > { %5843 = vmatprep.subr.bf16.mxu0 %v6445_v12 }
0x180a   : > { %v3013_v41 = vpop.f32.mrb[32].mxu1 }
0x180b   : > { %v5593_v42 = vpop.f32.mrb[33].mxu1  ;;  %v3179_v5 = vpop.f32.mrb[22].mxu0  ;;  %v3017_v43 = vsel %vm910_vm2, %v3013_v41, -inf }
0x180c   : > { %v5603_v44 = vpop.f32.mrb[23].mxu0  ;;  %3018 = vmax.xlane.f32.xlu1 %v3017_v43  ;;  %v3183_v45 = vsel %vm910_vm2, %v3179_v5, -inf  ;;  %v5176_v42 = vld [vmem:[%s7748_s6 + $0x38] sm:$0xff] }
0x180d   : > { %3184 = vmax.xlane.f32.xlu0 %v3183_v45 }
0x1812   : > { %v3344_v46 = vpop.f32.mrb[24].mxu0 }
0x1813   : > { %v5613_v47 = vpop.f32.mrb[25].mxu0  ;;  %v3348_v48 = vsel %vm910_vm2, %v3344_v46, -inf }
0x1814   : > { %3349 = vmax.xlane.f32.xlu0 %v3348_v48 }
0x1816   : > { %v3509_v49 = vpop.f32.mrb[26].mxu0 }
0x1817   : > { %v5623_v50 = vpop.f32.mrb[27].mxu0  ;;  %v3513_v51 = vsel %vm910_vm2, %v3509_v49, -inf }
0x1818   : > { %3514 = vmax.xlane.f32.xlu1 %v3513_v51 }
0x1829   : > { %3194 = vrot.lane.b32.xlu1 %v7237_v30, %s7773_s7 }
0x1899   : > { %v3019_v52 = vpop.xlane.xlu1 %3018 }
0x189a   : > { %v3020_v33 = vsub.f32 %v3013_v41, %v3019_v52  ;;  %v3185_v53 = vpop.xlane.xlu0 %3184  ;;  %v5175_v41 = vld [vmem:[%s7748_s6 + $0x30] sm:$0xff] }
0x189b   : > { %v3186_v54 = vsub.f32 %v3179_v5, %v3185_v53  ;;  %v5844_v5 = vpack.c.bf16 %v5176_v42, %v5175_v41 }
0x189c   : > { %v3021_v56 = vmul.f32 1.442695, %v3020_v33  ;;  %v5178_v33 = vld [vmem:[%s7749_s13 + $0x1] ss:$0 sm:$0xff] }
0x189d   : > { %v3187_v57 = vmul.f32 1.442695, %v3186_v54  ;;  %5845 = vmatpush3.bf16.msra.mxu0 %v5844_v5 }
0x189e   : > { %6123 = vpow2.f32 %v3021_v56  ;;  %5852 = vmatprep.subr.bf16.mxu0 %v6445_v12 }
0x189f   : > { %6125 = vpow2.f32 %v3187_v57 }
0x18a1   : > { %v3350_v7 = vpop.xlane.xlu0 %3349 }
0x18a2   : > { %v3351_v8 = vsub.f32 %v3344_v46, %v3350_v7  ;;  %v5185_v7 = vld [vmem:[%s7750_s16 + $0x38] sm:$0xff] }
0x18a4   : > { %v3352_v10 = vmul.f32 1.442695, %v3351_v8 }
0x18a5   : > { %v3515_v58 = vpop.xlane.xlu1 %3514 }
0x18a6   : > { %v3516_v59 = vsub.f32 %v3509_v49, %v3515_v58 }
0x18a8   : > { %v6124_v60 = vpop.eup %6123  ;;  %v3517_v62 = vmul.f32 1.442695, %v3516_v59 }
0x18a9   : > { %v6126_v63 = vpop.eup %6125  ;;  %v3023_v6 = vsel %vm910_vm2, %v6124_v60, 0.0  ;;  %v3195_v16 = vpop.permute.xlu1 %3194 }
0x18aa   : > { %6127 = vpow2.f32 %v3517_v62  ;;  %3024 = vadd.xlane.f32.xlu0 %v3023_v6  ;;  %v3189_v2 = vsel %vm910_vm2, %v6126_v63, 0.0 }
0x18ab   : > { %3190 = vadd.xlane.f32.xlu1 %v3189_v2  ;;  %6129 = vpow2.f32 %v3352_v10  ;;  %v5182_v2 = vld [vmem:[%s7750_s16 + $0x20] sm:$0xff] }
0x18b4   : > { %v6128_v3 = vpop.eup %6127 }
0x18b5   : > { %v3519_v4 = vsel %vm910_vm2, %v6128_v3, 0.0  ;;  %v6130_v11 = vpop.eup %6129 }
0x18b6   : > { %3520 = vadd.xlane.f32.xlu1 %v3519_v4  ;;  %v3354_v13 = vsel %vm910_vm2, %v6130_v11, 0.0 }
0x18c0   : > { %3029 = vrot.lane.b32.xlu0 %v7237_v30, %s7774_s20 }
0x18c7   : > { %3359 = vrot.lane.b32.xlu1 %v7237_v30, %s7757_s17 }
0x18df   : > { %3355 = vadd.xlane.f32.xlu0 %v3354_v13 }
0x18f5   : > { %3524 = vrot.lane.b32.xlu0 %v7237_v30, %s7758_s11 }
0x1937   : > { %v3025_v19 = vpop.xlane.xlu0 %3024 }
0x1938   : > { %6131 = vrcp.f32 %v3025_v19  ;;  %v3191_v55 = vpop.xlane.xlu1 %3190  ;;  %v5180_v19 = vld [vmem:[%s7751_s9 + $0x3] ss:$0 sm:$0xff] }
0x1939   : > { %6133 = vrcp.f32 %v3191_v55 }
0x193b   : > { %v3030_v20 = vpop.permute.xlu0 %3029 }
0x193c   : > { %5595 = vmatpush3.msra.mxu1 %v3030_v20  ;;  %v5181_v20 = vld [vmem:[%s7752_s15 + $0x3] ss:$0 sm:$0xff] }
0x193d   : > { %5604 = vmatprep.subr.mxu1 %v6432_v9 }
0x1942   : > { %v6132_v14 = vpop.eup %6131 }
0x1943   : > { %v3027_v18 = vmul.f32 %v6132_v14, %v6124_v60  ;;  %v3521_v21 = vpop.xlane.xlu1 %3520  ;;  %v6134_v23 = vpop.eup %6133 }
0x1944   : > { %v3193_v24 = vmul.f32 %v6134_v23, %v6126_v63 }
0x1945   : > { %5597 = vmatmul.mubr.msk.f32.vlgmr.msra.gmra.mrb[34].mxu1 %vm910_vm2, %v3027_v18 }
0x1946   : > { %5605 = vmatpush3.msra.mxu1 %v3195_v16  ;;  %5606 = vmatprep.mubr.msk.f32.mxu1 %vm6433_vm1, %v6432_v9 }
0x1947   : > { %v3360_v27 = vpop.permute.xlu1 %3359  ;;  %5614 = vmatprep.subr.mxu1 %v6432_v9 }
0x1949   : > { %5607 = vmatmul.mubr.msk.f32.vlgmr.msra.gmra.mrb[36].mxu1 %vm910_vm2, %v3193_v24 }
0x194a   : > { %5615 = vmatpush3.msra.mxu1 %v3360_v27  ;;  %5616 = vmatprep.mubr.msk.f32.mxu1 %vm6433_vm1, %v6432_v9 }
0x194b   : > { %5624 = vmatprep.subr.mxu1 %v6432_v9 }
0x196c   : > { %v3356_v28 = vpop.xlane.xlu0 %3355 }
0x196d   : > { %6135 = vrcp.f32 %v3356_v28 }
0x196e   : > { %6137 = vrcp.f32 %v3521_v21 }
0x1970   : > { %v3525_v31 = vpop.permute.xlu0 %3524 }
0x1977   : > { %v6136_v29 = vpop.eup %6135 }
0x1978   : > { %v3358_v30 = vmul.f32 %v6136_v29, %v6130_v11  ;;  %v6138_v61 = vpop.eup %6137 }
0x1979   : > { %v3523_v32 = vmul.f32 %v6138_v61, %v6128_v3  ;;  %v5183_v3 = vld [vmem:[%s7750_s16 + $0x28] sm:$0xff] }
0x197a   : > { %5617 = vmatmul.mubr.msk.f32.vlgmr.msra.gmra.mrb[38].mxu1 %vm910_vm2, %v3358_v30  ;;  %v5847_v4 = vpack.c.bf16 %v5183_v3, %v5182_v2 }
0x197b   : > { %5625 = vmatpush3.msra.mxu1 %v3525_v31  ;;  %5626 = vmatprep.mubr.msk.f32.mxu1 %vm6433_vm1, %v6432_v9 }
0x197c   : > { %5846 = vmatprep.subr.bf16.mxu1 %v6445_v12 }
0x197e   : > { %5627 = vmatmul.mubr.msk.f32.vlgmr.msra.gmra.mrb[40].mxu1 %vm910_vm2, %v3523_v32 }
0x197f   : > { %5648 = vmatprep.mubr.msk.f32.mxu1 %vm6433_vm1, %v6432_v9  ;;  %5848 = vmatpush3.bf16.msra.mxu1 %v5847_v4 }
0x1980   : > { %5849 = vmatprep.subr.bf16.mxu1 %v6445_v12 }
0x1a18   : > { %v3101_v37 = vpop.f32.mrb[34].mxu1 }
0x1a19   : > { %v5598_v38 = vpop.f32.mrb[35].mxu1 }
0x1a1c   : > { %v3266_v39 = vpop.f32.mrb[36].mxu1 }
0x1a1d   : > { %3601 = vrot.lane.b32.xlu1 %v3266_v39, %s7760_s10  ;;  %v5608_v40 = vpop.f32.mrb[37].mxu1 }
0x1a4d   : > { %v3431_v43 = vpop.f32.mrb[38].mxu1 }
0x1a4e   : > { %3605 = vrot.lane.b32.xlu0 %v3431_v43, %s7759_s29  ;;  %v5618_v44 = vpop.f32.mrb[39].mxu1 }
0x1a51   : > { %v3596_v45 = vpop.f32.mrb[40].mxu1 }
0x1a52   : > { %3609 = vrot.lane.b32.xlu1 %v3596_v45, %s7761_s28  ;;  %v5628_v46 = vpop.f32.mrb[41].mxu1 }
0x1a8f   : > { %v3602_v47 = vpop.permute.xlu1 %3601 }
0x1a90   : > { %v3612_v49 = vsel %vm910_vm2, %v3101_v37, %v3602_v47 }
0x1ac0   : > { %v3606_v48 = vpop.permute.xlu0 %3605 }
0x1ac1   : > { %v3613_v50 = vsel %vm1582_vm3, %v3612_v49, %v3606_v48 }
0x1ac4   : > { %v3610_v51 = vpop.permute.xlu1 %3609 }
0x1ac5   : > { %v3614_v52 = vsel %vm1584_vm4, %v3613_v50, %v3610_v51 }
0x1ac6   : > { %5638 = vmatmul.mubr.msk.f32.vlgmr.msra.gmra.mrb[28].mxu0 %vm796_vm0, %v3614_v52 }
0x1ac7   : > { %5667 = vmatprep.mubr.msk.f32.mxu0 %vm6433_vm1, %v6432_v9 }
0x1b99   : > { %v3697_v53 = vpop.f32.mrb[28].mxu0 }
0x1b9a   : > { %v3698_v54 = vadd.f32 %v5178_v33, %v3697_v53  ;;  %v5639_v56 = vpop.f32.mrb[29].mxu0 }
0x1b9c   : > { %v3701_v57 = vadd.f32 %v3698_v54, %v7221_v25  ;;  %v5184_v25 = vld [vmem:[%s7750_s16 + $0x30] sm:$0xff] }
0x1b9d   : > { %v5850_v8 = vpack.c.bf16 %v5185_v7, %v5184_v25 }
0x1b9e   : > { %v3702_v58 = vsel %vm796_vm0, %v3701_v57, 0.0 }
0x1b9f   : > { %3703 = vadd.xlane.f32.xlu0 %v3702_v58  ;;  %5851 = vmatpush3.bf16.msra.mxu1 %v5850_v8 }
0x1ba0   : > { %5863 = vmatprep.subr.bf16.mxu1 %v6445_v12 }
0x1c2c   : > { %v3704_v59 = vpop.xlane.xlu0 %3703 }
0x1c2d   : > { %v3705_v60 = vmul.f32 0.03125, %v3704_v59 }
0x1c2f   : > { %v3706_v62 = vsub.f32 %v3701_v57, %v3705_v60 }
0x1c31   : > { %v3707_v63 = vmul.f32 %v3706_v62, %v3706_v62 }
0x1c33   : > { %v3708_v6 = vsel %vm796_vm0, %v3707_v63, 0.0 }
0x1c34   : > { %3709 = vadd.xlane.f32.xlu1 %v3708_v6 }
0x1cc1   : > { %v3710_v10 = vpop.xlane.xlu1 %3709 }
0x1cc2   : > { %v3711_v11 = vmul.f32 0.03125, %v3710_v10 }
0x1cc4   : > { %v3712_v13 = vadd.f32 1e-05, %v3711_v11 }
0x1cc6   : > { %6139 = vrsqrt.f32 %v3712_v13 }
0x1cd0   : > { %v6140_v16 = vpop.eup %6139 }
0x1cd1   : > { %v3714_v55 = vmul.f32 %v6140_v16, %v3706_v62 }
0x1cd3   : > { %v3721_v14 = vmul.f32 %v5180_v19, %v3714_v55 }
0x1cd5   : > { %v7347_v18 = vadd.f32 %v5181_v20, %v3721_v14 }
0x1cd7   : > { %v3729_v21 = vadd.f32 %v7225_v26, %v7347_v18 }
0x1cd9   : > { %3730 = vst.msk [vmem:[#allocation2] sm:$0xff] %vm796_vm0, %v3729_v21 }
0x1ce0   : > { %v3731_v23 = vld [vmem:[#allocation2] sm:$0xff] }
0x1ce1   : > { %5649 = vmatmul.mubr.msk.f32.vlgmr.msra.gmra.mrb[42].mxu1 %vm796_vm0, %v3731_v23 }
0x1ce2   : > { %5651 = vmatprep.mubr.msk.f32.mxu1 %vm6433_vm1, %v6432_v9 }
0x1ce5   : > { %5652 = vmatmul.mubr.msk.f32.gmra.mrb[44].mxu1 %vm796_vm0, %v7025_v0 }
0x1ce6   : > { %5654 = vmatprep.mubr.msk.f32.mxu1 %vm6433_vm1, %v6432_v9 }
0x1ce9   : > { %5655 = vmatmul.mubr.msk.f32.gmra.mrb[46].mxu1 %vm796_vm0, %v7031_v1  ;;  %v5187_v1 = vld [vmem:[%s7753_s27 + $0x1] ss:$0 sm:$0xff] }
0x1cea   : > { %5657 = vmatprep.mubr.msk.f32.mxu1 %vm6433_vm1, %v6432_v9 }
0x1ced   : > { %5658 = vmatmul.mubr.msk.f32.gmra.mrb[48].mxu1 %vm796_vm0, %v7044_v15 }
0x1cee   : > { %5660 = vmatprep.mubr.msk.f32.mxu1 %vm6433_vm1, %v6432_v9 }
0x1cf1   : > { %5661 = vmatmul.mubr.msk.f32.gmra.mrb[50].mxu1 %vm796_vm0, %v7050_v17 }
0x1cf2   : > { %5688 = vmatprep.mubr.msk.f32.mxu1 %vm6433_vm1, %v6432_v9 }
0x1db4   : > { %v3830_v0 = vpop.f32.mrb[42].mxu1 }
0x1db5   : > { %v5650_v26 = vpop.f32.mrb[43].mxu1  ;;  %v3831_v17 = vadd.f32 %v5187_v1, %v3830_v0 }
0x1db7   : > { %v7380_v31 = vmul.f32 0.35355338, %v3831_v17 }
0x1db8   : > { %v3835_v24 = vpop.f32.mrb[44].mxu1 }
0x1db9   : > { %v5653_v27 = vpop.f32.mrb[45].mxu1  ;;  %v3836_v29 = vadd.f32 %v5187_v1, %v3835_v24 }
0x1dbc   : > { %v3840_v28 = vpop.f32.mrb[46].mxu1 }
0x1dbd   : > { %v3841_v15 = vadd.f32 %v5187_v1, %v3840_v28  ;;  %v5656_v30 = vpop.f32.mrb[47].mxu1 }
0x1dbf   : > { %v7374_v61 = vpack.i.bf16 %v3841_v15, %v3836_v29 }
0x1dc0   : > { %v3845_v40 = vpop.f32.mrb[48].mxu1 }
0x1dc1   : > { %6046 = vrot.lane.b32.xlu0 %v7374_v61, %s7768_s3  ;;  %v3846_v41 = vadd.f32 %v5187_v1, %v3845_v40  ;;  %v5659_v42 = vpop.f32.mrb[49].mxu1 }
0x1dc4   : > { %v3850_v5 = vpop.f32.mrb[50].mxu1 }
0x1dc5   : > { %6056 = vrot.lane.b32.xlu0 %v7374_v61, %s7767_s12  ;;  %v3851_v43 = vadd.f32 %v5187_v1, %v3850_v5  ;;  %v5662_v44 = vpop.f32.mrb[51].mxu1 }
0x1dc7   : > { %v7394_v45 = vpack.i.bf16 %v3851_v43, %v3846_v41 }
0x1dc9   : > { %4030 = vrot.lane.b32.xlu0 %v7380_v31, %s7770_s26  ;;  %s7776_s26 = sld [smem:[#allocation29_spill]] }
0x1dcd   : > { %6061 = vrot.lane.b32.xlu0 %v7374_v61, %s7771_s14  ;;  %s7777_s14 = sld [smem:[#allocation27_spill]] }
0x1dd3   : > { %p7782_p1 = scmp.ne.s32.totalorder %s7777_s14, 0 }
0x1e33   : > { %v6047_v32 = vpop.permute.xlu0 %6046 }
0x1e34   : > { %v6049_v34 = vunpack.i.h.bf16 %v6047_v32  ;;  %v6048_v35 = vunpack.i.l.bf16 %v6047_v32 }
0x1e36   : > { %v5853_v36 = vpack.c.bf16 %v6049_v34, %v6048_v35 }
0x1e37   : > { %v6057_v33 = vpop.permute.xlu0 %6056 }
0x1e38   : > { %5855 = vmatpush3.bf16.xpose.msk.msra.mxu0 %vm7066_vm5, %v5853_v36  ;;  %v6059_v59 = vunpack.i.h.bf16 %v6057_v33  ;;  %v6058_v60 = vunpack.i.l.bf16 %v6057_v33 }
0x1e39   : > { %5856 = vmatprep.subr.bf16.mxu0 %v6445_v12 }
0x1e3a   : > { %v5860_v63 = vpack.c.bf16 %v6059_v59, %v6058_v60 }
0x1e3b   : > { %v4031_v58 = vpop.permute.xlu0 %4030 }
0x1e3f   : > { %5668 = vmatmul.mubr.msk.f32.vlgmr.msra.gmra.mrb[30].mxu0 %vm910_vm2, %v7380_v31  ;;  %v6062_v6 = vpop.permute.xlu0 %6061 }
0x1e40   : > { %5674 = vmatprep.mubr.msk.f32.mxu0 %vm6433_vm1, %v6432_v9  ;;  %v6064_v2 = vunpack.i.h.bf16 %v6062_v6  ;;  %v6063_v3 = vunpack.i.l.bf16 %v6062_v6  ;;  %v4562_v6 = vld [vmem:[#allocation11 + $0x20] sm:$0xff] }
0x1e42   : > { %v5867_v4 = vpack.c.bf16 %v6064_v2, %v6063_v3  ;;  %v4563_v2 = vld [vmem:[#allocation11 + $0x28] sm:$0xff]  ;;  %v4564_v3 = vld [vmem:[#allocation11 + $0x30] sm:$0xff] }
0x1f12   : > { %v3934_v37 = vpop.f32.mrb[30].mxu0 }
0x1f13   : > { %v5669_v38 = vpop.f32.mrb[31].mxu0  ;;  %v3938_v39 = vsel %vm1582_vm3, %v3934_v37, -inf }
0x1f14   : > { %3939 = vmax.xlane.f32.xlu1 %v3938_v39 }
0x1fa1   : > { %v3940_v46 = vpop.xlane.xlu1 %3939 }
0x1fa2   : > { %v3941_v47 = vsub.f32 %v3934_v37, %v3940_v46 }
0x1fa4   : > { %v3942_v48 = vmul.f32 1.442695, %v3941_v47 }
0x1fa6   : > { %6141 = vpow2.f32 %v3942_v48 }
0x1fb0   : > { %v6142_v49 = vpop.eup %6141 }
0x1fb1   : > { %v3944_v50 = vsel %vm1582_vm3, %v6142_v49, 0.0 }
0x1fb2   : > { %3945 = vadd.xlane.f32.xlu1 %v3944_v50 }
0x1fc3   : > { %6051 = vrot.lane.b32.xlu1 %v7394_v45, %s7774_s20  ;;  %s7778_s20 = sld [smem:[#allocation49_spill]] }
0x1fc7   : > { %4202 = vrot.lane.b32.xlu1 %v7380_v31, %s7769_s23  ;;  %s7775_s23 = sld [smem:[#allocation30_spill]] }
0x1fcd   : > { %s787_s5 = scalar_lea.vmem [#allocation14], %s7775_s23 }
0x1fce   : > { %s4924_s6 = sshll.u32 %s787_s5, 4  ;;  %s7536_s6 = int_to_ptr.vmem [resolvable:$true] %s4924_s6 }
0x203f   : > { %v3946_v51 = vpop.xlane.xlu1 %3945 }
0x2040   : > { %6143 = vrcp.f32 %v3946_v51 }
0x2043   : > { %v6052_v52 = vpop.permute.xlu1 %6051 }
0x2044   : > { %v6054_v53 = vunpack.i.h.bf16 %v6052_v52  ;;  %v6053_v54 = vunpack.i.l.bf16 %v6052_v52 }
0x2046   : > { %v5857_v56 = vpack.c.bf16 %v6054_v53, %v6053_v54 }
0x2047   : > { %v4203_v25 = vpop.permute.xlu1 %4202 }
0x2048   : > { %5858 = vmatpush3.bf16.msra.mxu0 %v5857_v56 }
0x2049   : > { %5859 = vmatprep.subr.bf16.mxu0 %v6445_v12 }
0x204a   : > { %v6144_v57 = vpop.eup %6143 }
0x204b   : > { %v3948_v62 = vmul.f32 %v6144_v57, %v6142_v49 }
0x204d   : > { %5675 = vmatmul.mubr.msk.f32.vlgmr.msra.gmra.mrb[32].mxu0 %vm1582_vm3, %v3948_v62 }
0x204e   : > { %5681 = vmatprep.mubr.msk.f32.mxu0 %vm6433_vm1, %v6432_v9 }
0x2051   : > { %5862 = vmatpush3.bf16.xpose.msk.msra.mxu0 %vm7066_vm5, %v5860_v63 }
0x2052   : > { %5866 = vmatprep.subr.bf16.mxu0 %v6445_v12 }
0x2058   : > { %5682 = vmatmul.mubr.msk.f32.vlgmr.msra.gmra.mrb[34].mxu0 %vm910_vm2, %v4031_v58 }
0x2059   : > { %5869 = vmatpush3.bf16.xpose.msk.msra.mxu0 %vm7066_vm5, %v5867_v4  ;;  %5695 = vmatprep.mubr.msk.f32.mxu0 %vm6433_vm1, %v6432_v9  ;;  %v5881_v4 = vpack.c.bf16 %v4563_v2, %v4562_v6 }
0x205a   : > { %5877 = vmatprep.subr.bf16.mxu0 %v6445_v12 }
0x2060   : > { %5696 = vmatmul.mubr.msk.f32.vlgmr.msra.gmra.mrb[36].mxu0 %vm910_vm2, %v4203_v25  ;;  %v4565_v25 = vld [vmem:[#allocation11 + $0x38] sm:$0xff] }
0x2061   : > { %5716 = vmatprep.mubr.msk.f32.mxu0 %vm6433_vm1, %v6432_v9 }
0x2120   : > { %v7417_v7 = vpop.f32.mrb[32].mxu0 }
0x2121   : > { %v5676_v8 = vpop.f32.mrb[33].mxu0 }
0x2122   : > { %v5884_v8 = vpack.c.bf16 %v4565_v25, %v4564_v3 }
0x212b   : > { %v4108_v10 = vpop.f32.mrb[34].mxu0 }
0x212c   : > { %v5683_v11 = vpop.f32.mrb[35].mxu0  ;;  %v4112_v13 = vsel %vm1582_vm3, %v4108_v10, -inf }
0x212d   : > { %4113 = vmax.xlane.f32.xlu0 %v4112_v13 }
0x2133   : > { %v4280_v16 = vpop.f32.mrb[36].mxu0 }
0x2134   : > { %v5697_v19 = vpop.f32.mrb[37].mxu0  ;;  %v4284_v55 = vsel %vm1582_vm3, %v4280_v16, -inf }
0x2135   : > { %4285 = vmax.xlane.f32.xlu1 %v4284_v55 }
0x2146   : > { %6066 = vrot.lane.b32.xlu1 %v7394_v45, %s7773_s7 }
0x214a   : > { %6076 = vrot.lane.b32.xlu1 %v7374_v61, %s7772_s30 }
0x214e   : > { %4374 = vrot.lane.b32.xlu1 %v7380_v31, %s7756_s1  ;;  %s7780_s1 = sld [smem:[#allocation51_spill]] }
0x21ba   : > { %v4114_v20 = vpop.xlane.xlu0 %4113 }
0x21bb   : > { %v4115_v14 = vsub.f32 %v4108_v10, %v4114_v20 }
0x21bd   : > { %v4116_v21 = vmul.f32 1.442695, %v4115_v14 }
0x21bf   : > { %6145 = vpow2.f32 %v4116_v21  ;;  %v5210_v21 = vld [vmem:[%s7762_s4 + $0x1] ss:$0 sm:$0xff] }
0x21c2   : > { %v4286_v23 = vpop.xlane.xlu1 %4285 }
0x21c3   : > { %v4287_v0 = vsub.f32 %v4280_v16, %v4286_v23 }
0x21c5   : > { %v4288_v26 = vmul.f32 1.442695, %v4287_v0 }
0x21c6   : > { %v6067_v24 = vpop.permute.xlu1 %6066 }
0x21c7   : > { %6147 = vpow2.f32 %v4288_v26  ;;  %v6069_v27 = vunpack.i.h.bf16 %v6067_v24  ;;  %v6068_v1 = vunpack.i.l.bf16 %v6067_v24 }
0x21c9   : > { %v6146_v28 = vpop.eup %6145  ;;  %v5864_v29 = vpack.c.bf16 %v6069_v27, %v6068_v1 }
0x21ca   : > { %v4118_v15 = vsel %vm1582_vm3, %v6146_v28, 0.0  ;;  %v6077_v39 = vpop.permute.xlu1 %6076 }
0x21cb   : > { %4119 = vadd.xlane.f32.xlu0 %v4118_v15  ;;  %5865 = vmatpush3.bf16.msra.mxu1 %v5864_v29  ;;  %v6079_v41 = vunpack.i.h.bf16 %v6077_v39  ;;  %v6078_v42 = vunpack.i.l.bf16 %v6077_v39  ;;  %v5221_v39 = vld [vmem:[%s7763_s8 + $0x60] sm:$0xff] }
0x21cc   : > { %5870 = vmatprep.subr.bf16.mxu1 %v6445_v12 }
0x21cd   : > { %v5874_v43 = vpack.c.bf16 %v6079_v41, %v6078_v42 }
0x21ce   : > { %v4375_v44 = vpop.permute.xlu1 %4374 }
0x21d1   : > { %v6148_v30 = vpop.eup %6147 }
0x21d2   : > { %v4290_v61 = vsel %vm1582_vm3, %v6148_v30, 0.0 }
0x21d3   : > { %4291 = vadd.xlane.f32.xlu0 %v4290_v61 }
0x21e9   : > { %6071 = vrot.lane.b32.xlu0 %v7394_v45, %s7757_s17  ;;  %s7781_s17 = smov %s7780_s1 }
0x2258   : > { %v4120_v17 = vpop.xlane.xlu0 %4119 }
0x2259   : > { %6149 = vrcp.f32 %v4120_v17  ;;  %v4678_v17 = vld [vmem:[#allocation12 + $0x30] sm:$0xff] }
0x2260   : > { %v4292_v31 = vpop.xlane.xlu0 %4291 }
0x2261   : > { %6151 = vrcp.f32 %v4292_v31  ;;  %v4679_v31 = vld [vmem:[#allocation12 + $0x38] sm:$0xff] }
0x2263   : > { %v6150_v32 = vpop.eup %6149 }
0x2264   : > { %v4122_v34 = vmul.f32 %v6150_v32, %v6146_v28  ;;  %v6072_v35 = vpop.permute.xlu0 %6071  ;;  %v5890_v32 = vpack.c.bf16 %v4679_v31, %v4678_v17 }
0x2265   : > { %v6074_v36 = vunpack.i.h.bf16 %v6072_v35  ;;  %v6073_v37 = vunpack.i.l.bf16 %v6072_v35  ;;  %v5219_v35 = vld [vmem:[%s7763_s8 + $0x50] sm:$0xff] }
0x2266   : > { %5689 = vmatmul.mubr.msk.f32.vlgmr.msra.gmra.mrb[52].mxu1 %vm1582_vm3, %v4122_v34  ;;  %v5218_v34 = vld [vmem:[%s7763_s8 + $0x48] sm:$0xff] }
0x2267   : > { %v5871_v38 = vpack.c.bf16 %v6074_v36, %v6073_v37  ;;  %5702 = vmatprep.mubr.msk.f32.mxu1 %vm6433_vm1, %v6432_v9  ;;  %v5220_v37 = vld [vmem:[%s7763_s8 + $0x58] sm:$0xff] }
0x2269   : > { %5872 = vmatpush3.bf16.msra.mxu1 %v5871_v38  ;;  %v5896_v38 = vpack.c.bf16 %v5220_v37, %v5219_v35 }
0x226a   : > { %5873 = vmatprep.subr.bf16.mxu1 %v6445_v12 }
0x226b   : > { %v6152_v40 = vpop.eup %6151 }
0x226c   : > { %v4294_v5 = vmul.f32 %v6152_v40, %v6148_v30  ;;  %v4677_v30 = vld [vmem:[#allocation12 + $0x28] sm:$0xff]  ;;  %v5222_v40 = vld [vmem:[%s7763_s8 + $0x68] sm:$0xff] }
0x226d   : > { %v5899_v41 = vpack.c.bf16 %v5222_v40, %v5221_v39 }
0x226e   : > { %5703 = vmatmul.mubr.msk.f32.vlgmr.msra.gmra.mrb[54].mxu1 %vm1582_vm3, %v4294_v5 }
0x226f   : > { %5709 = vmatprep.mubr.msk.f32.mxu1 %vm6433_vm1, %v6432_v9 }
0x2272   : > { %5876 = vmatpush3.bf16.xpose.msk.msra.mxu1 %vm7066_vm5, %v5874_v43 }
0x2273   : > { %5886 = vmatprep.subr.bf16.mxu1 %v6445_v12 }
0x2279   : > { %5710 = vmatmul.mubr.msk.f32.vlgmr.msra.gmra.mrb[56].mxu1 %vm910_vm2, %v4375_v44 }
0x227a   : > { %5738 = vmatprep.mubr.msk.f32.mxu1 %vm6433_vm1, %v6432_v9 }
0x2339   : > { %v4198_v46 = vpop.f32.mrb[52].mxu1 }
0x233a   : > { %v5690_v47 = vpop.f32.mrb[53].mxu1 }
0x2341   : > { %v4370_v48 = vpop.f32.mrb[54].mxu1 }
0x2342   : > { %v5704_v49 = vpop.f32.mrb[55].mxu1 }
0x234c   : > { %v4452_v50 = vpop.f32.mrb[56].mxu1 }
0x234d   : > { %v5711_v51 = vpop.f32.mrb[57].mxu1  ;;  %v4456_v52 = vsel %vm1582_vm3, %v4452_v50, -inf }
0x234e   : > { %4457 = vmax.xlane.f32.xlu0 %v4456_v52  ;;  %v5224_v51 = vld [vmem:[%s7763_s8 + $0x78] sm:$0xff] }
0x2364   : > { %6081 = vrot.lane.b32.xlu0 %v7394_v45, %s7758_s11  ;;  %s7534_s11 = scalar_lea.hbm %s7780_s1, %s5233_s0 }
0x2368   : > { %4551 = vrot.lane.b32.xlu0 %v4370_v48, %s7759_s29  ;;  %v5213_v48 = vld [vmem:[%s7752_s15 + $0x4] ss:$0 sm:$0xff]  ;;  %s4911_s29 = scalar_lea.sflag [#allocation5], %s7776_s26 }
0x23db   : > { %v4458_v22 = vpop.xlane.xlu0 %4457 }
0x23dc   : > { %v4459_v33 = vsub.f32 %v4452_v50, %v4458_v22  ;;  %v5215_v22 = vld [vmem:[%s7764_s18 + $0x1] ss:$0 sm:$0xff] }
0x23de   : > { %v4460_v53 = vmul.f32 1.442695, %v4459_v33 }
0x23df   : > { %v6082_v54 = vpop.permute.xlu0 %6081 }
0x23e0   : > { %6153 = vpow2.f32 %v4460_v53  ;;  %v6084_v56 = vunpack.i.h.bf16 %v6082_v54  ;;  %v6083_v57 = vunpack.i.l.bf16 %v6082_v54 }
0x23e2   : > { %v5878_v58 = vpack.c.bf16 %v6084_v56, %v6083_v57  ;;  %v5226_v57 = vld [vmem:[%s7765_s21 + $0x1] ss:$0 sm:$0xff] }
0x23e3   : > { %v4552_v19 = vpop.permute.xlu0 %4551 }
0x23e4   : > { %5879 = vmatpush3.bf16.msra.mxu0 %v5878_v58 }
0x23e5   : > { %5880 = vmatprep.subr.bf16.mxu0 %v6445_v12 }
0x23ea   : > { %v6154_v59 = vpop.eup %6153 }
0x23eb   : > { %v4462_v60 = vsel %vm1582_vm3, %v6154_v59, 0.0 }
0x23ec   : > { %4463 = vadd.xlane.f32.xlu1 %v4462_v60 }
0x23fd   : > { %4547 = vrot.lane.b32.xlu1 %v4198_v46, %s7760_s10  ;;  %v5212_v46 = vld [vmem:[%s7751_s9 + $0x4] ss:$0 sm:$0xff]  ;;  %s6340_s10 = scalar_lea.vmem %s7536_s6, 128 }
0x23fe   : > { %p6341_p8 = scmp.ne.s32.totalorder %s7536_s6, %s6340_s10 }
0x2400   : > { %p6342_p5 = pnand %p6341_p8, %p7782_p1 }
0x2402   : > { %p6343_p11 = pneg %p6342_p5 }
0x2479   : > { %v4464_v45 = vpop.xlane.xlu1 %4463 }
0x247a   : > { %6155 = vrcp.f32 %v4464_v45 }
0x247d   : > { %v4548_v13 = vpop.permute.xlu1 %4547 }
0x247e   : > { %v4558_v16 = vsel %vm910_vm2, %v7417_v7, %v4548_v13  ;;  %v5228_v13 = vld [vmem:[%s7751_s9 + $0x5] ss:$0 sm:$0xff] }
0x247f   : > { %v4559_v55 = vsel %vm1582_vm3, %v4558_v16, %v4552_v19  ;;  %v5229_v19 = vld [vmem:[%s7752_s15 + $0x5] ss:$0 sm:$0xff] }
0x2484   : > { %v6156_v62 = vpop.eup %6155 }
0x2485   : > { %v4466_v63 = vmul.f32 %v6156_v62, %v6154_v59 }
0x2487   : > { %5717 = vmatmul.mubr.msk.f32.vlgmr.msra.gmra.mrb[38].mxu0 %vm1582_vm3, %v4466_v63 }
0x2488   : > { %5727 = vmatprep.mubr.msk.f32.mxu0 %vm6433_vm1, %v6432_v9  ;;  %5882 = vmatpush3.bf16.msra.mxu0 %v5881_v4 }
0x2489   : > { %5883 = vmatprep.subr.bf16.mxu0 %v6445_v12 }
0x248c   : > { %5885 = vmatpush3.bf16.msra.mxu0 %v5884_v8 }
0x248d   : > { %5892 = vmatprep.subr.bf16.mxu0 %v6445_v12 }
0x255a   : > { %v4542_v10 = vpop.f32.mrb[38].mxu0 }
0x255b   : > { %4555 = vrot.lane.b32.xlu1 %v4542_v10, %s7761_s28  ;;  %v5718_v11 = vpop.f32.mrb[39].mxu0  ;;  %s6344_s28 = sshll.u32 %s6449_s2, 4  ;;  %s6345_s28 = int_to_ptr.vmem [resolvable:$false] %s6344_s28 }
0x255c   : > { %s6346_s12 = scalar_lea.vmem %s6345_s28, 256  ;;  %p6347_p4 = scmp.lt.s32.totalorder %s7536_s6, %s6345_s28 }
0x255d   : > { %p6348_p13 = scmp.lt.s32.totalorder %s6346_s12, %s6340_s10 }
0x255f   : > { %p6349_p0 = por %p6348_p13, %p6347_p4 }
0x2561   : > { %p6350_p7 = pnand %p6349_p0, %p6343_p11 }
0x25cd   : > { %v4556_v20 = vpop.permute.xlu1 %4555 }
0x25ce   : > { %v4560_v14 = vsel %vm1584_vm4, %v4559_v55, %v4556_v20 }
0x25cf   : > { %5728 = vmatmul.mubr.msk.f32.vlgmr.msra.gmra.mrb[40].mxu0 %vm796_vm0, %v4560_v14 }
0x25d0   : > { %5757 = vmatprep.mubr.msk.f32.mxu0 %vm6433_vm1, %v6432_v9  ;;  %v4676_v9 = vld [vmem:[#allocation12 + $0x20] sm:$0xff] }
0x25d1   : > { %v5887_v61 = vpack.c.bf16 %v4677_v30, %v4676_v9  ;;  %v5231_v9 = vld [vmem:[%s7779_s19] ss:$0 sm:$0xff] }
0x25d3   : > { %5888 = vmatpush3.bf16.msra.mxu1 %v5887_v61 }
0x25d4   : > { %5889 = vmatprep.subr.bf16.mxu1 %v6445_v12 }
0x25d7   : > { %5891 = vmatpush3.bf16.msra.mxu1 %v5890_v32 }
0x26a2   : > { %v4643_v23 = vpop.f32.mrb[40].mxu0 }
0x26a3   : > { %v4644_v0 = vadd.f32 %v5210_v21, %v4643_v23  ;;  %v5729_v26 = vpop.f32.mrb[41].mxu0 }
0x26a5   : > { %v4647_v7 = vadd.f32 %v4644_v0, %v7347_v18  ;;  %v5217_v18 = vld [vmem:[%s7763_s8 + $0x40] sm:$0xff] }
0x26a6   : > { %v5893_v36 = vpack.c.bf16 %v5218_v34, %v5217_v18 }
0x26a7   : > { %v4648_v24 = vsel %vm796_vm0, %v4647_v7, 0.0 }
0x26a8   : > { %4649 = vadd.xlane.f32.xlu0 %v4648_v24  ;;  %5894 = vmatpush3.bf16.msra.mxu0 %v5893_v36 }
0x26a9   : > { %5895 = vmatprep.subr.bf16.mxu0 %v6445_v12 }
0x26ac   : > { %5897 = vmatpush3.bf16.msra.mxu0 %v5896_v38 }
0x26ad   : > { %5898 = vmatprep.subr.bf16.mxu0 %v6445_v12 }
0x26b0   : > { %5900 = vmatpush3.bf16.msra.mxu0 %v5899_v41 }
0x26b1   : > { %5901 = vmatprep.subr.bf16.mxu0 %v6445_v12  ;;  %v5223_v12 = vld [vmem:[%s7763_s8 + $0x70] sm:$0xff] }
0x26b2   : > { %v5902_v52 = vpack.c.bf16 %v5224_v51, %v5223_v12 }
0x26b4   : > { %5903 = vmatpush3.bf16.msra.mxu0 %v5902_v52 }
0x2735   : > { %v4650_v27 = vpop.xlane.xlu0 %4649 }
0x2736   : > { %v4651_v1 = vmul.f32 0.03125, %v4650_v27 }
0x2738   : > { %v4652_v28 = vsub.f32 %v4647_v7, %v4651_v1 }
0x273a   : > { %v4653_v29 = vmul.f32 %v4652_v28, %v4652_v28 }
0x273c   : > { %v4654_v15 = vsel %vm796_vm0, %v4653_v29, 0.0  ;;  %v5230_v29 = vld [vmem:[%s7778_s20] ss:$0 sm:$0xff] }
0x273d   : > { %4655 = vadd.xlane.f32.xlu1 %v4654_v15 }
0x27ca   : > { %v4656_v42 = vpop.xlane.xlu1 %4655 }
0x27cb   : > { %v4657_v5 = vmul.f32 0.03125, %v4656_v42 }
0x27cd   : > { %v4658_v43 = vadd.f32 1e-05, %v4657_v5 }
0x27cf   : > { %6157 = vrsqrt.f32 %v4658_v43 }
0x27d9   : > { %v6158_v44 = vpop.eup %6157 }
0x27da   : > { %v4660_v47 = vmul.f32 %v6158_v44, %v4652_v28 }
0x27dc   : > { %v4667_v49 = vmul.f32 %v5212_v46, %v4660_v47 }
0x27de   : > { %v4674_v50 = vadd.f32 %v5213_v48, %v4667_v49 }
0x27e0   : > { %5739 = vmatmul.mubr.msk.f32.vlgmr.msra.gmra.mrb[58].mxu1 %vm796_vm0, %v4674_v50 }
0x28b3   : > { %v4757_v33 = vpop.f32.mrb[58].mxu1 }
0x28b4   : > { %v4758_v53 = vadd.f32 %v5215_v22, %v4757_v33  ;;  %v5740_v54 = vpop.f32.mrb[59].mxu1 }
0x28b6   : > { %v4761_v56 = vmax.f32 %v4758_v53, 0.0 }
0x28b8   : > { %5758 = vmatmul.mubr.msk.f32.vlgmr.msra.gmra.mrb[42].mxu0 %vm2741_vm6, %v4761_v56 }
0x298b   : > { %v4848_v58 = vpop.f32.mrb[42].mxu0 }
0x298c   : > { %v4849_v59 = vadd.f32 %v5226_v57, %v4848_v58  ;;  %v5759_v60 = vpop.f32.mrb[43].mxu0 }
0x298e   : > { %v4852_v45 = vadd.f32 %v4849_v59, %v4674_v50 }
0x2990   : > { %v4853_v62 = vsel %vm796_vm0, %v4852_v45, 0.0 }
0x2991   : > { %4854 = vadd.xlane.f32.xlu0 %v4853_v62 }
0x2a1e   : > { %v4855_v63 = vpop.xlane.xlu0 %4854 }
0x2a1f   : > { %v4856_v6 = vmul.f32 0.03125, %v4855_v63 }
0x2a21   : > { %v4857_v2 = vsub.f32 %v4852_v45, %v4856_v6 }
0x2a23   : > { %v4858_v3 = vmul.f32 %v4857_v2, %v4857_v2 }
0x2a25   : > { %v4859_v4 = vsel %vm796_vm0, %v4858_v3, 0.0 }
0x2a26   : > { %4860 = vadd.xlane.f32.xlu0 %v4859_v4 }
0x2ab3   : > { %v4861_v25 = vpop.xlane.xlu0 %4860 }
0x2ab4   : > { %v4862_v8 = vmul.f32 0.03125, %v4861_v25 }
0x2ab6   : > { %v4863_v10 = vadd.f32 1e-05, %v4862_v8 }
0x2ab8   : > { %6159 = vrsqrt.f32 %v4863_v10 }
0x2ac2   : > { %v6160_v11 = vpop.eup %6159 }
0x2ac3   : > { %v4865_v16 = vmul.f32 %v6160_v11, %v4857_v2 }
0x2ac5   : > { %v4872_v55 = vmul.f32 %v5228_v13, %v4865_v16 }
0x2ac7   : > { %v4879_v20 = vadd.f32 %v5229_v19, %v4872_v55 }
0x2ac9   : > { %v4882_v14 = vsel %vm796_vm0, %v4879_v20, 0.0 }
0x2aca   : > { %4883 = vadd.xlane.f32.xlu1 %v4882_v14 }
0x2b57   : > { %v4884_v21 = vpop.xlane.xlu1 %4883 }
0x2b58   : > { %v4885_v23 = vmul.f32 0.03125, %v4884_v21 }
0x2b5a   : > { %v4886_v0 = vsub.f32 %v4879_v20, %v4885_v23 }
0x2b5c   : > { %v4887_v26 = vmul.f32 %v4886_v0, %v4886_v0 }
0x2b5e   : > { %v4888_v7 = vsel %vm796_vm0, %v4887_v26, 0.0 }
0x2b5f   : > { %4889 = vadd.xlane.f32.xlu0 %v4888_v7 }
0x2bec   : > { %v4890_v24 = vpop.xlane.xlu0 %4889 }
0x2bed   : > { %v4891_v27 = vmul.f32 0.03125, %v4890_v24 }
0x2bef   : > { %v4892_v1 = vadd.f32 1e-05, %v4891_v27 }
0x2bf1   : > { %6161 = vrsqrt.f32 %v4892_v1 }
0x2bfb   : > { %v6162_v28 = vpop.eup %6161 }
0x2bfc   : > { %v4894_v15 = vmul.f32 %v6162_v28, %v4886_v0 }
0x2bfe   : > { %v4901_v30 = vmul.f32 %v5230_v29, %v4894_v15 }
0x2c00   : > { %v4908_v61 = vadd.f32 %v5231_v9, %v4901_v30 }
0x2c02   : > { %4909 = vst.msk [vmem:[%s787_s5] sm:$0xff] %vm796_vm0, %v4908_v61 }
0x2c03   : > { %6353 = shalt.err (!%p6350_p7)
}
0x2c04   : > { %s6354_s3 = scalar_lea.hbm %s7534_s11, 128  ;;  %s6358_s30 = scalar_lea.hbm %s7781_s17, 256 }
0x2c05   : > { %p6355_p3 = scmp.ne.s32.totalorder %s7534_s11, %s6354_s3  ;;  %p6359_p6 = scmp.lt.u32.totalorder %s7534_s11, %s7781_s17 }
0x2c06   : > { %p6360_p2 = scmp.lt.u32.totalorder %s6358_s30, %s6354_s3  ;;  %p6362_p8 = scmp.lt.u32.totalorder %s6354_s3, %s7534_s11 }
0x2c07   : > { %p6356_p12 = pnand %p6355_p3, %p7782_p1 }
0x2c08   : > { %p6361_p9 = por %p6360_p2, %p6359_p6 }
0x2c09   : > { %p6357_p10 = pneg %p6356_p12 }
0x2c0a   : > { %p6363_p5 = por %p6362_p8, %p6361_p9 }
0x2c0c   : > { %p6364_p11 = pnand %p6363_p5, %p6357_p10 }
0x2c0e   : > { %6367 = shalt.err (!%p6364_p11)
}
0x2c0f   : > { %5920 = dma.vmem_to_hbm [thread:$0]  (%p7782_p1), %s7536_s6, 128, %s7534_s11, %s4911_s29  }
0x2c10 PF: > { %s7783_s22 = sld [smem:[#allocation21_spill]]  ;;  %s7784_s24 = sld [smem:[#allocation28_spill]] }
0x2c11   : > { %s7785_s19 = sld [smem:[#allocation24_spill]] }
0x2c16   : > { %s4936_s0 = sand.u32 1, %s7783_s22   ;;  %p7786_p4 = scmp.ne.s32.totalorder %s7784_s24, 0 }
0x2c17   : > { %p7787_p13 = scmp.ge.s32.totalorder %s7785_s19, 2  ;;  %s4937_s5 = scalar_lea.sflag [#allocation5], %s4936_s0 }
0x2c19   : > { %p5943_p0 = pnand %p7787_p13, %p7786_p4 }
0x2c1b   : > { %6405 = dma.done.wait (!%p5943_p0), %s4937_s5, 128  }
0x2c1c   : > { %6407 = vsyncadd (!%p5943_p0), %s4937_s5, 4294967168  ;;  %s7788_s24 = sld [smem:[#allocation25_spill]]  ;;  %s7789_s1 = sld [smem:[#allocation22_spill]] }
0x2c1d   : > { %s7790_s22 = sld [smem:[#allocation23_spill]]  ;;  %s7791_s23 = sld [smem:[#allocation26_spill]] }
0x2c22   : > { %p40_p7 = scmp.ge.s32.totalorder %s7788_s24, 4  }
0x2c24   :  { %42 = sbr.rel (!%p40_p7) target bundleno = 32 (0x20), region = 202 }
0x2c2b   :  { %4942 = vsyncpa [#allocation4], 1 }
0x2c2c   :  { %4944 = vsyncpa [#allocation4 + $0x1], 1 }
0x2c2d   :  { %4945 = vsyncpa [#allocation7], 1 }
0x2c2e   :  { %4947 = vsyncpa [#allocation7 + $0x1], 1 }
0x2c2f   :  { %4948 = vsyncpa [#allocation10], 1 }
0x2c30   :  { %4950 = vsyncpa [#allocation10 + $0x1], 1 }
0x2c31   :  { %4951 = vsyncpa [#allocation13], 1 }
0x2c32   :  { %4952 = vsyncpa [#allocation5], 1 }
0x2c33   :  { %4954 = vsyncpa [#allocation5 + $0x1], 1 }

</bundles_post_ra>
